<compile_context>
chip_gen: v6e
topology: v6e:2x2x1
jax: 0.10.0
libtpu: 0.0.40
codegen_flags: <defaults>
</compile_context>

<pallas_src>
import functools

import jax
import jax.numpy as jnp
from jax import lax
from jax.experimental import pallas as pl
from jax.experimental.pallas import tpu as pltpu

_VMEM_LIMIT = 32 * 1024 * 1024  # conservative scoped-VMEM budget for all gens


# ----------------------------------------------------------------------------
# small layout helpers
# ----------------------------------------------------------------------------
def _pad_to_multiple(a, mult, axis=-1):
    n = a.shape[axis]
    pad = (-n) % mult
    if pad == 0:
        return a
    widths = [(0, 0)] * a.ndim
    widths[axis] = (0, pad)
    return jnp.pad(a, widths)


def _pick_lane_tile(n_pad, max_tile=2048):
    """n_pad is a multiple of 128.  Pick the largest lane tile (multiple of 128)
    dividing n_pad, preferring >=2 grid steps so both v7x TensorCores get work."""
    candidates = [t for t in (2048, 1024, 512, 256, 128) if t <= max_tile]
    for t in candidates:
        if n_pad % t == 0 and n_pad // t >= 2:
            return t
    for t in candidates:
        if n_pad % t == 0:
            return t
    return 128


# ----------------------------------------------------------------------------
# Pallas kernel 1: per-mode complex channel mixing as one real block matmul.
#   out2[m] = W_block[m]^T @ X_stack[m]  with  X_stack = [xr; xi],
#   W_block = [[wr, wi], [-wi, wr]]  so   out2 = [out_r; out_i].
# One pallas_call handles all three spectral axes (3 stacks / 3 weight blocks /
# 3 outputs); grid is over shared lane tiles of N, all modes unrolled inside.
# ----------------------------------------------------------------------------
def _mix_one(x_ref, w_ref, o_ref):
    n_modes = x_ref.shape[0]

    def body(m, carry):
        o_ref[m] = lax.dot_general(
            w_ref[m], x_ref[m],
            (((0,), (0,)), ((), ())),          # contract over 2I
            preferred_element_type=jnp.float32)
        return carry

    lax.fori_loop(0, n_modes, body, 0, unroll=True)


def _make_cmix_kernel(n_sets):
    def kernel(*refs):
        for s in range(n_sets):
            _mix_one(refs[s], refs[n_sets + s], refs[2 * n_sets + s])
    return kernel


def complex_mode_mix_multi(stacks, w_blocks, max_lane_tile=2048):
    # stacks[k]: (M_k, 2I, N) f32 ; w_blocks[k]: (M_k, 2I, 2O) f32
    # -> list of (M_k, 2O, N) f32
    lane_extents = {int(s.shape[-1]) for s in stacks}
    if len(lane_extents) != 1 and len(stacks) > 1:
        # Non-cubic spatial grids: lane extents differ, fall back to per-axis calls.
        return [complex_mode_mix_multi([s], [w], max_lane_tile)[0]
                for s, w in zip(stacks, w_blocks)]

    N = stacks[0].shape[-1]
    stacks_p = [_pad_to_multiple(s, 128, axis=-1) for s in stacks]
    Np = stacks_p[0].shape[-1]
    TN = _pick_lane_tile(Np, max_tile=max_lane_tile)
    n = len(stacks)

    in_specs = (
        [pl.BlockSpec((s.shape[0], s.shape[1], TN), lambda j: (0, 0, j))
         for s in stacks_p]
        + [pl.BlockSpec(w.shape, lambda j: (0, 0, 0)) for w in w_blocks])
    out_specs = [pl.BlockSpec((w.shape[0], w.shape[2], TN), lambda j: (0, 0, j))
                 for w in w_blocks]
    out_shape = [jax.ShapeDtypeStruct((w.shape[0], w.shape[2], Np), jnp.float32)
                 for w in w_blocks]

    outs = pl.pallas_call(
        _make_cmix_kernel(n),
        out_shape=out_shape,
        grid_spec=pltpu.PrefetchScalarGridSpec(
            num_scalar_prefetch=0,
            grid=(Np // TN,),
            in_specs=in_specs,
            out_specs=out_specs),
        compiler_params=pltpu.CompilerParams(
            dimension_semantics=("parallel",),
            vmem_limit_bytes=_VMEM_LIMIT),
    )(*stacks_p, *w_blocks)
    return [o[..., :N] for o in outs]


def _make_w_block(w):
    # w: (I, O, M, 2) -> real block form (M, 2I, 2O)
    wr = jnp.transpose(w[..., 0], (2, 0, 1))     # (M, I, O)
    wi = jnp.transpose(w[..., 1], (2, 0, 1))
    top = jnp.concatenate([wr, wi], axis=-1)     # (M, I, 2O)
    bot = jnp.concatenate([-wi, wr], axis=-1)    # (M, I, 2O)
    return jnp.concatenate([top, bot], axis=1)   # (M, 2I, 2O)


# ----------------------------------------------------------------------------
# Pallas kernel 2: fused (xx+xy+xz) sum + channels-first FeedForward(s).
# One pallas_call reads the three (D, lane-tile) activation slabs once, sums
# them in VMEM, and produces one output per FF head (backcast / forecast).
# Lane axis = B*S1*S2*S3 chunk (lane-dense loads/stores).
# ----------------------------------------------------------------------------
def _make_ff_kernel(n_act, n_ff):
    def kernel(*refs):
        act_refs = refs[:n_act]
        w_refs = refs[n_act: n_act + 4 * n_ff]
        out_refs = refs[n_act + 4 * n_ff:]
        x = act_refs[0][0]                                     # (D, TN) lane-dense
        for r in act_refs[1:]:
            x = x + r[0]
        for k in range(n_ff):
            w1_ref, b1_ref, w2_ref, b2_ref = w_refs[4 * k: 4 * k + 4]
            h = lax.dot_general(w1_ref[...], x, (((0,), (0,)), ((), ())),
                                preferred_element_type=jnp.float32) + b1_ref[...]
            h = jnp.maximum(h, 0.0)
            y = lax.dot_general(w2_ref[...], h, (((0,), (0,)), ((), ())),
                                preferred_element_type=jnp.float32) + b2_ref[...]
            out_refs[k][0] = y.astype(out_refs[k].dtype)
    return kernel


def feed_forward_fused(act_slabs, ff_param_sets, max_lane_tile=2048):
    # act_slabs: list of (B, D, Sf) channels-first slabs, summed inside the kernel.
    B, D, Sf = act_slabs[0].shape
    slabs_p = [_pad_to_multiple(a, 128, axis=-1) for a in act_slabs]
    Np = slabs_p[0].shape[-1]
    TN = _pick_lane_tile(Np, max_tile=max_lane_tile)
    n_act = len(act_slabs)
    n_ff = len(ff_param_sets)

    act_spec = pl.BlockSpec((1, D, TN), lambda b, j: (b, 0, j))
    in_specs = [act_spec] * n_act
    flat_w = []
    for (w1, b1, w2, b2) in ff_param_sets:
        H = w1.shape[1]
        flat_w += [w1, b1.reshape(H, 1), w2, b2.reshape(D, 1)]
        in_specs += [pl.BlockSpec((D, H), lambda b, j: (0, 0)),
                     pl.BlockSpec((H, 1), lambda b, j: (0, 0)),
                     pl.BlockSpec((H, D), lambda b, j: (0, 0)),
                     pl.BlockSpec((D, 1), lambda b, j: (0, 0))]

    outs = pl.pallas_call(
        _make_ff_kernel(n_act, n_ff),
        out_shape=[jax.ShapeDtypeStruct((B, D, Np), jnp.float32)] * n_ff,
        grid_spec=pltpu.PrefetchScalarGridSpec(
            num_scalar_prefetch=0,
            grid=(B, Np // TN),
            in_specs=in_specs,
            out_specs=[pl.BlockSpec((1, D, TN), lambda b, j: (b, 0, j))] * n_ff),
        compiler_params=pltpu.CompilerParams(
            dimension_semantics=("parallel", "parallel"),
            vmem_limit_bytes=_VMEM_LIMIT),
    )(*slabs_p, *flat_w)
    return [o[..., :Sf] for o in outs]


# ----------------------------------------------------------------------------
# Spectral mixing along one spatial axis: rfft -> stack re/im (mode-major) and,
# after the fused Pallas mix, pad + irfft back to a real spatial slab.
# ----------------------------------------------------------------------------
def _prep_axis(x, axis, modes):
    # x: (B, I, S1, S2, S3) real f32 -> (M, 2I, B*dA*dB) stacked rfft modes
    xf = jnp.fft.rfft(x, axis=axis, norm='ortho')              # complex64
    xfm = jnp.moveaxis(xf, axis, -1)[..., :modes]              # (B, I, dA, dB, M)
    B, I, dA, dB, M = xfm.shape
    x_stack = jnp.concatenate([jnp.real(xfm), jnp.imag(xfm)], axis=1)  # (B,2I,dA,dB,M)
    x_stack = jnp.transpose(x_stack, (4, 1, 0, 2, 3)).reshape(M, 2 * I, B * dA * dB)
    return x_stack, (B, dA, dB)


def _finish_axis(out2, meta, axis, modes, S, O):
    # out2: (M, 2O, N) = [re; im] -> (B, O, S1, S2, S3) real slab via irfft
    B, dA, dB = meta
    out_c = (out2[:, :O, :] + 1j * out2[:, O:, :]).astype(jnp.complex64)
    out_c = out_c.reshape(modes, O, B, dA, dB).transpose(2, 1, 3, 4, 0)  # (B,O,dA,dB,M)
    out_c = jnp.pad(out_c, [(0, 0)] * 4 + [(0, S // 2 + 1 - modes)])
    out_c = jnp.moveaxis(out_c, -1, axis)
    return jnp.fft.irfft(out_c, n=S, axis=axis, norm='ortho')


def spectral_conv_forward(x, params, use_fork=True):
    # x: (B, S1, S2, S3, I) channels-last
    x_cf = jnp.transpose(x, (0, 4, 1, 2, 3))                   # (B, I, S1, S2, S3)
    B, I, S1, S2, S3 = x_cf.shape
    O = params['wz'].shape[1]

    axes_cfg = [(-1, params['wz'], S3),
                (-2, params['wy'], S2),
                (-3, params['wx'], S1)]

    stacks, metas, blocks = [], [], []
    for axis, w, S in axes_cfg:
        st, meta = _prep_axis(x_cf, axis, w.shape[2])
        stacks.append(st)
        metas.append(meta)
        blocks.append(_make_w_block(w))

    outs2 = complex_mode_mix_multi(stacks, blocks)              # fused Pallas call

    slabs = []
    for (axis, w, S), o2, meta in zip(axes_cfg, outs2, metas):
        xr = _finish_axis(o2, meta, axis, w.shape[2], S, O)     # (B, O, S1, S2, S3)
        slabs.append(xr.reshape(B, O, S1 * S2 * S3))            # channels-first slab

    ff_sets = [params['backcast']] + ([params['forecast']] if use_fork else [])
    outs = feed_forward_fused(slabs, ff_sets)                   # fused sum + 2 heads

    def to_channels_last(o):
        return jnp.transpose(o.reshape(B, O, S1, S2, S3), (0, 2, 3, 4, 1))

    b = to_channels_last(outs[0])
    f = to_channels_last(outs[1]) if use_fork else None
    return b, f


# ----------------------------------------------------------------------------
# Deterministic parameter init (mirrors shapes from the PyTorch __init__)
# ----------------------------------------------------------------------------
def xavier_normal(key, I, O, M):
    fan_in = I * M * 2
    fan_out = O * M * 2
    std = (2.0 / (fan_in + fan_out)) ** 0.5
    return std * jax.random.normal(key, (I, O, M, 2), jnp.float32)


def init_ff(key, dim, factor):
    H = dim * factor
    k1, k2, k3, k4 = jax.random.split(key, 4)
    w1 = jax.random.normal(k1, (dim, H), jnp.float32) / jnp.sqrt(dim)
    b1 = 0.01 * jax.random.normal(k2, (1, H), jnp.float32)
    w2 = jax.random.normal(k3, (H, dim), jnp.float32) / jnp.sqrt(H)
    b2 = 0.01 * jax.random.normal(k4, (1, dim), jnp.float32)
    return (w1, b1, w2, b2)


def init_params(key, in_dim, out_dim, modes_x, modes_y, modes_z, factor):
    ks = jax.random.split(key, 5)
    return {
        'wx': xavier_normal(ks[0], in_dim, out_dim, modes_x),
        'wy': xavier_normal(ks[1], in_dim, out_dim, modes_y),
        'wz': xavier_normal(ks[2], in_dim, out_dim, modes_z),
        'backcast': init_ff(ks[3], out_dim, factor),
        'forecast': init_ff(ks[4], out_dim, factor),
    }


# ----------------------------------------------------------------------------
# Pure-JAX reference (mirrors the PyTorch forward) for a sanity check
# ----------------------------------------------------------------------------
def _ref_axis(x, w, axis, modes, S, eq):
    xf = jnp.fft.rfft(x, axis=axis, norm='ortho')
    wc = (w[..., 0] + 1j * w[..., 1]).astype(jnp.complex64)
    sl = [slice(None)] * 5
    sl[axis] = slice(0, modes)
    mixed = jnp.einsum(eq, xf[tuple(sl)], wc)
    pad_w = [(0, 0)] * 5
    pad_w[axis] = (0, S // 2 + 1 - modes)
    return jnp.fft.irfft(jnp.pad(mixed, pad_w), n=S, axis=axis, norm='ortho')


def ref_forward(x, params, use_fork=True):
    xc = jnp.transpose(x, (0, 4, 1, 2, 3))
    B, I, S1, S2, S3 = xc.shape
    xz = _ref_axis(xc, params['wz'], -1, params['wz'].shape[2], S3,
                   'bixyz,ioz->boxyz')
    xy = _ref_axis(xc, params['wy'], -2, params['wy'].shape[2], S2,
                   'bixyz,ioy->boxyz')
    xx = _ref_axis(xc, params['wx'], -3, params['wx'].shape[2], S1,
                   'bixyz,iox->boxyz')
    h = jnp.transpose(xx + xy + xz, (0, 2, 3, 4, 1))

    def ff(h, p):
        w1, b1, w2, b2 = p
        z = jnp.maximum(h @ w1 + b1[0], 0.0)
        return z @ w2 + b2[0]

    b = ff(h, params['backcast'])
    f = ff(h, params['forecast']) if use_fork else None
    return b, f


# ----------------------------------------------------------------------------
if __name__ == "__main__":
    key = jax.random.PRNGKey(0)
    k_x, k_p = jax.random.split(key)

    B, S1, S2, S3 = 2, 16, 16, 16
    in_dim = out_dim = 4
    modes_x = modes_y = modes_z = 8
    factor = 2

    x = jax.random.normal(k_x, (B, S1, S2, S3, in_dim), jnp.float32)
    params = init_params(k_p, in_dim, out_dim, modes_x, modes_y, modes_z, factor)

    fwd = jax.jit(functools.partial(spectral_conv_forward, use_fork=True))
    b, f = fwd(x, params)
    jax.block_until_ready((b, f))

    b_ref, f_ref = ref_forward(x, params, use_fork=True)
    assert b.shape == (B, S1, S2, S3, out_dim)
    assert f.shape == (B, S1, S2, S3, out_dim)
    assert jnp.allclose(b, b_ref, rtol=2e-3, atol=2e-3), "backcast mismatch"
    assert jnp.allclose(f, f_ref, rtol=2e-3, atol=2e-3), "forecast mismatch"

    print("KERNEL_OK")
</pallas_src>

<mosaic_0001>
module attributes {stable_mosaic.version = 11 : i64} {
  func.func @kernel(%arg0: i32, %arg1: memref<8x8x256xf32, #tpu.memory_space<vmem>>, %arg2: memref<8x8x256xf32, #tpu.memory_space<vmem>>, %arg3: memref<8x8x256xf32, #tpu.memory_space<vmem>>, %arg4: memref<8x8x8xf32, #tpu.memory_space<vmem>>, %arg5: memref<8x8x8xf32, #tpu.memory_space<vmem>>, %arg6: memref<8x8x8xf32, #tpu.memory_space<vmem>>, %arg7: memref<8x8x256xf32, #tpu.memory_space<vmem>>, %arg8: memref<8x8x256xf32, #tpu.memory_space<vmem>>, %arg9: memref<8x8x256xf32, #tpu.memory_space<vmem>>) attributes {dimension_semantics = [#tpu.dimension_semantics<parallel>], iteration_bounds = array<i64: 2>, scalar_prefetch = 0 : i64, scratch_operands = 0 : i64, tpu.core_type = #tpu.core_type<tc>, window_params = [{transform_indices = @transform_0, window_bounds = array<i64: 8, 8, 256>}, {transform_indices = @transform_1, window_bounds = array<i64: 8, 8, 256>}, {transform_indices = @transform_2, window_bounds = array<i64: 8, 8, 256>}, {pipeline_mode = #tpu.pipeline_mode<synchronous>, transform_indices = @transform_3, window_bounds = array<i64: 8, 8, 8>}, {pipeline_mode = #tpu.pipeline_mode<synchronous>, transform_indices = @transform_4, window_bounds = array<i64: 8, 8, 8>}, {pipeline_mode = #tpu.pipeline_mode<synchronous>, transform_indices = @transform_5, window_bounds = array<i64: 8, 8, 8>}, {transform_indices = @transform_6, window_bounds = array<i64: 8, 8, 256>}, {transform_indices = @transform_7, window_bounds = array<i64: 8, 8, 256>}, {transform_indices = @transform_8, window_bounds = array<i64: 8, 8, 256>}]} {
    %c0_i32 = arith.constant 0 : i32
    %0 = arith.index_cast %c0_i32 : i32 to index
    %c0 = arith.constant 0 : index
    %c0_0 = arith.constant 0 : index
    %1 = vector.load %arg4[%0, %c0, %c0_0] : memref<8x8x8xf32, #tpu.memory_space<vmem>>, vector<1x8x8xf32>
    %2 = vector.shape_cast %1 : vector<1x8x8xf32> to vector<8x8xf32>
    %3 = arith.index_cast %c0_i32 : i32 to index
    %c0_1 = arith.constant 0 : index
    %c0_2 = arith.constant 0 : index
    %4 = vector.load %arg1[%3, %c0_1, %c0_2] : memref<8x8x256xf32, #tpu.memory_space<vmem>>, vector<1x8x256xf32>
    %5 = vector.shape_cast %4 : vector<1x8x256xf32> to vector<8x256xf32>
    %cst = arith.constant dense<0.000000e+00> : vector<8x256xf32>
    %6 = tpu.matmul %2, %5, %cst {dimension_numbers = #tpu.dot_dimension_numbers<[0], [0], [1], [1], [0, 1, 1, 1], [], []>} : vector<8x8xf32>, vector<8x256xf32>, vector<8x256xf32> -> vector<8x256xf32>
    %7 = arith.index_cast %c0_i32 : i32 to index
    %c0_3 = arith.constant 0 : index
    %c0_4 = arith.constant 0 : index
    %8 = vector.load %arg7[%7, %c0_3, %c0_4] : memref<8x8x256xf32, #tpu.memory_space<vmem>>, vector<1x8x256xf32>
    %9 = vector.shape_cast %8 : vector<1x8x256xf32> to vector<8x256xf32>
    %10 = vector.shape_cast %6 : vector<8x256xf32> to vector<1x8x256xf32>
    tpu.vector_store %arg7[%7, %c0_3, %c0_4], %10 {strides = array<i32>} : memref<8x8x256xf32, #tpu.memory_space<vmem>>, vector<1x8x256xf32>,
    %c1_i32 = arith.constant 1 : i32
    %11 = arith.index_cast %c1_i32 : i32 to index
    %c0_5 = arith.constant 0 : index
    %c0_6 = arith.constant 0 : index
    %12 = vector.load %arg4[%11, %c0_5, %c0_6] : memref<8x8x8xf32, #tpu.memory_space<vmem>>, vector<1x8x8xf32>
    %13 = vector.shape_cast %12 : vector<1x8x8xf32> to vector<8x8xf32>
    %14 = arith.index_cast %c1_i32 : i32 to index
    %c0_7 = arith.constant 0 : index
    %c0_8 = arith.constant 0 : index
    %15 = vector.load %arg1[%14, %c0_7, %c0_8] : memref<8x8x256xf32, #tpu.memory_space<vmem>>, vector<1x8x256xf32>
    %16 = vector.shape_cast %15 : vector<1x8x256xf32> to vector<8x256xf32>
    %cst_9 = arith.constant dense<0.000000e+00> : vector<8x256xf32>
    %17 = tpu.matmul %13, %16, %cst_9 {dimension_numbers = #tpu.dot_dimension_numbers<[0], [0], [1], [1], [0, 1, 1, 1], [], []>} : vector<8x8xf32>, vector<8x256xf32>, vector<8x256xf32> -> vector<8x256xf32>
    %18 = arith.index_cast %c1_i32 : i32 to index
    %c0_10 = arith.constant 0 : index
    %c0_11 = arith.constant 0 : index
    %19 = vector.load %arg7[%18, %c0_10, %c0_11] : memref<8x8x256xf32, #tpu.memory_space<vmem>>, vector<1x8x256xf32>
    %20 = vector.shape_cast %19 : vector<1x8x256xf32> to vector<8x256xf32>
    %21 = vector.shape_cast %17 : vector<8x256xf32> to vector<1x8x256xf32>
    tpu.vector_store %arg7[%18, %c0_10, %c0_11], %21 {strides = array<i32>} : memref<8x8x256xf32, #tpu.memory_space<vmem>>, vector<1x8x256xf32>,
    %c2_i32 = arith.constant 2 : i32
    %22 = arith.index_cast %c2_i32 : i32 to index
    %c0_12 = arith.constant 0 : index
    %c0_13 = arith.constant 0 : index
    %23 = vector.load %arg4[%22, %c0_12, %c0_13] : memref<8x8x8xf32, #tpu.memory_space<vmem>>, vector<1x8x8xf32>
    %24 = vector.shape_cast %23 : vector<1x8x8xf32> to vector<8x8xf32>
    %25 = arith.index_cast %c2_i32 : i32 to index
    %c0_14 = arith.constant 0 : index
    %c0_15 = arith.constant 0 : index
    %26 = vector.load %arg1[%25, %c0_14, %c0_15] : memref<8x8x256xf32, #tpu.memory_space<vmem>>, vector<1x8x256xf32>
    %27 = vector.shape_cast %26 : vector<1x8x256xf32> to vector<8x256xf32>
    %cst_16 = arith.constant dense<0.000000e+00> : vector<8x256xf32>
    %28 = tpu.matmul %24, %27, %cst_16 {dimension_numbers = #tpu.dot_dimension_numbers<[0], [0], [1], [1], [0, 1, 1, 1], [], []>} : vector<8x8xf32>, vector<8x256xf32>, vector<8x256xf32> -> vector<8x256xf32>
    %29 = arith.index_cast %c2_i32 : i32 to index
    %c0_17 = arith.constant 0 : index
    %c0_18 = arith.constant 0 : index
    %30 = vector.load %arg7[%29, %c0_17, %c0_18] : memref<8x8x256xf32, #tpu.memory_space<vmem>>, vector<1x8x256xf32>
    %31 = vector.shape_cast %30 : vector<1x8x256xf32> to vector<8x256xf32>
    %32 = vector.shape_cast %28 : vector<8x256xf32> to vector<1x8x256xf32>
    tpu.vector_store %arg7[%29, %c0_17, %c0_18], %32 {strides = array<i32>} : memref<8x8x256xf32, #tpu.memory_space<vmem>>, vector<1x8x256xf32>,
    %c3_i32 = arith.constant 3 : i32
    %33 = arith.index_cast %c3_i32 : i32 to index
    %c0_19 = arith.constant 0 : index
    %c0_20 = arith.constant 0 : index
    %34 = vector.load %arg4[%33, %c0_19, %c0_20] : memref<8x8x8xf32, #tpu.memory_space<vmem>>, vector<1x8x8xf32>
    %35 = vector.shape_cast %34 : vector<1x8x8xf32> to vector<8x8xf32>
    %36 = arith.index_cast %c3_i32 : i32 to index
    %c0_21 = arith.constant 0 : index
    %c0_22 = arith.constant 0 : index
    %37 = vector.load %arg1[%36, %c0_21, %c0_22] : memref<8x8x256xf32, #tpu.memory_space<vmem>>, vector<1x8x256xf32>
    %38 = vector.shape_cast %37 : vector<1x8x256xf32> to vector<8x256xf32>
    %cst_23 = arith.constant dense<0.000000e+00> : vector<8x256xf32>
    %39 = tpu.matmul %35, %38, %cst_23 {dimension_numbers = #tpu.dot_dimension_numbers<[0], [0], [1], [1], [0, 1, 1, 1], [], []>} : vector<8x8xf32>, vector<8x256xf32>, vector<8x256xf32> -> vector<8x256xf32>
    %40 = arith.index_cast %c3_i32 : i32 to index
    %c0_24 = arith.constant 0 : index
    %c0_25 = arith.constant 0 : index
    %41 = vector.load %arg7[%40, %c0_24, %c0_25] : memref<8x8x256xf32, #tpu.memory_space<vmem>>, vector<1x8x256xf32>
    %42 = vector.shape_cast %41 : vector<1x8x256xf32> to vector<8x256xf32>
    %43 = vector.shape_cast %39 : vector<8x256xf32> to vector<1x8x256xf32>
    tpu.vector_store %arg7[%40, %c0_24, %c0_25], %43 {strides = array<i32>} : memref<8x8x256xf32, #tpu.memory_space<vmem>>, vector<1x8x256xf32>,
    %c4_i32 = arith.constant 4 : i32
    %44 = arith.index_cast %c4_i32 : i32 to index
    %c0_26 = arith.constant 0 : index
    %c0_27 = arith.constant 0 : index
    %45 = vector.load %arg4[%44, %c0_26, %c0_27] : memref<8x8x8xf32, #tpu.memory_space<vmem>>, vector<1x8x8xf32>
    %46 = vector.shape_cast %45 : vector<1x8x8xf32> to vector<8x8xf32>
    %47 = arith.index_cast %c4_i32 : i32 to index
    %c0_28 = arith.constant 0 : index
    %c0_29 = arith.constant 0 : index
    %48 = vector.load %arg1[%47, %c0_28, %c0_29] : memref<8x8x256xf32, #tpu.memory_space<vmem>>, vector<1x8x256xf32>
    %49 = vector.shape_cast %48 : vector<1x8x256xf32> to vector<8x256xf32>
    %cst_30 = arith.constant dense<0.000000e+00> : vector<8x256xf32>
    %50 = tpu.matmul %46, %49, %cst_30 {dimension_numbers = #tpu.dot_dimension_numbers<[0], [0], [1], [1], [0, 1, 1, 1], [], []>} : vector<8x8xf32>, vector<8x256xf32>, vector<8x256xf32> -> vector<8x256xf32>
    %51 = arith.index_cast %c4_i32 : i32 to index
    %c0_31 = arith.constant 0 : index
    %c0_32 = arith.constant 0 : index
    %52 = vector.load %arg7[%51, %c0_31, %c0_32] : memref<8x8x256xf32, #tpu.memory_space<vmem>>, vector<1x8x256xf32>
    %53 = vector.shape_cast %52 : vector<1x8x256xf32> to vector<8x256xf32>
    %54 = vector.shape_cast %50 : vector<8x256xf32> to vector<1x8x256xf32>
    tpu.vector_store %arg7[%51, %c0_31, %c0_32], %54 {strides = array<i32>} : memref<8x8x256xf32, #tpu.memory_space<vmem>>, vector<1x8x256xf32>,
    %c5_i32 = arith.constant 5 : i32
    %55 = arith.index_cast %c5_i32 : i32 to index
    %c0_33 = arith.constant 0 : index
    %c0_34 = arith.constant 0 : index
    %56 = vector.load %arg4[%55, %c0_33, %c0_34] : memref<8x8x8xf32, #tpu.memory_space<vmem>>, vector<1x8x8xf32>
    %57 = vector.shape_cast %56 : vector<1x8x8xf32> to vector<8x8xf32>
    %58 = arith.index_cast %c5_i32 : i32 to index
    %c0_35 = arith.constant 0 : index
    %c0_36 = arith.constant 0 : index
    %59 = vector.load %arg1[%58, %c0_35, %c0_36] : memref<8x8x256xf32, #tpu.memory_space<vmem>>, vector<1x8x256xf32>
    %60 = vector.shape_cast %59 : vector<1x8x256xf32> to vector<8x256xf32>
    %cst_37 = arith.constant dense<0.000000e+00> : vector<8x256xf32>
    %61 = tpu.matmul %57, %60, %cst_37 {dimension_numbers = #tpu.dot_dimension_numbers<[0], [0], [1], [1], [0, 1, 1, 1], [], []>} : vector<8x8xf32>, vector<8x256xf32>, vector<8x256xf32> -> vector<8x256xf32>
    %62 = arith.index_cast %c5_i32 : i32 to index
    %c0_38 = arith.constant 0 : index
    %c0_39 = arith.constant 0 : index
    %63 = vector.load %arg7[%62, %c0_38, %c0_39] : memref<8x8x256xf32, #tpu.memory_space<vmem>>, vector<1x8x256xf32>
    %64 = vector.shape_cast %63 : vector<1x8x256xf32> to vector<8x256xf32>
    %65 = vector.shape_cast %61 : vector<8x256xf32> to vector<1x8x256xf32>
    tpu.vector_store %arg7[%62, %c0_38, %c0_39], %65 {strides = array<i32>} : memref<8x8x256xf32, #tpu.memory_space<vmem>>, vector<1x8x256xf32>,
    %c6_i32 = arith.constant 6 : i32
    %66 = arith.index_cast %c6_i32 : i32 to index
    %c0_40 = arith.constant 0 : index
    %c0_41 = arith.constant 0 : index
    %67 = vector.load %arg4[%66, %c0_40, %c0_41] : memref<8x8x8xf32, #tpu.memory_space<vmem>>, vector<1x8x8xf32>
    %68 = vector.shape_cast %67 : vector<1x8x8xf32> to vector<8x8xf32>
    %69 = arith.index_cast %c6_i32 : i32 to index
    %c0_42 = arith.constant 0 : index
    %c0_43 = arith.constant 0 : index
    %70 = vector.load %arg1[%69, %c0_42, %c0_43] : memref<8x8x256xf32, #tpu.memory_space<vmem>>, vector<1x8x256xf32>
    %71 = vector.shape_cast %70 : vector<1x8x256xf32> to vector<8x256xf32>
    %cst_44 = arith.constant dense<0.000000e+00> : vector<8x256xf32>
    %72 = tpu.matmul %68, %71, %cst_44 {dimension_numbers = #tpu.dot_dimension_numbers<[0], [0], [1], [1], [0, 1, 1, 1], [], []>} : vector<8x8xf32>, vector<8x256xf32>, vector<8x256xf32> -> vector<8x256xf32>
    %73 = arith.index_cast %c6_i32 : i32 to index
    %c0_45 = arith.constant 0 : index
    %c0_46 = arith.constant 0 : index
    %74 = vector.load %arg7[%73, %c0_45, %c0_46] : memref<8x8x256xf32, #tpu.memory_space<vmem>>, vector<1x8x256xf32>
    %75 = vector.shape_cast %74 : vector<1x8x256xf32> to vector<8x256xf32>
    %76 = vector.shape_cast %72 : vector<8x256xf32> to vector<1x8x256xf32>
    tpu.vector_store %arg7[%73, %c0_45, %c0_46], %76 {strides = array<i32>} : memref<8x8x256xf32, #tpu.memory_space<vmem>>, vector<1x8x256xf32>,
    %c7_i32 = arith.constant 7 : i32
    %77 = arith.index_cast %c7_i32 : i32 to index
    %c0_47 = arith.constant 0 : index
    %c0_48 = arith.constant 0 : index
    %78 = vector.load %arg4[%77, %c0_47, %c0_48] : memref<8x8x8xf32, #tpu.memory_space<vmem>>, vector<1x8x8xf32>
    %79 = vector.shape_cast %78 : vector<1x8x8xf32> to vector<8x8xf32>
    %80 = arith.index_cast %c7_i32 : i32 to index
    %c0_49 = arith.constant 0 : index
    %c0_50 = arith.constant 0 : index
    %81 = vector.load %arg1[%80, %c0_49, %c0_50] : memref<8x8x256xf32, #tpu.memory_space<vmem>>, vector<1x8x256xf32>
    %82 = vector.shape_cast %81 : vector<1x8x256xf32> to vector<8x256xf32>
    %cst_51 = arith.constant dense<0.000000e+00> : vector<8x256xf32>
    %83 = tpu.matmul %79, %82, %cst_51 {dimension_numbers = #tpu.dot_dimension_numbers<[0], [0], [1], [1], [0, 1, 1, 1], [], []>} : vector<8x8xf32>, vector<8x256xf32>, vector<8x256xf32> -> vector<8x256xf32>
    %84 = arith.index_cast %c7_i32 : i32 to index
    %c0_52 = arith.constant 0 : index
    %c0_53 = arith.constant 0 : index
    %85 = vector.load %arg7[%84, %c0_52, %c0_53] : memref<8x8x256xf32, #tpu.memory_space<vmem>>, vector<1x8x256xf32>
    %86 = vector.shape_cast %85 : vector<1x8x256xf32> to vector<8x256xf32>
    %87 = vector.shape_cast %83 : vector<8x256xf32> to vector<1x8x256xf32>
    tpu.vector_store %arg7[%84, %c0_52, %c0_53], %87 {strides = array<i32>} : memref<8x8x256xf32, #tpu.memory_space<vmem>>, vector<1x8x256xf32>,
    %c8_i32 = arith.constant 8 : i32
    %c0_i32_54 = arith.constant 0 : i32
    %88 = arith.index_cast %c0_i32_54 : i32 to index
    %c0_55 = arith.constant 0 : index
    %c0_56 = arith.constant 0 : index
    %89 = vector.load %arg5[%88, %c0_55, %c0_56] : memref<8x8x8xf32, #tpu.memory_space<vmem>>, vector<1x8x8xf32>
    %90 = vector.shape_cast %89 : vector<1x8x8xf32> to vector<8x8xf32>
    %91 = arith.index_cast %c0_i32_54 : i32 to index
    %c0_57 = arith.constant 0 : index
    %c0_58 = arith.constant 0 : index
    %92 = vector.load %arg2[%91, %c0_57, %c0_58] : memref<8x8x256xf32, #tpu.memory_space<vmem>>, vector<1x8x256xf32>
    %93 = vector.shape_cast %92 : vector<1x8x256xf32> to vector<8x256xf32>
    %cst_59 = arith.constant dense<0.000000e+00> : vector<8x256xf32>
    %94 = tpu.matmul %90, %93, %cst_59 {dimension_numbers = #tpu.dot_dimension_numbers<[0], [0], [1], [1], [0, 1, 1, 1], [], []>} : vector<8x8xf32>, vector<8x256xf32>, vector<8x256xf32> -> vector<8x256xf32>
    %95 = arith.index_cast %c0_i32_54 : i32 to index
    %c0_60 = arith.constant 0 : index
    %c0_61 = arith.constant 0 : index
    %96 = vector.load %arg8[%95, %c0_60, %c0_61] : memref<8x8x256xf32, #tpu.memory_space<vmem>>, vector<1x8x256xf32>
    %97 = vector.shape_cast %96 : vector<1x8x256xf32> to vector<8x256xf32>
    %98 = vector.shape_cast %94 : vector<8x256xf32> to vector<1x8x256xf32>
    tpu.vector_store %arg8[%95, %c0_60, %c0_61], %98 {strides = array<i32>} : memref<8x8x256xf32, #tpu.memory_space<vmem>>, vector<1x8x256xf32>,
    %c1_i32_62 = arith.constant 1 : i32
    %99 = arith.index_cast %c1_i32_62 : i32 to index
    %c0_63 = arith.constant 0 : index
    %c0_64 = arith.constant 0 : index
    %100 = vector.load %arg5[%99, %c0_63, %c0_64] : memref<8x8x8xf32, #tpu.memory_space<vmem>>, vector<1x8x8xf32>
    %101 = vector.shape_cast %100 : vector<1x8x8xf32> to vector<8x8xf32>
    %102 = arith.index_cast %c1_i32_62 : i32 to index
    %c0_65 = arith.constant 0 : index
    %c0_66 = arith.constant 0 : index
    %103 = vector.load %arg2[%102, %c0_65, %c0_66] : memref<8x8x256xf32, #tpu.memory_space<vmem>>, vector<1x8x256xf32>
    %104 = vector.shape_cast %103 : vector<1x8x256xf32> to vector<8x256xf32>
    %cst_67 = arith.constant dense<0.000000e+00> : vector<8x256xf32>
    %105 = tpu.matmul %101, %104, %cst_67 {dimension_numbers = #tpu.dot_dimension_numbers<[0], [0], [1], [1], [0, 1, 1, 1], [], []>} : vector<8x8xf32>, vector<8x256xf32>, vector<8x256xf32> -> vector<8x256xf32>
    %106 = arith.index_cast %c1_i32_62 : i32 to index
    %c0_68 = arith.constant 0 : index
    %c0_69 = arith.constant 0 : index
    %107 = vector.load %arg8[%106, %c0_68, %c0_69] : memref<8x8x256xf32, #tpu.memory_space<vmem>>, vector<1x8x256xf32>
    %108 = vector.shape_cast %107 : vector<1x8x256xf32> to vector<8x256xf32>
    %109 = vector.shape_cast %105 : vector<8x256xf32> to vector<1x8x256xf32>
    tpu.vector_store %arg8[%106, %c0_68, %c0_69], %109 {strides = array<i32>} : memref<8x8x256xf32, #tpu.memory_space<vmem>>, vector<1x8x256xf32>,
    %c2_i32_70 = arith.constant 2 : i32
    %110 = arith.index_cast %c2_i32_70 : i32 to index
    %c0_71 = arith.constant 0 : index
    %c0_72 = arith.constant 0 : index
    %111 = vector.load %arg5[%110, %c0_71, %c0_72] : memref<8x8x8xf32, #tpu.memory_space<vmem>>, vector<1x8x8xf32>
    %112 = vector.shape_cast %111 : vector<1x8x8xf32> to vector<8x8xf32>
    %113 = arith.index_cast %c2_i32_70 : i32 to index
    %c0_73 = arith.constant 0 : index
    %c0_74 = arith.constant 0 : index
    %114 = vector.load %arg2[%113, %c0_73, %c0_74] : memref<8x8x256xf32, #tpu.memory_space<vmem>>, vector<1x8x256xf32>
    %115 = vector.shape_cast %114 : vector<1x8x256xf32> to vector<8x256xf32>
    %cst_75 = arith.constant dense<0.000000e+00> : vector<8x256xf32>
    %116 = tpu.matmul %112, %115, %cst_75 {dimension_numbers = #tpu.dot_dimension_numbers<[0], [0], [1], [1], [0, 1, 1, 1], [], []>} : vector<8x8xf32>, vector<8x256xf32>, vector<8x256xf32> -> vector<8x256xf32>
    %117 = arith.index_cast %c2_i32_70 : i32 to index
    %c0_76 = arith.constant 0 : index
    %c0_77 = arith.constant 0 : index
    %118 = vector.load %arg8[%117, %c0_76, %c0_77] : memref<8x8x256xf32, #tpu.memory_space<vmem>>, vector<1x8x256xf32>
    %119 = vector.shape_cast %118 : vector<1x8x256xf32> to vector<8x256xf32>
    %120 = vector.shape_cast %116 : vector<8x256xf32> to vector<1x8x256xf32>
    tpu.vector_store %arg8[%117, %c0_76, %c0_77], %120 {strides = array<i32>} : memref<8x8x256xf32, #tpu.memory_space<vmem>>, vector<1x8x256xf32>,
    %c3_i32_78 = arith.constant 3 : i32
    %121 = arith.index_cast %c3_i32_78 : i32 to index
    %c0_79 = arith.constant 0 : index
    %c0_80 = arith.constant 0 : index
    %122 = vector.load %arg5[%121, %c0_79, %c0_80] : memref<8x8x8xf32, #tpu.memory_space<vmem>>, vector<1x8x8xf32>
    %123 = vector.shape_cast %122 : vector<1x8x8xf32> to vector<8x8xf32>
    %124 = arith.index_cast %c3_i32_78 : i32 to index
    %c0_81 = arith.constant 0 : index
    %c0_82 = arith.constant 0 : index
    %125 = vector.load %arg2[%124, %c0_81, %c0_82] : memref<8x8x256xf32, #tpu.memory_space<vmem>>, vector<1x8x256xf32>
    %126 = vector.shape_cast %125 : vector<1x8x256xf32> to vector<8x256xf32>
    %cst_83 = arith.constant dense<0.000000e+00> : vector<8x256xf32>
    %127 = tpu.matmul %123, %126, %cst_83 {dimension_numbers = #tpu.dot_dimension_numbers<[0], [0], [1], [1], [0, 1, 1, 1], [], []>} : vector<8x8xf32>, vector<8x256xf32>, vector<8x256xf32> -> vector<8x256xf32>
    %128 = arith.index_cast %c3_i32_78 : i32 to index
    %c0_84 = arith.constant 0 : index
    %c0_85 = arith.constant 0 : index
    %129 = vector.load %arg8[%128, %c0_84, %c0_85] : memref<8x8x256xf32, #tpu.memory_space<vmem>>, vector<1x8x256xf32>
    %130 = vector.shape_cast %129 : vector<1x8x256xf32> to vector<8x256xf32>
    %131 = vector.shape_cast %127 : vector<8x256xf32> to vector<1x8x256xf32>
    tpu.vector_store %arg8[%128, %c0_84, %c0_85], %131 {strides = array<i32>} : memref<8x8x256xf32, #tpu.memory_space<vmem>>, vector<1x8x256xf32>,
    %c4_i32_86 = arith.constant 4 : i32
    %132 = arith.index_cast %c4_i32_86 : i32 to index
    %c0_87 = arith.constant 0 : index
    %c0_88 = arith.constant 0 : index
    %133 = vector.load %arg5[%132, %c0_87, %c0_88] : memref<8x8x8xf32, #tpu.memory_space<vmem>>, vector<1x8x8xf32>
    %134 = vector.shape_cast %133 : vector<1x8x8xf32> to vector<8x8xf32>
    %135 = arith.index_cast %c4_i32_86 : i32 to index
    %c0_89 = arith.constant 0 : index
    %c0_90 = arith.constant 0 : index
    %136 = vector.load %arg2[%135, %c0_89, %c0_90] : memref<8x8x256xf32, #tpu.memory_space<vmem>>, vector<1x8x256xf32>
    %137 = vector.shape_cast %136 : vector<1x8x256xf32> to vector<8x256xf32>
    %cst_91 = arith.constant dense<0.000000e+00> : vector<8x256xf32>
    %138 = tpu.matmul %134, %137, %cst_91 {dimension_numbers = #tpu.dot_dimension_numbers<[0], [0], [1], [1], [0, 1, 1, 1], [], []>} : vector<8x8xf32>, vector<8x256xf32>, vector<8x256xf32> -> vector<8x256xf32>
    %139 = arith.index_cast %c4_i32_86 : i32 to index
    %c0_92 = arith.constant 0 : index
    %c0_93 = arith.constant 0 : index
    %140 = vector.load %arg8[%139, %c0_92, %c0_93] : memref<8x8x256xf32, #tpu.memory_space<vmem>>, vector<1x8x256xf32>
    %141 = vector.shape_cast %140 : vector<1x8x256xf32> to vector<8x256xf32>
    %142 = vector.shape_cast %138 : vector<8x256xf32> to vector<1x8x256xf32>
    tpu.vector_store %arg8[%139, %c0_92, %c0_93], %142 {strides = array<i32>} : memref<8x8x256xf32, #tpu.memory_space<vmem>>, vector<1x8x256xf32>,
    %c5_i32_94 = arith.constant 5 : i32
    %143 = arith.index_cast %c5_i32_94 : i32 to index
    %c0_95 = arith.constant 0 : index
    %c0_96 = arith.constant 0 : index
    %144 = vector.load %arg5[%143, %c0_95, %c0_96] : memref<8x8x8xf32, #tpu.memory_space<vmem>>, vector<1x8x8xf32>
    %145 = vector.shape_cast %144 : vector<1x8x8xf32> to vector<8x8xf32>
    %146 = arith.index_cast %c5_i32_94 : i32 to index
    %c0_97 = arith.constant 0 : index
    %c0_98 = arith.constant 0 : index
    %147 = vector.load %arg2[%146, %c0_97, %c0_98] : memref<8x8x256xf32, #tpu.memory_space<vmem>>, vector<1x8x256xf32>
    %148 = vector.shape_cast %147 : vector<1x8x256xf32> to vector<8x256xf32>
    %cst_99 = arith.constant dense<0.000000e+00> : vector<8x256xf32>
    %149 = tpu.matmul %145, %148, %cst_99 {dimension_numbers = #tpu.dot_dimension_numbers<[0], [0], [1], [1], [0, 1, 1, 1], [], []>} : vector<8x8xf32>, vector<8x256xf32>, vector<8x256xf32> -> vector<8x256xf32>
    %150 = arith.index_cast %c5_i32_94 : i32 to index
    %c0_100 = arith.constant 0 : index
    %c0_101 = arith.constant 0 : index
    %151 = vector.load %arg8[%150, %c0_100, %c0_101] : memref<8x8x256xf32, #tpu.memory_space<vmem>>, vector<1x8x256xf32>
    %152 = vector.shape_cast %151 : vector<1x8x256xf32> to vector<8x256xf32>
    %153 = vector.shape_cast %149 : vector<8x256xf32> to vector<1x8x256xf32>
    tpu.vector_store %arg8[%150, %c0_100, %c0_101], %153 {strides = array<i32>} : memref<8x8x256xf32, #tpu.memory_space<vmem>>, vector<1x8x256xf32>,
    %c6_i32_102 = arith.constant 6 : i32
    %154 = arith.index_cast %c6_i32_102 : i32 to index
    %c0_103 = arith.constant 0 : index
    %c0_104 = arith.constant 0 : index
    %155 = vector.load %arg5[%154, %c0_103, %c0_104] : memref<8x8x8xf32, #tpu.memory_space<vmem>>, vector<1x8x8xf32>
    %156 = vector.shape_cast %155 : vector<1x8x8xf32> to vector<8x8xf32>
    %157 = arith.index_cast %c6_i32_102 : i32 to index
    %c0_105 = arith.constant 0 : index
    %c0_106 = arith.constant 0 : index
    %158 = vector.load %arg2[%157, %c0_105, %c0_106] : memref<8x8x256xf32, #tpu.memory_space<vmem>>, vector<1x8x256xf32>
    %159 = vector.shape_cast %158 : vector<1x8x256xf32> to vector<8x256xf32>
    %cst_107 = arith.constant dense<0.000000e+00> : vector<8x256xf32>
    %160 = tpu.matmul %156, %159, %cst_107 {dimension_numbers = #tpu.dot_dimension_numbers<[0], [0], [1], [1], [0, 1, 1, 1], [], []>} : vector<8x8xf32>, vector<8x256xf32>, vector<8x256xf32> -> vector<8x256xf32>
    %161 = arith.index_cast %c6_i32_102 : i32 to index
    %c0_108 = arith.constant 0 : index
    %c0_109 = arith.constant 0 : index
    %162 = vector.load %arg8[%161, %c0_108, %c0_109] : memref<8x8x256xf32, #tpu.memory_space<vmem>>, vector<1x8x256xf32>
    %163 = vector.shape_cast %162 : vector<1x8x256xf32> to vector<8x256xf32>
    %164 = vector.shape_cast %160 : vector<8x256xf32> to vector<1x8x256xf32>
    tpu.vector_store %arg8[%161, %c0_108, %c0_109], %164 {strides = array<i32>} : memref<8x8x256xf32, #tpu.memory_space<vmem>>, vector<1x8x256xf32>,
    %c7_i32_110 = arith.constant 7 : i32
    %165 = arith.index_cast %c7_i32_110 : i32 to index
    %c0_111 = arith.constant 0 : index
    %c0_112 = arith.constant 0 : index
    %166 = vector.load %arg5[%165, %c0_111, %c0_112] : memref<8x8x8xf32, #tpu.memory_space<vmem>>, vector<1x8x8xf32>
    %167 = vector.shape_cast %166 : vector<1x8x8xf32> to vector<8x8xf32>
    %168 = arith.index_cast %c7_i32_110 : i32 to index
    %c0_113 = arith.constant 0 : index
    %c0_114 = arith.constant 0 : index
    %169 = vector.load %arg2[%168, %c0_113, %c0_114] : memref<8x8x256xf32, #tpu.memory_space<vmem>>, vector<1x8x256xf32>
    %170 = vector.shape_cast %169 : vector<1x8x256xf32> to vector<8x256xf32>
    %cst_115 = arith.constant dense<0.000000e+00> : vector<8x256xf32>
    %171 = tpu.matmul %167, %170, %cst_115 {dimension_numbers = #tpu.dot_dimension_numbers<[0], [0], [1], [1], [0, 1, 1, 1], [], []>} : vector<8x8xf32>, vector<8x256xf32>, vector<8x256xf32> -> vector<8x256xf32>
    %172 = arith.index_cast %c7_i32_110 : i32 to index
    %c0_116 = arith.constant 0 : index
    %c0_117 = arith.constant 0 : index
    %173 = vector.load %arg8[%172, %c0_116, %c0_117] : memref<8x8x256xf32, #tpu.memory_space<vmem>>, vector<1x8x256xf32>
    %174 = vector.shape_cast %173 : vector<1x8x256xf32> to vector<8x256xf32>
    %175 = vector.shape_cast %171 : vector<8x256xf32> to vector<1x8x256xf32>
    tpu.vector_store %arg8[%172, %c0_116, %c0_117], %175 {strides = array<i32>} : memref<8x8x256xf32, #tpu.memory_space<vmem>>, vector<1x8x256xf32>,
    %c8_i32_118 = arith.constant 8 : i32
    %c0_i32_119 = arith.constant 0 : i32
    %176 = arith.index_cast %c0_i32_119 : i32 to index
    %c0_120 = arith.constant 0 : index
    %c0_121 = arith.constant 0 : index
    %177 = vector.load %arg6[%176, %c0_120, %c0_121] : memref<8x8x8xf32, #tpu.memory_space<vmem>>, vector<1x8x8xf32>
    %178 = vector.shape_cast %177 : vector<1x8x8xf32> to vector<8x8xf32>
    %179 = arith.index_cast %c0_i32_119 : i32 to index
    %c0_122 = arith.constant 0 : index
    %c0_123 = arith.constant 0 : index
    %180 = vector.load %arg3[%179, %c0_122, %c0_123] : memref<8x8x256xf32, #tpu.memory_space<vmem>>, vector<1x8x256xf32>
    %181 = vector.shape_cast %180 : vector<1x8x256xf32> to vector<8x256xf32>
    %cst_124 = arith.constant dense<0.000000e+00> : vector<8x256xf32>
    %182 = tpu.matmul %178, %181, %cst_124 {dimension_numbers = #tpu.dot_dimension_numbers<[0], [0], [1], [1], [0, 1, 1, 1], [], []>} : vector<8x8xf32>, vector<8x256xf32>, vector<8x256xf32> -> vector<8x256xf32>
    %183 = arith.index_cast %c0_i32_119 : i32 to index
    %c0_125 = arith.constant 0 : index
    %c0_126 = arith.constant 0 : index
    %184 = vector.load %arg9[%183, %c0_125, %c0_126] : memref<8x8x256xf32, #tpu.memory_space<vmem>>, vector<1x8x256xf32>
    %185 = vector.shape_cast %184 : vector<1x8x256xf32> to vector<8x256xf32>
    %186 = vector.shape_cast %182 : vector<8x256xf32> to vector<1x8x256xf32>
    tpu.vector_store %arg9[%183, %c0_125, %c0_126], %186 {strides = array<i32>} : memref<8x8x256xf32, #tpu.memory_space<vmem>>, vector<1x8x256xf32>,
    %c1_i32_127 = arith.constant 1 : i32
    %187 = arith.index_cast %c1_i32_127 : i32 to index
    %c0_128 = arith.constant 0 : index
    %c0_129 = arith.constant 0 : index
    %188 = vector.load %arg6[%187, %c0_128, %c0_129] : memref<8x8x8xf32, #tpu.memory_space<vmem>>, vector<1x8x8xf32>
    %189 = vector.shape_cast %188 : vector<1x8x8xf32> to vector<8x8xf32>
    %190 = arith.index_cast %c1_i32_127 : i32 to index
    %c0_130 = arith.constant 0 : index
    %c0_131 = arith.constant 0 : index
    %191 = vector.load %arg3[%190, %c0_130, %c0_131] : memref<8x8x256xf32, #tpu.memory_space<vmem>>, vector<1x8x256xf32>
    %192 = vector.shape_cast %191 : vector<1x8x256xf32> to vector<8x256xf32>
    %cst_132 = arith.constant dense<0.000000e+00> : vector<8x256xf32>
    %193 = tpu.matmul %189, %192, %cst_132 {dimension_numbers = #tpu.dot_dimension_numbers<[0], [0], [1], [1], [0, 1, 1, 1], [], []>} : vector<8x8xf32>, vector<8x256xf32>, vector<8x256xf32> -> vector<8x256xf32>
    %194 = arith.index_cast %c1_i32_127 : i32 to index
    %c0_133 = arith.constant 0 : index
    %c0_134 = arith.constant 0 : index
    %195 = vector.load %arg9[%194, %c0_133, %c0_134] : memref<8x8x256xf32, #tpu.memory_space<vmem>>, vector<1x8x256xf32>
    %196 = vector.shape_cast %195 : vector<1x8x256xf32> to vector<8x256xf32>
    %197 = vector.shape_cast %193 : vector<8x256xf32> to vector<1x8x256xf32>
    tpu.vector_store %arg9[%194, %c0_133, %c0_134], %197 {strides = array<i32>} : memref<8x8x256xf32, #tpu.memory_space<vmem>>, vector<1x8x256xf32>,
    %c2_i32_135 = arith.constant 2 : i32
    %198 = arith.index_cast %c2_i32_135 : i32 to index
    %c0_136 = arith.constant 0 : index
    %c0_137 = arith.constant 0 : index
    %199 = vector.load %arg6[%198, %c0_136, %c0_137] : memref<8x8x8xf32, #tpu.memory_space<vmem>>, vector<1x8x8xf32>
    %200 = vector.shape_cast %199 : vector<1x8x8xf32> to vector<8x8xf32>
    %201 = arith.index_cast %c2_i32_135 : i32 to index
    %c0_138 = arith.constant 0 : index
    %c0_139 = arith.constant 0 : index
    %202 = vector.load %arg3[%201, %c0_138, %c0_139] : memref<8x8x256xf32, #tpu.memory_space<vmem>>, vector<1x8x256xf32>
    %203 = vector.shape_cast %202 : vector<1x8x256xf32> to vector<8x256xf32>
    %cst_140 = arith.constant dense<0.000000e+00> : vector<8x256xf32>
    %204 = tpu.matmul %200, %203, %cst_140 {dimension_numbers = #tpu.dot_dimension_numbers<[0], [0], [1], [1], [0, 1, 1, 1], [], []>} : vector<8x8xf32>, vector<8x256xf32>, vector<8x256xf32> -> vector<8x256xf32>
    %205 = arith.index_cast %c2_i32_135 : i32 to index
    %c0_141 = arith.constant 0 : index
    %c0_142 = arith.constant 0 : index
    %206 = vector.load %arg9[%205, %c0_141, %c0_142] : memref<8x8x256xf32, #tpu.memory_space<vmem>>, vector<1x8x256xf32>
    %207 = vector.shape_cast %206 : vector<1x8x256xf32> to vector<8x256xf32>
    %208 = vector.shape_cast %204 : vector<8x256xf32> to vector<1x8x256xf32>
    tpu.vector_store %arg9[%205, %c0_141, %c0_142], %208 {strides = array<i32>} : memref<8x8x256xf32, #tpu.memory_space<vmem>>, vector<1x8x256xf32>,
    %c3_i32_143 = arith.constant 3 : i32
    %209 = arith.index_cast %c3_i32_143 : i32 to index
    %c0_144 = arith.constant 0 : index
    %c0_145 = arith.constant 0 : index
    %210 = vector.load %arg6[%209, %c0_144, %c0_145] : memref<8x8x8xf32, #tpu.memory_space<vmem>>, vector<1x8x8xf32>
    %211 = vector.shape_cast %210 : vector<1x8x8xf32> to vector<8x8xf32>
    %212 = arith.index_cast %c3_i32_143 : i32 to index
    %c0_146 = arith.constant 0 : index
    %c0_147 = arith.constant 0 : index
    %213 = vector.load %arg3[%212, %c0_146, %c0_147] : memref<8x8x256xf32, #tpu.memory_space<vmem>>, vector<1x8x256xf32>
    %214 = vector.shape_cast %213 : vector<1x8x256xf32> to vector<8x256xf32>
    %cst_148 = arith.constant dense<0.000000e+00> : vector<8x256xf32>
    %215 = tpu.matmul %211, %214, %cst_148 {dimension_numbers = #tpu.dot_dimension_numbers<[0], [0], [1], [1], [0, 1, 1, 1], [], []>} : vector<8x8xf32>, vector<8x256xf32>, vector<8x256xf32> -> vector<8x256xf32>
    %216 = arith.index_cast %c3_i32_143 : i32 to index
    %c0_149 = arith.constant 0 : index
    %c0_150 = arith.constant 0 : index
    %217 = vector.load %arg9[%216, %c0_149, %c0_150] : memref<8x8x256xf32, #tpu.memory_space<vmem>>, vector<1x8x256xf32>
    %218 = vector.shape_cast %217 : vector<1x8x256xf32> to vector<8x256xf32>
    %219 = vector.shape_cast %215 : vector<8x256xf32> to vector<1x8x256xf32>
    tpu.vector_store %arg9[%216, %c0_149, %c0_150], %219 {strides = array<i32>} : memref<8x8x256xf32, #tpu.memory_space<vmem>>, vector<1x8x256xf32>,
    %c4_i32_151 = arith.constant 4 : i32
    %220 = arith.index_cast %c4_i32_151 : i32 to index
    %c0_152 = arith.constant 0 : index
    %c0_153 = arith.constant 0 : index
    %221 = vector.load %arg6[%220, %c0_152, %c0_153] : memref<8x8x8xf32, #tpu.memory_space<vmem>>, vector<1x8x8xf32>
    %222 = vector.shape_cast %221 : vector<1x8x8xf32> to vector<8x8xf32>
    %223 = arith.index_cast %c4_i32_151 : i32 to index
    %c0_154 = arith.constant 0 : index
    %c0_155 = arith.constant 0 : index
    %224 = vector.load %arg3[%223, %c0_154, %c0_155] : memref<8x8x256xf32, #tpu.memory_space<vmem>>, vector<1x8x256xf32>
    %225 = vector.shape_cast %224 : vector<1x8x256xf32> to vector<8x256xf32>
    %cst_156 = arith.constant dense<0.000000e+00> : vector<8x256xf32>
    %226 = tpu.matmul %222, %225, %cst_156 {dimension_numbers = #tpu.dot_dimension_numbers<[0], [0], [1], [1], [0, 1, 1, 1], [], []>} : vector<8x8xf32>, vector<8x256xf32>, vector<8x256xf32> -> vector<8x256xf32>
    %227 = arith.index_cast %c4_i32_151 : i32 to index
    %c0_157 = arith.constant 0 : index
    %c0_158 = arith.constant 0 : index
    %228 = vector.load %arg9[%227, %c0_157, %c0_158] : memref<8x8x256xf32, #tpu.memory_space<vmem>>, vector<1x8x256xf32>
    %229 = vector.shape_cast %228 : vector<1x8x256xf32> to vector<8x256xf32>
    %230 = vector.shape_cast %226 : vector<8x256xf32> to vector<1x8x256xf32>
    tpu.vector_store %arg9[%227, %c0_157, %c0_158], %230 {strides = array<i32>} : memref<8x8x256xf32, #tpu.memory_space<vmem>>, vector<1x8x256xf32>,
    %c5_i32_159 = arith.constant 5 : i32
    %231 = arith.index_cast %c5_i32_159 : i32 to index
    %c0_160 = arith.constant 0 : index
    %c0_161 = arith.constant 0 : index
    %232 = vector.load %arg6[%231, %c0_160, %c0_161] : memref<8x8x8xf32, #tpu.memory_space<vmem>>, vector<1x8x8xf32>
    %233 = vector.shape_cast %232 : vector<1x8x8xf32> to vector<8x8xf32>
    %234 = arith.index_cast %c5_i32_159 : i32 to index
    %c0_162 = arith.constant 0 : index
    %c0_163 = arith.constant 0 : index
    %235 = vector.load %arg3[%234, %c0_162, %c0_163] : memref<8x8x256xf32, #tpu.memory_space<vmem>>, vector<1x8x256xf32>
    %236 = vector.shape_cast %235 : vector<1x8x256xf32> to vector<8x256xf32>
    %cst_164 = arith.constant dense<0.000000e+00> : vector<8x256xf32>
    %237 = tpu.matmul %233, %236, %cst_164 {dimension_numbers = #tpu.dot_dimension_numbers<[0], [0], [1], [1], [0, 1, 1, 1], [], []>} : vector<8x8xf32>, vector<8x256xf32>, vector<8x256xf32> -> vector<8x256xf32>
    %238 = arith.index_cast %c5_i32_159 : i32 to index
    %c0_165 = arith.constant 0 : index
    %c0_166 = arith.constant 0 : index
    %239 = vector.load %arg9[%238, %c0_165, %c0_166] : memref<8x8x256xf32, #tpu.memory_space<vmem>>, vector<1x8x256xf32>
    %240 = vector.shape_cast %239 : vector<1x8x256xf32> to vector<8x256xf32>
    %241 = vector.shape_cast %237 : vector<8x256xf32> to vector<1x8x256xf32>
    tpu.vector_store %arg9[%238, %c0_165, %c0_166], %241 {strides = array<i32>} : memref<8x8x256xf32, #tpu.memory_space<vmem>>, vector<1x8x256xf32>,
    %c6_i32_167 = arith.constant 6 : i32
    %242 = arith.index_cast %c6_i32_167 : i32 to index
    %c0_168 = arith.constant 0 : index
    %c0_169 = arith.constant 0 : index
    %243 = vector.load %arg6[%242, %c0_168, %c0_169] : memref<8x8x8xf32, #tpu.memory_space<vmem>>, vector<1x8x8xf32>
    %244 = vector.shape_cast %243 : vector<1x8x8xf32> to vector<8x8xf32>
    %245 = arith.index_cast %c6_i32_167 : i32 to index
    %c0_170 = arith.constant 0 : index
    %c0_171 = arith.constant 0 : index
    %246 = vector.load %arg3[%245, %c0_170, %c0_171] : memref<8x8x256xf32, #tpu.memory_space<vmem>>, vector<1x8x256xf32>
    %247 = vector.shape_cast %246 : vector<1x8x256xf32> to vector<8x256xf32>
    %cst_172 = arith.constant dense<0.000000e+00> : vector<8x256xf32>
    %248 = tpu.matmul %244, %247, %cst_172 {dimension_numbers = #tpu.dot_dimension_numbers<[0], [0], [1], [1], [0, 1, 1, 1], [], []>} : vector<8x8xf32>, vector<8x256xf32>, vector<8x256xf32> -> vector<8x256xf32>
    %249 = arith.index_cast %c6_i32_167 : i32 to index
    %c0_173 = arith.constant 0 : index
    %c0_174 = arith.constant 0 : index
    %250 = vector.load %arg9[%249, %c0_173, %c0_174] : memref<8x8x256xf32, #tpu.memory_space<vmem>>, vector<1x8x256xf32>
    %251 = vector.shape_cast %250 : vector<1x8x256xf32> to vector<8x256xf32>
    %252 = vector.shape_cast %248 : vector<8x256xf32> to vector<1x8x256xf32>
    tpu.vector_store %arg9[%249, %c0_173, %c0_174], %252 {strides = array<i32>} : memref<8x8x256xf32, #tpu.memory_space<vmem>>, vector<1x8x256xf32>,
    %c7_i32_175 = arith.constant 7 : i32
    %253 = arith.index_cast %c7_i32_175 : i32 to index
    %c0_176 = arith.constant 0 : index
    %c0_177 = arith.constant 0 : index
    %254 = vector.load %arg6[%253, %c0_176, %c0_177] : memref<8x8x8xf32, #tpu.memory_space<vmem>>, vector<1x8x8xf32>
    %255 = vector.shape_cast %254 : vector<1x8x8xf32> to vector<8x8xf32>
    %256 = arith.index_cast %c7_i32_175 : i32 to index
    %c0_178 = arith.constant 0 : index
    %c0_179 = arith.constant 0 : index
    %257 = vector.load %arg3[%256, %c0_178, %c0_179] : memref<8x8x256xf32, #tpu.memory_space<vmem>>, vector<1x8x256xf32>
    %258 = vector.shape_cast %257 : vector<1x8x256xf32> to vector<8x256xf32>
    %cst_180 = arith.constant dense<0.000000e+00> : vector<8x256xf32>
    %259 = tpu.matmul %255, %258, %cst_180 {dimension_numbers = #tpu.dot_dimension_numbers<[0], [0], [1], [1], [0, 1, 1, 1], [], []>} : vector<8x8xf32>, vector<8x256xf32>, vector<8x256xf32> -> vector<8x256xf32>
    %260 = arith.index_cast %c7_i32_175 : i32 to index
    %c0_181 = arith.constant 0 : index
    %c0_182 = arith.constant 0 : index
    %261 = vector.load %arg9[%260, %c0_181, %c0_182] : memref<8x8x256xf32, #tpu.memory_space<vmem>>, vector<1x8x256xf32>
    %262 = vector.shape_cast %261 : vector<1x8x256xf32> to vector<8x256xf32>
    %263 = vector.shape_cast %259 : vector<8x256xf32> to vector<1x8x256xf32>
    tpu.vector_store %arg9[%260, %c0_181, %c0_182], %263 {strides = array<i32>} : memref<8x8x256xf32, #tpu.memory_space<vmem>>, vector<1x8x256xf32>,
    %c8_i32_183 = arith.constant 8 : i32
    return
  }
  func.func @transform_0(%arg0: i32) -> (i32, i32, i32) {
    %c0_i32 = arith.constant 0 : i32
    %c0_i32_0 = arith.constant 0 : i32
    %c0_i32_1 = arith.constant 0 : i32
    return %c0_i32, %c0_i32_0, %arg0 : i32, i32, i32
  }
  func.func @transform_1(%arg0: i32) -> (i32, i32, i32) {
    %c0_i32 = arith.constant 0 : i32
    %c0_i32_0 = arith.constant 0 : i32
    %c0_i32_1 = arith.constant 0 : i32
    return %c0_i32, %c0_i32_0, %arg0 : i32, i32, i32
  }
  func.func @transform_2(%arg0: i32) -> (i32, i32, i32) {
    %c0_i32 = arith.constant 0 : i32
    %c0_i32_0 = arith.constant 0 : i32
    %c0_i32_1 = arith.constant 0 : i32
    return %c0_i32, %c0_i32_0, %arg0 : i32, i32, i32
  }
  func.func @transform_3(%arg0: i32) -> (i32, i32, i32) {
    %c0_i32 = arith.constant 0 : i32
    %c0_i32_0 = arith.constant 0 : i32
    %c0_i32_1 = arith.constant 0 : i32
    %c0_i32_2 = arith.constant 0 : i32
    return %c0_i32, %c0_i32_0, %c0_i32_1 : i32, i32, i32
  }
  func.func @transform_4(%arg0: i32) -> (i32, i32, i32) {
    %c0_i32 = arith.constant 0 : i32
    %c0_i32_0 = arith.constant 0 : i32
    %c0_i32_1 = arith.constant 0 : i32
    %c0_i32_2 = arith.constant 0 : i32
    return %c0_i32, %c0_i32_0, %c0_i32_1 : i32, i32, i32
  }
  func.func @transform_5(%arg0: i32) -> (i32, i32, i32) {
    %c0_i32 = arith.constant 0 : i32
    %c0_i32_0 = arith.constant 0 : i32
    %c0_i32_1 = arith.constant 0 : i32
    %c0_i32_2 = arith.constant 0 : i32
    return %c0_i32, %c0_i32_0, %c0_i32_1 : i32, i32, i32
  }
  func.func @transform_6(%arg0: i32) -> (i32, i32, i32) {
    %c0_i32 = arith.constant 0 : i32
    %c0_i32_0 = arith.constant 0 : i32
    %c0_i32_1 = arith.constant 0 : i32
    return %c0_i32, %c0_i32_0, %arg0 : i32, i32, i32
  }
  func.func @transform_7(%arg0: i32) -> (i32, i32, i32) {
    %c0_i32 = arith.constant 0 : i32
    %c0_i32_0 = arith.constant 0 : i32
    %c0_i32_1 = arith.constant 0 : i32
    return %c0_i32, %c0_i32_0, %arg0 : i32, i32, i32
  }
  func.func @transform_8(%arg0: i32) -> (i32, i32, i32) {
    %c0_i32 = arith.constant 0 : i32
    %c0_i32_0 = arith.constant 0 : i32
    %c0_i32_1 = arith.constant 0 : i32
    return %c0_i32, %c0_i32_0, %arg0 : i32, i32, i32
  }
}

module attributes {stable_mosaic.version = 11 : i64} {
  func.func @kernel(%arg0: i32, %arg1: i32, %arg2: memref<1x4x2048xf32, #tpu.memory_space<vmem>>, %arg3: memref<1x4x2048xf32, #tpu.memory_space<vmem>>, %arg4: memref<1x4x2048xf32, #tpu.memory_space<vmem>>, %arg5: memref<4x8xf32, #tpu.memory_space<vmem>>, %arg6: memref<8x1xf32, #tpu.memory_space<vmem>>, %arg7: memref<8x4xf32, #tpu.memory_space<vmem>>, %arg8: memref<4x1xf32, #tpu.memory_space<vmem>>, %arg9: memref<4x8xf32, #tpu.memory_space<vmem>>, %arg10: memref<8x1xf32, #tpu.memory_space<vmem>>, %arg11: memref<8x4xf32, #tpu.memory_space<vmem>>, %arg12: memref<4x1xf32, #tpu.memory_space<vmem>>, %arg13: memref<1x4x2048xf32, #tpu.memory_space<vmem>>, %arg14: memref<1x4x2048xf32, #tpu.memory_space<vmem>>) attributes {dimension_semantics = [#tpu.dimension_semantics<parallel>, #tpu.dimension_semantics<parallel>], iteration_bounds = array<i64: 2, 2>, scalar_prefetch = 0 : i64, scratch_operands = 0 : i64, tpu.core_type = #tpu.core_type<tc>, window_params = [{transform_indices = @transform_0, window_bounds = array<i64: 1, 4, 2048>}, {transform_indices = @transform_1, window_bounds = array<i64: 1, 4, 2048>}, {transform_indices = @transform_2, window_bounds = array<i64: 1, 4, 2048>}, {pipeline_mode = #tpu.pipeline_mode<synchronous>, transform_indices = @transform_3, window_bounds = array<i64: 4, 8>}, {pipeline_mode = #tpu.pipeline_mode<synchronous>, transform_indices = @transform_4, window_bounds = array<i64: 8, 1>}, {pipeline_mode = #tpu.pipeline_mode<synchronous>, transform_indices = @transform_5, window_bounds = array<i64: 8, 4>}, {pipeline_mode = #tpu.pipeline_mode<synchronous>, transform_indices = @transform_6, window_bounds = array<i64: 4, 1>}, {pipeline_mode = #tpu.pipeline_mode<synchronous>, transform_indices = @transform_7, window_bounds = array<i64: 4, 8>}, {pipeline_mode = #tpu.pipeline_mode<synchronous>, transform_indices = @transform_8, window_bounds = array<i64: 8, 1>}, {pipeline_mode = #tpu.pipeline_mode<synchronous>, transform_indices = @transform_9, window_bounds = array<i64: 8, 4>}, {pipeline_mode = #tpu.pipeline_mode<synchronous>, transform_indices = @transform_10, window_bounds = array<i64: 4, 1>}, {transform_indices = @transform_11, window_bounds = array<i64: 1, 4, 2048>}, {transform_indices = @transform_12, window_bounds = array<i64: 1, 4, 2048>}]} {
    %c0 = arith.constant 0 : index
    %c0_0 = arith.constant 0 : index
    %c0_1 = arith.constant 0 : index
    %0 = vector.load %arg2[%c0, %c0_0, %c0_1] : memref<1x4x2048xf32, #tpu.memory_space<vmem>>, vector<1x4x2048xf32>
    %1 = vector.shape_cast %0 : vector<1x4x2048xf32> to vector<4x2048xf32>
    %c0_2 = arith.constant 0 : index
    %c0_3 = arith.constant 0 : index
    %c0_4 = arith.constant 0 : index
    %2 = vector.load %arg3[%c0_2, %c0_3, %c0_4] : memref<1x4x2048xf32, #tpu.memory_space<vmem>>, vector<1x4x2048xf32>
    %3 = vector.shape_cast %2 : vector<1x4x2048xf32> to vector<4x2048xf32>
    %4 = arith.addf %1, %3 : vector<4x2048xf32>
    %c0_5 = arith.constant 0 : index
    %c0_6 = arith.constant 0 : index
    %c0_7 = arith.constant 0 : index
    %5 = vector.load %arg4[%c0_5, %c0_6, %c0_7] : memref<1x4x2048xf32, #tpu.memory_space<vmem>>, vector<1x4x2048xf32>
    %6 = vector.shape_cast %5 : vector<1x4x2048xf32> to vector<4x2048xf32>
    %7 = arith.addf %4, %6 : vector<4x2048xf32>
    %c0_8 = arith.constant 0 : index
    %c0_9 = arith.constant 0 : index
    %8 = vector.load %arg5[%c0_8, %c0_9] : memref<4x8xf32, #tpu.memory_space<vmem>>, vector<4x8xf32>
    %cst = arith.constant dense<0.000000e+00> : vector<8x2048xf32>
    %9 = tpu.matmul %8, %7, %cst {dimension_numbers = #tpu.dot_dimension_numbers<[0], [0], [1], [1], [0, 1, 1, 1], [], []>} : vector<4x8xf32>, vector<4x2048xf32>, vector<8x2048xf32> -> vector<8x2048xf32>
    %c0_10 = arith.constant 0 : index
    %c0_11 = arith.constant 0 : index
    %10 = vector.load %arg6[%c0_10, %c0_11] : memref<8x1xf32, #tpu.memory_space<vmem>>, vector<8x1xf32>
    %11 = vector.broadcast %10 : vector<8x1xf32> to vector<8x2048xf32>
    %12 = arith.addf %9, %11 : vector<8x2048xf32>
    %cst_12 = arith.constant 0.000000e+00 : f32
    %13 = vector.broadcast %cst_12 : f32 to vector<8x2048xf32>
    %14 = arith.maximumf %12, %13 : vector<8x2048xf32>
    %c0_13 = arith.constant 0 : index
    %c0_14 = arith.constant 0 : index
    %15 = vector.load %arg7[%c0_13, %c0_14] : memref<8x4xf32, #tpu.memory_space<vmem>>, vector<8x4xf32>
    %cst_15 = arith.constant dense<0.000000e+00> : vector<4x2048xf32>
    %16 = tpu.matmul %15, %14, %cst_15 {dimension_numbers = #tpu.dot_dimension_numbers<[0], [0], [1], [1], [0, 1, 1, 1], [], []>} : vector<8x4xf32>, vector<8x2048xf32>, vector<4x2048xf32> -> vector<4x2048xf32>
    %c0_16 = arith.constant 0 : index
    %c0_17 = arith.constant 0 : index
    %17 = vector.load %arg8[%c0_16, %c0_17] : memref<4x1xf32, #tpu.memory_space<vmem>>, vector<4x1xf32>
    %18 = vector.broadcast %17 : vector<4x1xf32> to vector<4x2048xf32>
    %19 = arith.addf %16, %18 : vector<4x2048xf32>
    %c0_18 = arith.constant 0 : index
    %c0_19 = arith.constant 0 : index
    %c0_20 = arith.constant 0 : index
    %20 = vector.load %arg13[%c0_18, %c0_19, %c0_20] : memref<1x4x2048xf32, #tpu.memory_space<vmem>>, vector<1x4x2048xf32>
    %21 = vector.shape_cast %20 : vector<1x4x2048xf32> to vector<4x2048xf32>
    %22 = vector.shape_cast %19 : vector<4x2048xf32> to vector<1x4x2048xf32>
    tpu.vector_store %arg13[%c0_18, %c0_19, %c0_20], %22 {strides = array<i32>} : memref<1x4x2048xf32, #tpu.memory_space<vmem>>, vector<1x4x2048xf32>,
    %c0_21 = arith.constant 0 : index
    %c0_22 = arith.constant 0 : index
    %23 = vector.load %arg9[%c0_21, %c0_22] : memref<4x8xf32, #tpu.memory_space<vmem>>, vector<4x8xf32>
    %cst_23 = arith.constant dense<0.000000e+00> : vector<8x2048xf32>
    %24 = tpu.matmul %23, %7, %cst_23 {dimension_numbers = #tpu.dot_dimension_numbers<[0], [0], [1], [1], [0, 1, 1, 1], [], []>} : vector<4x8xf32>, vector<4x2048xf32>, vector<8x2048xf32> -> vector<8x2048xf32>
    %c0_24 = arith.constant 0 : index
    %c0_25 = arith.constant 0 : index
    %25 = vector.load %arg10[%c0_24, %c0_25] : memref<8x1xf32, #tpu.memory_space<vmem>>, vector<8x1xf32>
    %26 = vector.broadcast %25 : vector<8x1xf32> to vector<8x2048xf32>
    %27 = arith.addf %24, %26 : vector<8x2048xf32>
    %cst_26 = arith.constant 0.000000e+00 : f32
    %28 = vector.broadcast %cst_26 : f32 to vector<8x2048xf32>
    %29 = arith.maximumf %27, %28 : vector<8x2048xf32>
    %c0_27 = arith.constant 0 : index
    %c0_28 = arith.constant 0 : index
    %30 = vector.load %arg11[%c0_27, %c0_28] : memref<8x4xf32, #tpu.memory_space<vmem>>, vector<8x4xf32>
    %cst_29 = arith.constant dense<0.000000e+00> : vector<4x2048xf32>
    %31 = tpu.matmul %30, %29, %cst_29 {dimension_numbers = #tpu.dot_dimension_numbers<[0], [0], [1], [1], [0, 1, 1, 1], [], []>} : vector<8x4xf32>, vector<8x2048xf32>, vector<4x2048xf32> -> vector<4x2048xf32>
    %c0_30 = arith.constant 0 : index
    %c0_31 = arith.constant 0 : index
    %32 = vector.load %arg12[%c0_30, %c0_31] : memref<4x1xf32, #tpu.memory_space<vmem>>, vector<4x1xf32>
    %33 = vector.broadcast %32 : vector<4x1xf32> to vector<4x2048xf32>
    %34 = arith.addf %31, %33 : vector<4x2048xf32>
    %c0_32 = arith.constant 0 : index
    %c0_33 = arith.constant 0 : index
    %c0_34 = arith.constant 0 : index
    %35 = vector.load %arg14[%c0_32, %c0_33, %c0_34] : memref<1x4x2048xf32, #tpu.memory_space<vmem>>, vector<1x4x2048xf32>
    %36 = vector.shape_cast %35 : vector<1x4x2048xf32> to vector<4x2048xf32>
    %37 = vector.shape_cast %34 : vector<4x2048xf32> to vector<1x4x2048xf32>
    tpu.vector_store %arg14[%c0_32, %c0_33, %c0_34], %37 {strides = array<i32>} : memref<1x4x2048xf32, #tpu.memory_space<vmem>>, vector<1x4x2048xf32>,
    return
  }
  func.func @transform_0(%arg0: i32, %arg1: i32) -> (i32, i32, i32) {
    %c0_i32 = arith.constant 0 : i32
    %c0_i32_0 = arith.constant 0 : i32
    return %arg0, %c0_i32, %arg1 : i32, i32, i32
  }
  func.func @transform_1(%arg0: i32, %arg1: i32) -> (i32, i32, i32) {
    %c0_i32 = arith.constant 0 : i32
    %c0_i32_0 = arith.constant 0 : i32
    return %arg0, %c0_i32, %arg1 : i32, i32, i32
  }
  func.func @transform_2(%arg0: i32, %arg1: i32) -> (i32, i32, i32) {
    %c0_i32 = arith.constant 0 : i32
    %c0_i32_0 = arith.constant 0 : i32
    return %arg0, %c0_i32, %arg1 : i32, i32, i32
  }
  func.func @transform_3(%arg0: i32, %arg1: i32) -> (i32, i32) {
    %c0_i32 = arith.constant 0 : i32
    %c0_i32_0 = arith.constant 0 : i32
    %c0_i32_1 = arith.constant 0 : i32
    return %c0_i32, %c0_i32_0 : i32, i32
  }
  func.func @transform_4(%arg0: i32, %arg1: i32) -> (i32, i32) {
    %c0_i32 = arith.constant 0 : i32
    %c0_i32_0 = arith.constant 0 : i32
    %c0_i32_1 = arith.constant 0 : i32
    return %c0_i32, %c0_i32_0 : i32, i32
  }
  func.func @transform_5(%arg0: i32, %arg1: i32) -> (i32, i32) {
    %c0_i32 = arith.constant 0 : i32
    %c0_i32_0 = arith.constant 0 : i32
    %c0_i32_1 = arith.constant 0 : i32
    return %c0_i32, %c0_i32_0 : i32, i32
  }
  func.func @transform_6(%arg0: i32, %arg1: i32) -> (i32, i32) {
    %c0_i32 = arith.constant 0 : i32
    %c0_i32_0 = arith.constant 0 : i32
    %c0_i32_1 = arith.constant 0 : i32
    return %c0_i32, %c0_i32_0 : i32, i32
  }
  func.func @transform_7(%arg0: i32, %arg1: i32) -> (i32, i32) {
    %c0_i32 = arith.constant 0 : i32
    %c0_i32_0 = arith.constant 0 : i32
    %c0_i32_1 = arith.constant 0 : i32
    return %c0_i32, %c0_i32_0 : i32, i32
  }
  func.func @transform_8(%arg0: i32, %arg1: i32) -> (i32, i32) {
    %c0_i32 = arith.constant 0 : i32
    %c0_i32_0 = arith.constant 0 : i32
    %c0_i32_1 = arith.constant 0 : i32
    return %c0_i32, %c0_i32_0 : i32, i32
  }
  func.func @transform_9(%arg0: i32, %arg1: i32) -> (i32, i32) {
    %c0_i32 = arith.constant 0 : i32
    %c0_i32_0 = arith.constant 0 : i32
    %c0_i32_1 = arith.constant 0 : i32
    return %c0_i32, %c0_i32_0 : i32, i32
  }
  func.func @transform_10(%arg0: i32, %arg1: i32) -> (i32, i32) {
    %c0_i32 = arith.constant 0 : i32
    %c0_i32_0 = arith.constant 0 : i32
    %c0_i32_1 = arith.constant 0 : i32
    return %c0_i32, %c0_i32_0 : i32, i32
  }
  func.func @transform_11(%arg0: i32, %arg1: i32) -> (i32, i32, i32) {
    %c0_i32 = arith.constant 0 : i32
    %c0_i32_0 = arith.constant 0 : i32
    return %arg0, %c0_i32, %arg1 : i32, i32, i32
  }
  func.func @transform_12(%arg0: i32, %arg1: i32) -> (i32, i32, i32) {
    %c0_i32 = arith.constant 0 : i32
    %c0_i32_0 = arith.constant 0 : i32
    return %arg0, %c0_i32, %arg1 : i32, i32, i32
  }
}

</mosaic_0001>

<bundles_post_ra>
// kernel: spectral_conv_forward.2
= control target key start
LH: loop header
LB: loop body
LE: loop exit
PB: predicated region body
PF: predicated region fallthrough
CT: control target
= control target key end

     0   :  { %s3817_s27 = smov 0   ;;  %s3819_s28 = smov 0   ;;  %s4247_s0 = inlined_call_operand.vmem [shape: f32[8,8,512], index: 0, kind: input, shape index: {}]   ;;  %s4248_s1 = inlined_call_operand.vmem [shape: f32[8,8,512], index: 1, kind: input, shape index: {}]   ;;  %s4249_s2 = inlined_call_operand.vmem [shape: f32[8,8,512], index: 2, kind: input, shape index: {}]   ;;  %s4250_s3 = inlined_call_operand.vmem [shape: f32[8,8,8], index: 3, kind: input, shape index: {}]   ;;  %s4251_s4 = inlined_call_operand.vmem [shape: f32[8,8,8], index: 4, kind: input, shape index: {}]   ;;  %s4252_s5 = inlined_call_operand.vmem [shape: f32[8,8,8], index: 5, kind: input, shape index: {}]   ;;  %s4253_s6 = inlined_call_operand.vmem [shape: f32[8,8,512], index: 6, kind: output, shape index: {0}]   ;;  %s4254_s7 = inlined_call_operand.vmem [shape: f32[8,8,512], index: 7, kind: output, shape index: {1}]   ;;  %s4255_s8 = inlined_call_operand.vmem [shape: f32[8,8,512], index: 8, kind: output, shape index: {2}]  }
   0x1   :  { %s3821_s29 = smov 0  }
   0x2 LB: > { %s3833_s30 = sadd.s32 4294967295, %s3769_s29   ;;  %s3836_s9 = sadd.s32 1, %s3769_s29   ;;  %s3769_s29 = sphi %s3821_s29, %s4260_s29   ;;  %s3765_s28 = sphi %s3819_s28, %s4259_s28   ;;  %s3761_s27 = sphi %s3817_s27, %s4258_s27  }
   0x3   : > { %s23_s10 = ssub.s32 %s3769_s29, %s3836_s9  ;;  %s26_s11 = sadd.s32 1, %s3765_s28 }
   0x4   : > { %p24_p0 = scmp.eq.s32.totalorder %s23_s10, 0  ;;  %p33_p1 = scmp.ne.s32.totalorder %s3765_s28, %s3761_s27 }
   0x5   : > { %p34_p2 = scmp.eq.s32.totalorder %s3769_s29, 0  ;;  %p178_p3 = scmp.eq.s32.totalorder %s3833_s30, 1 }
   0x6   : > { %s3846_s12 = scalar_select %p24_p0, %s3765_s28, %s26_s11  }
   0x7   : > { %p3848_p4 = por %p34_p2, %p33_p1  ;;  %p3852_p5 = por %p178_p3, %p33_p1 }
   0x8   : > { %p3559_p6 = scmp.ge.s32.totalorder %s3769_s29, 2 }
   0xa   : > { %261 = sbr.rel (%p3559_p6) target bundleno = 51 (0x33), region = 28 }
   0xf   : > { %264 = sbr.rel (!%p3848_p4) target bundleno = 27 (0x1b), region = 32  ;;  %s266_s15 = sand.u32 (%p3848_p4), 1, %s3765_s28  }
  0x10   : > { %s3716_s16 = sshll.u32 (%p3848_p4), %s3769_s29, 4  ;;  %s3560_s17 = sshll.u32 (%p3848_p4), %s266_s15, 7 }
  0x11   : > { %s3864_s20 = scalar_lea.vmem (%p3848_p4), %s4247_s0, %s3716_s16  ;;  %s268_s21 = scalar_lea.vmem (%p3848_p4), [#allocation2], %s3560_s17 }
  0x12   : > { %v284_v0 = vld [vmem:[%s3864_s20] sm:$0xff] (%p3848_p4)  ;;  %v286_v1 = vld [vmem:[%s3864_s20 + $0x8] sm:$0xff] (%p3848_p4) }
  0x13   : > { %v288_v2 = vld [vmem:[%s3864_s20 + $0x20] sm:$0xff] (%p3848_p4)  ;;  %285 = vst [vmem:[%s268_s21] sm:$0xff] (%p3848_p4), %v284_v0  ;;  %287 = vst [vmem:[%s268_s21 + $0x8] sm:$0xff] (%p3848_p4), %v286_v1  ;;  %v290_v3 = vld [vmem:[%s3864_s20 + $0x28] sm:$0xff] (%p3848_p4) }
  0x14   : > { %289 = vst [vmem:[%s268_s21 + $0x10] sm:$0xff] %v288_v2  ;;  %v292_v4 = vld [vmem:[%s3864_s20 + $0x40] sm:$0xff]  ;;  %v294_v5 = vld [vmem:[%s3864_s20 + $0x48] sm:$0xff]  ;;  %291 = vst [vmem:[%s268_s21 + $0x18] sm:$0xff] %v290_v3 }
  0x15   : > { %293 = vst [vmem:[%s268_s21 + $0x20] sm:$0xff] %v292_v4  ;;  %295 = vst [vmem:[%s268_s21 + $0x28] sm:$0xff] %v294_v5  ;;  %v296_v6 = vld [vmem:[%s3864_s20 + $0x60] sm:$0xff]  ;;  %v298_v7 = vld [vmem:[%s3864_s20 + $0x68] sm:$0xff] }
  0x16   : > { %v300_v8 = vld [vmem:[%s3864_s20 + $0x80] sm:$0xff]  ;;  %297 = vst [vmem:[%s268_s21 + $0x30] sm:$0xff] %v296_v6  ;;  %299 = vst [vmem:[%s268_s21 + $0x38] sm:$0xff] %v298_v7  ;;  %v302_v9 = vld [vmem:[%s3864_s20 + $0x88] sm:$0xff] }
  0x17   : > { %301 = vst [vmem:[%s268_s21 + $0x40] sm:$0xff] %v300_v8  ;;  %v304_v10 = vld [vmem:[%s3864_s20 + $0xa0] sm:$0xff]  ;;  %v306_v11 = vld [vmem:[%s3864_s20 + $0xa8] sm:$0xff]  ;;  %303 = vst [vmem:[%s268_s21 + $0x48] sm:$0xff] %v302_v9 }
  0x18   : > { %305 = vst [vmem:[%s268_s21 + $0x50] sm:$0xff] %v304_v10  ;;  %307 = vst [vmem:[%s268_s21 + $0x58] sm:$0xff] %v306_v11  ;;  %v308_v12 = vld [vmem:[%s3864_s20 + $0xc0] sm:$0xff]  ;;  %v310_v13 = vld [vmem:[%s3864_s20 + $0xc8] sm:$0xff] }
  0x19   : > { %v312_v14 = vld [vmem:[%s3864_s20 + $0xe0] sm:$0xff]  ;;  %309 = vst [vmem:[%s268_s21 + $0x60] sm:$0xff] %v308_v12  ;;  %311 = vst [vmem:[%s268_s21 + $0x68] sm:$0xff] %v310_v13  ;;  %v314_v15 = vld [vmem:[%s3864_s20 + $0xe8] sm:$0xff] }
  0x1a   : > { %313 = vst [vmem:[%s268_s21 + $0x70] sm:$0xff] %v312_v14  ;;  %315 = vst [vmem:[%s268_s21 + $0x78] sm:$0xff] %v314_v15 }
  0x1b PF: > { %321 = sbr.rel (!%p3848_p4) target bundleno = 39 (0x27), region = 55  ;;  %s323_s22 = sand.u32 (%p3848_p4), 1, %s3765_s28  }
  0x1c   : > { %s3717_s23 = sshll.u32 (%p3848_p4), %s3769_s29, 4  ;;  %s3563_s24 = sshll.u32 (%p3848_p4), %s323_s22, 7 }
  0x1d   : > { %s3889_s10 = scalar_lea.vmem (%p3848_p4), %s4248_s1, %s3717_s23  ;;  %s325_s11 = scalar_lea.vmem (%p3848_p4), [#allocation3], %s3563_s24 }
  0x1e   : > { %v341_v16 = vld [vmem:[%s3889_s10] sm:$0xff] (%p3848_p4)  ;;  %v343_v17 = vld [vmem:[%s3889_s10 + $0x8] sm:$0xff] (%p3848_p4) }
  0x1f   : > { %v345_v18 = vld [vmem:[%s3889_s10 + $0x20] sm:$0xff] (%p3848_p4)  ;;  %342 = vst [vmem:[%s325_s11] sm:$0xff] (%p3848_p4), %v341_v16  ;;  %344 = vst [vmem:[%s325_s11 + $0x8] sm:$0xff] (%p3848_p4), %v343_v17  ;;  %v347_v19 = vld [vmem:[%s3889_s10 + $0x28] sm:$0xff] (%p3848_p4) }
  0x20   : > { %346 = vst [vmem:[%s325_s11 + $0x10] sm:$0xff] %v345_v18  ;;  %v349_v20 = vld [vmem:[%s3889_s10 + $0x40] sm:$0xff]  ;;  %v351_v21 = vld [vmem:[%s3889_s10 + $0x48] sm:$0xff]  ;;  %348 = vst [vmem:[%s325_s11 + $0x18] sm:$0xff] %v347_v19 }
  0x21   : > { %350 = vst [vmem:[%s325_s11 + $0x20] sm:$0xff] %v349_v20  ;;  %352 = vst [vmem:[%s325_s11 + $0x28] sm:$0xff] %v351_v21  ;;  %v353_v22 = vld [vmem:[%s3889_s10 + $0x60] sm:$0xff]  ;;  %v355_v23 = vld [vmem:[%s3889_s10 + $0x68] sm:$0xff] }
  0x22   : > { %v357_v24 = vld [vmem:[%s3889_s10 + $0x80] sm:$0xff]  ;;  %354 = vst [vmem:[%s325_s11 + $0x30] sm:$0xff] %v353_v22  ;;  %356 = vst [vmem:[%s325_s11 + $0x38] sm:$0xff] %v355_v23  ;;  %v359_v25 = vld [vmem:[%s3889_s10 + $0x88] sm:$0xff] }
  0x23   : > { %358 = vst [vmem:[%s325_s11 + $0x40] sm:$0xff] %v357_v24  ;;  %v361_v26 = vld [vmem:[%s3889_s10 + $0xa0] sm:$0xff]  ;;  %v363_v27 = vld [vmem:[%s3889_s10 + $0xa8] sm:$0xff]  ;;  %360 = vst [vmem:[%s325_s11 + $0x48] sm:$0xff] %v359_v25 }
  0x24   : > { %362 = vst [vmem:[%s325_s11 + $0x50] sm:$0xff] %v361_v26  ;;  %364 = vst [vmem:[%s325_s11 + $0x58] sm:$0xff] %v363_v27  ;;  %v365_v28 = vld [vmem:[%s3889_s10 + $0xc0] sm:$0xff]  ;;  %v367_v29 = vld [vmem:[%s3889_s10 + $0xc8] sm:$0xff] }
  0x25   : > { %v369_v30 = vld [vmem:[%s3889_s10 + $0xe0] sm:$0xff]  ;;  %366 = vst [vmem:[%s325_s11 + $0x60] sm:$0xff] %v365_v28  ;;  %368 = vst [vmem:[%s325_s11 + $0x68] sm:$0xff] %v367_v29  ;;  %v371_v31 = vld [vmem:[%s3889_s10 + $0xe8] sm:$0xff] }
  0x26   : > { %370 = vst [vmem:[%s325_s11 + $0x70] sm:$0xff] %v369_v30  ;;  %372 = vst [vmem:[%s325_s11 + $0x78] sm:$0xff] %v371_v31 }
  0x27 PF: > { %378 = sbr.rel (!%p3848_p4) target bundleno = 51 (0x33), region = 78  ;;  %s380_s15 = sand.u32 (%p3848_p4), 1, %s3765_s28  }
  0x28   : > { %s3718_s16 = sshll.u32 (%p3848_p4), %s3769_s29, 4  ;;  %s3566_s17 = sshll.u32 (%p3848_p4), %s380_s15, 7 }
  0x29   : > { %s3914_s20 = scalar_lea.vmem (%p3848_p4), %s4249_s2, %s3718_s16  ;;  %s382_s13 = scalar_lea.vmem (%p3848_p4), [#allocation4], %s3566_s17 }
  0x2a   : > { %v398_v32 = vld [vmem:[%s3914_s20] sm:$0xff] (%p3848_p4)  ;;  %v400_v33 = vld [vmem:[%s3914_s20 + $0x8] sm:$0xff] (%p3848_p4) }
  0x2b   : > { %v402_v34 = vld [vmem:[%s3914_s20 + $0x20] sm:$0xff] (%p3848_p4)  ;;  %399 = vst [vmem:[%s382_s13] sm:$0xff] (%p3848_p4), %v398_v32  ;;  %401 = vst [vmem:[%s382_s13 + $0x8] sm:$0xff] (%p3848_p4), %v400_v33  ;;  %v404_v35 = vld [vmem:[%s3914_s20 + $0x28] sm:$0xff] (%p3848_p4) }
  0x2c   : > { %403 = vst [vmem:[%s382_s13 + $0x10] sm:$0xff] %v402_v34  ;;  %v406_v36 = vld [vmem:[%s3914_s20 + $0x40] sm:$0xff]  ;;  %v408_v37 = vld [vmem:[%s3914_s20 + $0x48] sm:$0xff]  ;;  %405 = vst [vmem:[%s382_s13 + $0x18] sm:$0xff] %v404_v35 }
  0x2d   : > { %407 = vst [vmem:[%s382_s13 + $0x20] sm:$0xff] %v406_v36  ;;  %409 = vst [vmem:[%s382_s13 + $0x28] sm:$0xff] %v408_v37  ;;  %v410_v38 = vld [vmem:[%s3914_s20 + $0x60] sm:$0xff]  ;;  %v412_v39 = vld [vmem:[%s3914_s20 + $0x68] sm:$0xff] }
  0x2e   : > { %v414_v40 = vld [vmem:[%s3914_s20 + $0x80] sm:$0xff]  ;;  %411 = vst [vmem:[%s382_s13 + $0x30] sm:$0xff] %v410_v38  ;;  %413 = vst [vmem:[%s382_s13 + $0x38] sm:$0xff] %v412_v39  ;;  %v416_v41 = vld [vmem:[%s3914_s20 + $0x88] sm:$0xff] }
  0x2f   : > { %415 = vst [vmem:[%s382_s13 + $0x40] sm:$0xff] %v414_v40  ;;  %v418_v42 = vld [vmem:[%s3914_s20 + $0xa0] sm:$0xff]  ;;  %v420_v43 = vld [vmem:[%s3914_s20 + $0xa8] sm:$0xff]  ;;  %417 = vst [vmem:[%s382_s13 + $0x48] sm:$0xff] %v416_v41 }
  0x30   : > { %419 = vst [vmem:[%s382_s13 + $0x50] sm:$0xff] %v418_v42  ;;  %421 = vst [vmem:[%s382_s13 + $0x58] sm:$0xff] %v420_v43  ;;  %v422_v44 = vld [vmem:[%s3914_s20 + $0xc0] sm:$0xff]  ;;  %v424_v45 = vld [vmem:[%s3914_s20 + $0xc8] sm:$0xff] }
  0x31   : > { %v426_v46 = vld [vmem:[%s3914_s20 + $0xe0] sm:$0xff]  ;;  %423 = vst [vmem:[%s382_s13 + $0x60] sm:$0xff] %v422_v44  ;;  %425 = vst [vmem:[%s382_s13 + $0x68] sm:$0xff] %v424_v45  ;;  %v428_v47 = vld [vmem:[%s3914_s20 + $0xe8] sm:$0xff] }
  0x32   : > { %427 = vst [vmem:[%s382_s13 + $0x70] sm:$0xff] %v426_v46  ;;  %429 = vst [vmem:[%s382_s13 + $0x78] sm:$0xff] %v428_v47 }
  0x33 PF: > { %p3569_p7 = scmp.ge.s32.totalorder %s3769_s29, 1  ;;  %p434_p8 = scmp.lt.s32.totalorder %s3769_s29, 3 }
  0x35   : > { %p435_p9 = pnand %p3569_p7, %p434_p8 }
  0x36   : > { %s441_s25 = sand.u32 (!%p435_p9), 1, %s3761_s27  }
  0x37   : > { %438 = sbr.rel (%p435_p9) target bundleno = 450 (0x1c2), region = 101  ;;  %s3947_s15 = sshll.u32 (!%p435_p9), %s441_s25, 7 }
  0x38   : > { %s3958_s19 = scalar_lea.vmem (!%p435_p9), [#allocation2], %s3947_s15  ;;  %s4038_s25 = scalar_lea.vmem (!%p435_p9), [#allocation3], %s3947_s15 }
  0x39   : > { %s4115_s26 = scalar_lea.vmem (!%p435_p9), [#allocation5], %s3947_s15  ;;  %s4133_s10 = scalar_lea.vmem (!%p435_p9), [#allocation6], %s3947_s15 }
  0x3a   : > { %s4152_s11 = scalar_lea.vmem (!%p435_p9), [#allocation7], %s3947_s15 }
  0x3c   : > { %v509_v48 = vld [vmem:[%s4250_s3] sm:$0xff]  ;;  %v3583_v49 = vld [vmem:[%s4250_s3 + $0x10] sm:$0xff]  ;;  %v3577_v50 = vld [vmem:[%s4250_s3 + $0x8] sm:$0xff]  ;;  %v3771_v52 = vmov 0.0   ;;  %vm544_vm0 = vcmask 64512  }
  0x3d   : > { %512 = vxpose.xlu0.b32.start.end [1/1] (short) (narrow) %v509_v48, 8  ;;  %740 = vxpose.xlu1.b32.start.end [1/1] (short) (narrow) %v3583_v49, 8  ;;  %v3589_v51 = vld [vmem:[%s4250_s3 + $0x18] sm:$0xff]  ;;  %v3595_v53 = vld [vmem:[%s4250_s3 + $0x20] sm:$0xff]  ;;  %v3601_v54 = vld [vmem:[%s4250_s3 + $0x28] sm:$0xff] }
  0x3e   : > { %612 = vmatprep.mubr.f32.mxu0 %v3771_v52  ;;  %725 = vmatprep.mubr.f32.mxu1 %v3771_v52  ;;  %v511_v55 = vld [vmem:[%s3958_s19 + $0x8] sm:$0xff]  ;;  %v510_v56 = vld [vmem:[%s3958_s19] sm:$0xff]  ;;  %v3579_v57 = vld [vmem:[%s3958_s19 + $0x18] sm:$0xff] }
  0x3f   : > { %v3578_v58 = vld [vmem:[%s3958_s19 + $0x10] sm:$0xff]  ;;  %v3585_v59 = vld [vmem:[%s3958_s19 + $0x28] sm:$0xff]  ;;  %v3613_v61 = vld [vmem:[%s4250_s3 + $0x38] sm:$0xff]  ;;  %578 = vmatprep.subr.mxu0 %v511_v55  ;;  %691 = vmatprep.subr.mxu1 %v3579_v57 }
  0x40   : > { %v3607_v60 = vld [vmem:[%s4250_s3 + $0x30] sm:$0xff]  ;;  %v3591_v62 = vld [vmem:[%s3958_s19 + $0x38] sm:$0xff]  ;;  %579 = vmatpush1.msra.mxu0 %v510_v56  ;;  %692 = vmatpush1.msra.mxu1 %v3578_v58  ;;  %v1419_v63 = vld [vmem:[%s4251_s4] sm:$0xff] }
  0x41   : > { %626 = vxpose.xlu0.b32.start.end [1/1] (short) (narrow) %v3577_v50, 8  ;;  %854 = vxpose.xlu1.b32.start.end [1/1] (short) (narrow) %v3589_v51, 8  ;;  %v3620_v0 = vld [vmem:[%s4251_s4 + $0x8] sm:$0xff]  ;;  %v3626_v1 = vld [vmem:[%s4251_s4 + $0x10] sm:$0xff]  ;;  %v3632_v2 = vld [vmem:[%s4251_s4 + $0x18] sm:$0xff] }
  0x42   : > { %805 = vmatprep.subr.mxu0 %v3585_v59  ;;  %919 = vmatprep.subr.mxu1 %v3591_v62  ;;  %v3638_v3 = vld [vmem:[%s4251_s4 + $0x20] sm:$0xff]  ;;  %v3644_v4 = vld [vmem:[%s4251_s4 + $0x28] sm:$0xff]  ;;  %v3650_v5 = vld [vmem:[%s4251_s4 + $0x30] sm:$0xff] }
  0x43   : > { %v3656_v6 = vld [vmem:[%s4251_s4 + $0x38] sm:$0xff]  ;;  %v2328_v7 = vld [vmem:[%s4252_s5] sm:$0xff]  ;;  %v3663_v8 = vld [vmem:[%s4252_s5 + $0x8] sm:$0xff] }
  0x44   : > { %v3669_v9 = vld [vmem:[%s4252_s5 + $0x10] sm:$0xff]  ;;  %v3675_v10 = vld [vmem:[%s4252_s5 + $0x18] sm:$0xff]  ;;  %v3681_v11 = vld [vmem:[%s4252_s5 + $0x20] sm:$0xff] }
  0x45   : > { %968 = vxpose.xlu0.b32.start.end [1/1] (short) (narrow) %v3595_v53, 8  ;;  %1082 = vxpose.xlu1.b32.start.end [1/1] (short) (narrow) %v3601_v54, 8  ;;  %v3687_v12 = vld [vmem:[%s4252_s5 + $0x28] sm:$0xff]  ;;  %v3693_v13 = vld [vmem:[%s4252_s5 + $0x30] sm:$0xff]  ;;  %v3699_v14 = vld [vmem:[%s4252_s5 + $0x38] sm:$0xff] }
  0x46   : > { %v3584_v15 = vld [vmem:[%s3958_s19 + $0x20] sm:$0xff]  ;;  %v3597_v18 = vld [vmem:[%s3958_s19 + $0x48] sm:$0xff]  ;;  %v3590_v19 = vld [vmem:[%s3958_s19 + $0x30] sm:$0xff] }
  0x47   : > { %v3603_v22 = vld [vmem:[%s3958_s19 + $0x58] sm:$0xff]  ;;  %v3596_v23 = vld [vmem:[%s3958_s19 + $0x40] sm:$0xff]  ;;  %v3609_v24 = vld [vmem:[%s3958_s19 + $0x68] sm:$0xff] }
  0x48   : > { %v3602_v25 = vld [vmem:[%s3958_s19 + $0x50] sm:$0xff]  ;;  %v3615_v28 = vld [vmem:[%s3958_s19 + $0x78] sm:$0xff]  ;;  %v3608_v29 = vld [vmem:[%s3958_s19 + $0x60] sm:$0xff] }
  0x49   : > { %1196 = vxpose.xlu0.b32.start.end [1/1] (short) (narrow) %v3607_v60, 8  ;;  %1310 = vxpose.xlu1.b32.start.end [1/1] (short) (narrow) %v3613_v61, 8  ;;  %v1421_v30 = vld [vmem:[%s4038_s25 + $0x8] sm:$0xff]  ;;  %v3614_v31 = vld [vmem:[%s3958_s19 + $0x70] sm:$0xff]  ;;  %v3622_v34 = vld [vmem:[%s4038_s25 + $0x18] sm:$0xff]  ;;  %s4073_s19 = scalar_lea.vmem [#allocation4], %s3947_s15 }
  0x4a   : > { %v1420_v35 = vld [vmem:[%s4038_s25] sm:$0xff]  ;;  %v3628_v36 = vld [vmem:[%s4038_s25 + $0x28] sm:$0xff]  ;;  %v3621_v37 = vld [vmem:[%s4038_s25 + $0x10] sm:$0xff]  ;;  %s3719_s15 = sshll.u32 (%p3852_p5), %s3833_s30, 4 }
  0x4b   : > { %v3634_v40 = vld [vmem:[%s4038_s25 + $0x38] sm:$0xff]  ;;  %v3627_v41 = vld [vmem:[%s4038_s25 + $0x20] sm:$0xff]  ;;  %v3640_v42 = vld [vmem:[%s4038_s25 + $0x48] sm:$0xff]  ;;  %s3254_s16 = scalar_lea.vmem (%p3852_p5), %s4253_s6, %s3719_s15 }
  0x4c   : > { %v3633_v43 = vld [vmem:[%s4038_s25 + $0x30] sm:$0xff]  ;;  %v3646_v46 = vld [vmem:[%s4038_s25 + $0x58] sm:$0xff]  ;;  %v3639_v47 = vld [vmem:[%s4038_s25 + $0x40] sm:$0xff] }
  0x4d   : > { %1422 = vxpose.xlu0.b32.start.end [1/1] (short) (narrow) %v1419_v63, 8  ;;  %1535 = vxpose.xlu1.b32.start.end [1/1] (short) (narrow) %v3620_v0, 8  ;;  %v3652_v48 = vld [vmem:[%s4038_s25 + $0x68] sm:$0xff]  ;;  %v3645_v49 = vld [vmem:[%s4038_s25 + $0x50] sm:$0xff]  ;;  %v3658_v53 = vld [vmem:[%s4038_s25 + $0x78] sm:$0xff] }
  0x4e   : > { %v3651_v54 = vld [vmem:[%s4038_s25 + $0x60] sm:$0xff]  ;;  %v2330_v55 = vld [vmem:[%s4073_s19 + $0x8] sm:$0xff]  ;;  %v3657_v56 = vld [vmem:[%s4038_s25 + $0x70] sm:$0xff] }
  0x4f   : > { %v3665_v59 = vld [vmem:[%s4073_s19 + $0x18] sm:$0xff]  ;;  %v2329_v60 = vld [vmem:[%s4073_s19] sm:$0xff]  ;;  %v3671_v61 = vld [vmem:[%s4073_s19 + $0x28] sm:$0xff] }
  0x50   : > { %v3664_v62 = vld [vmem:[%s4073_s19 + $0x10] sm:$0xff] }
  0x51   : > { %1649 = vxpose.xlu0.b32.start.end [1/1] (short) (narrow) %v3626_v1, 8  ;;  %1763 = vxpose.xlu1.b32.start.end [1/1] (short) (narrow) %v3632_v2, 8  ;;  %v3677_v1 = vld [vmem:[%s4073_s19 + $0x38] sm:$0xff]  ;;  %v3670_v2 = vld [vmem:[%s4073_s19 + $0x20] sm:$0xff] }
  0x55   : > { %1877 = vxpose.xlu0.b32.start.end [1/1] (short) (narrow) %v3638_v3, 8  ;;  %1991 = vxpose.xlu1.b32.start.end [1/1] (short) (narrow) %v3644_v4, 8  ;;  %v3683_v3 = vld [vmem:[%s4073_s19 + $0x48] sm:$0xff]  ;;  %v3676_v4 = vld [vmem:[%s4073_s19 + $0x30] sm:$0xff] }
  0x59   : > { %2105 = vxpose.xlu0.b32.start.end [1/1] (short) (narrow) %v3650_v5, 8  ;;  %2219 = vxpose.xlu1.b32.start.end [1/1] (short) (narrow) %v3656_v6, 8 }
  0x5d   : > { %2331 = vxpose.xlu0.b32.start.end [1/1] (short) (narrow) %v2328_v7, 8  ;;  %2444 = vxpose.xlu1.b32.start.end [1/1] (short) (narrow) %v3663_v8, 8  ;;  %v3689_v7 = vld [vmem:[%s4073_s19 + $0x58] sm:$0xff]  ;;  %v3682_v8 = vld [vmem:[%s4073_s19 + $0x40] sm:$0xff] }
  0x61   : > { %2558 = vxpose.xlu0.b32.start.end [1/1] (short) (narrow) %v3669_v9, 8  ;;  %2672 = vxpose.xlu1.b32.start.end [1/1] (short) (narrow) %v3675_v10, 8  ;;  %v3695_v9 = vld [vmem:[%s4073_s19 + $0x68] sm:$0xff]  ;;  %v3688_v10 = vld [vmem:[%s4073_s19 + $0x50] sm:$0xff] }
  0x65   : > { %2786 = vxpose.xlu0.b32.start.end [1/1] (short) (narrow) %v3681_v11, 8  ;;  %2900 = vxpose.xlu1.b32.start.end [1/1] (short) (narrow) %v3687_v12, 8 }
  0x69   : > { %3014 = vxpose.xlu0.b32.start.end [1/1] (short) (narrow) %v3693_v13, 8  ;;  %3128 = vxpose.xlu1.b32.start.end [1/1] (short) (narrow) %v3699_v14, 8  ;;  %v3701_v13 = vld [vmem:[%s4073_s19 + $0x78] sm:$0xff]  ;;  %v3694_v14 = vld [vmem:[%s4073_s19 + $0x60] sm:$0xff] }
  0xb9   : > { %v528_v16 = vpop.trf.xlu0  ;;  %v756_v17 = vpop.trf.xlu1 }
  0xba   : > { %3576 = vmatmul.mubr.msk.f32.vlgmr.msra.gmra.mxu0 %vm544_vm0, %v528_v16 }
  0xbb   : > { %806 = vmatpush1.msra.mxu0 %v3584_v15  ;;  %839 = vmatprep.mubr.f32.mxu0 %v3771_v52  ;;  %v3700_v15 = vld [vmem:[%s4073_s19 + $0x70] sm:$0xff] }
  0xbc   : > { %1033 = vmatprep.subr.mxu0 %v3597_v18 }
  0xbd   : > { %v642_v20 = vpop.trf.xlu0  ;;  %v870_v21 = vpop.trf.xlu1 }
  0xbe   : > { %3580 = vmatmul.mubr.msk.f32.vlgmr.msra.gmra.mxu1 %vm544_vm0, %v642_v20  ;;  %3586 = vmatmul.mubr.msk.f32.vlgmr.msra.gmra.mxu0 %vm544_vm0, %v756_v17 }
  0xbf   : > { %920 = vmatpush1.msra.mxu1 %v3590_v19  ;;  %953 = vmatprep.mubr.f32.mxu1 %v3771_v52 }
  0xc0   : > { %1147 = vmatprep.subr.mxu1 %v3603_v22  ;;  %1034 = vmatpush1.msra.mxu0 %v3596_v23 }
  0xc1   : > { %v984_v26 = vpop.trf.xlu0  ;;  %1067 = vmatprep.mubr.f32.mxu0 %v3771_v52  ;;  %v1098_v27 = vpop.trf.xlu1  ;;  %1261 = vmatprep.subr.mxu0 %v3609_v24 }
  0xc2   : > { %3592 = vmatmul.mubr.msk.f32.vlgmr.msra.gmra.mxu1 %vm544_vm0, %v870_v21  ;;  %3598 = vmatmul.mubr.msk.f32.vlgmr.msra.gmra.mxu0 %vm544_vm0, %v984_v26 }
  0xc3   : > { %1148 = vmatpush1.msra.mxu1 %v3602_v25  ;;  %1181 = vmatprep.mubr.f32.mxu1 %v3771_v52 }
  0xc4   : > { %1375 = vmatprep.subr.mxu1 %v3615_v28  ;;  %1262 = vmatpush1.msra.mxu0 %v3608_v29 }
  0xc5   : > { %v1212_v32 = vpop.trf.xlu0  ;;  %1295 = vmatprep.mubr.f32.mxu0 %v3771_v52  ;;  %v1326_v33 = vpop.trf.xlu1  ;;  %1487 = vmatprep.subr.mxu0 %v1421_v30 }
  0xc6   : > { %3604 = vmatmul.mubr.msk.f32.vlgmr.msra.gmra.mxu1 %vm544_vm0, %v1098_v27  ;;  %3610 = vmatmul.mubr.msk.f32.vlgmr.msra.gmra.mxu0 %vm544_vm0, %v1212_v32 }
  0xc7   : > { %1376 = vmatpush1.msra.mxu1 %v3614_v31  ;;  %1409 = vmatprep.mubr.f32.mxu1 %v3771_v52 }
  0xc8   : > { %1600 = vmatprep.subr.mxu1 %v3622_v34  ;;  %1488 = vmatpush1.msra.mxu0 %v1420_v35 }
  0xc9   : > { %v1438_v38 = vpop.trf.xlu0  ;;  %1521 = vmatprep.mubr.f32.mxu0 %v3771_v52  ;;  %v1551_v39 = vpop.trf.xlu1  ;;  %1714 = vmatprep.subr.mxu0 %v3628_v36 }
  0xca   : > { %3616 = vmatmul.mubr.msk.f32.vlgmr.msra.gmra.mxu1 %vm544_vm0, %v1326_v33  ;;  %3619 = vmatmul.mubr.msk.f32.vlgmr.msra.gmra.mxu0 %vm544_vm0, %v1438_v38 }
  0xcb   : > { %1601 = vmatpush1.msra.mxu1 %v3621_v37  ;;  %1634 = vmatprep.mubr.f32.mxu1 %v3771_v52 }
  0xcc   : > { %1828 = vmatprep.subr.mxu1 %v3634_v40  ;;  %1715 = vmatpush1.msra.mxu0 %v3627_v41 }
  0xcd   : > { %v1665_v44 = vpop.trf.xlu0  ;;  %1748 = vmatprep.mubr.f32.mxu0 %v3771_v52  ;;  %v1779_v45 = vpop.trf.xlu1  ;;  %1942 = vmatprep.subr.mxu0 %v3640_v42 }
  0xce   : > { %3623 = vmatmul.mubr.msk.f32.vlgmr.msra.gmra.mxu1 %vm544_vm0, %v1551_v39  ;;  %3629 = vmatmul.mubr.msk.f32.vlgmr.msra.gmra.mxu0 %vm544_vm0, %v1665_v44 }
  0xcf   : > { %1829 = vmatpush1.msra.mxu1 %v3633_v43  ;;  %1862 = vmatprep.mubr.f32.mxu1 %v3771_v52 }
  0xd0   : > { %2056 = vmatprep.subr.mxu1 %v3646_v46  ;;  %1943 = vmatpush1.msra.mxu0 %v3639_v47 }
  0xd1   : > { %v1893_v50 = vpop.trf.xlu0  ;;  %1976 = vmatprep.mubr.f32.mxu0 %v3771_v52  ;;  %v2007_v51 = vpop.trf.xlu1  ;;  %2170 = vmatprep.subr.mxu0 %v3652_v48 }
  0xd2   : > { %3635 = vmatmul.mubr.msk.f32.vlgmr.msra.gmra.mxu1 %vm544_vm0, %v1779_v45  ;;  %3641 = vmatmul.mubr.msk.f32.vlgmr.msra.gmra.mxu0 %vm544_vm0, %v1893_v50 }
  0xd3   : > { %2057 = vmatpush1.msra.mxu1 %v3645_v49  ;;  %2090 = vmatprep.mubr.f32.mxu1 %v3771_v52 }
  0xd4   : > { %2284 = vmatprep.subr.mxu1 %v3658_v53  ;;  %2171 = vmatpush1.msra.mxu0 %v3651_v54 }
  0xd5   : > { %v2121_v57 = vpop.trf.xlu0  ;;  %2204 = vmatprep.mubr.f32.mxu0 %v3771_v52  ;;  %v2235_v58 = vpop.trf.xlu1  ;;  %2396 = vmatprep.subr.mxu0 %v2330_v55 }
  0xd6   : > { %3647 = vmatmul.mubr.msk.f32.vlgmr.msra.gmra.mxu1 %vm544_vm0, %v2007_v51  ;;  %3653 = vmatmul.mubr.msk.f32.vlgmr.msra.gmra.mxu0 %vm544_vm0, %v2121_v57 }
  0xd7   : > { %2285 = vmatpush1.msra.mxu1 %v3657_v56  ;;  %2318 = vmatprep.mubr.f32.mxu1 %v3771_v52 }
  0xd8   : > { %2509 = vmatprep.subr.mxu1 %v3665_v59  ;;  %2397 = vmatpush1.msra.mxu0 %v2329_v60 }
  0xd9   : > { %v2347_v63 = vpop.trf.xlu0  ;;  %2430 = vmatprep.mubr.f32.mxu0 %v3771_v52  ;;  %v2460_v0 = vpop.trf.xlu1  ;;  %2623 = vmatprep.subr.mxu0 %v3671_v61 }
  0xda   : > { %3659 = vmatmul.mubr.msk.f32.vlgmr.msra.gmra.mxu1 %vm544_vm0, %v2235_v58  ;;  %3662 = vmatmul.mubr.msk.f32.vlgmr.msra.gmra.mxu0 %vm544_vm0, %v2347_v63 }
  0xdb   : > { %2510 = vmatpush1.msra.mxu1 %v3664_v62  ;;  %2543 = vmatprep.mubr.f32.mxu1 %v3771_v52 }
  0xdc   : > { %2737 = vmatprep.subr.mxu1 %v3677_v1  ;;  %2624 = vmatpush1.msra.mxu0 %v3670_v2 }
  0xdd   : > { %v2574_v5 = vpop.trf.xlu0  ;;  %2657 = vmatprep.mubr.f32.mxu0 %v3771_v52  ;;  %v2688_v6 = vpop.trf.xlu1  ;;  %2851 = vmatprep.subr.mxu0 %v3683_v3 }
  0xde   : > { %3666 = vmatmul.mubr.msk.f32.vlgmr.msra.gmra.mxu1 %vm544_vm0, %v2460_v0  ;;  %3672 = vmatmul.mubr.msk.f32.vlgmr.msra.gmra.mxu0 %vm544_vm0, %v2574_v5 }
  0xdf   : > { %2738 = vmatpush1.msra.mxu1 %v3676_v4  ;;  %2771 = vmatprep.mubr.f32.mxu1 %v3771_v52 }
  0xe0   : > { %2965 = vmatprep.subr.mxu1 %v3689_v7  ;;  %2852 = vmatpush1.msra.mxu0 %v3682_v8 }
  0xe1   : > { %v2802_v11 = vpop.trf.xlu0  ;;  %2885 = vmatprep.mubr.f32.mxu0 %v3771_v52  ;;  %v2916_v12 = vpop.trf.xlu1  ;;  %3079 = vmatprep.subr.mxu0 %v3695_v9 }
  0xe2   : > { %3678 = vmatmul.mubr.msk.f32.vlgmr.msra.gmra.mxu1 %vm544_vm0, %v2688_v6  ;;  %3684 = vmatmul.mubr.msk.f32.vlgmr.msra.gmra.mxu0 %vm544_vm0, %v2802_v11 }
  0xe3   : > { %2966 = vmatpush1.msra.mxu1 %v3688_v10  ;;  %2999 = vmatprep.mubr.f32.mxu1 %v3771_v52 }
  0xe4   : > { %3193 = vmatprep.subr.mxu1 %v3701_v13  ;;  %3080 = vmatpush1.msra.mxu0 %v3694_v14 }
  0xe5   : > { %v3030_v16 = vpop.trf.xlu0  ;;  %3113 = vmatprep.mubr.f32.mxu0 %v3771_v52  ;;  %v3144_v17 = vpop.trf.xlu1 }
  0xe6   : > { %3690 = vmatmul.mubr.msk.f32.vlgmr.msra.gmra.mxu1 %vm544_vm0, %v2916_v12  ;;  %3696 = vmatmul.mubr.msk.f32.vlgmr.msra.gmra.mxu0 %vm544_vm0, %v3030_v16 }
  0xe7   : > { %3194 = vmatpush1.msra.mxu1 %v3700_v15  ;;  %3227 = vmatprep.mubr.f32.mxu1 %v3771_v52 }
  0xea   : > { %3702 = vmatmul.mubr.msk.f32.vlgmr.msra.gmra.mxu1 %vm544_vm0, %v3144_v17 }
 0x17a   : > { %v614_v18 = vpop.f32.mrf.mxu0 }
 0x17b   : > { %619 = vst [vmem:[%s4115_s26] sm:$0xff] %v614_v18 }
 0x17c   : > { %v616_v19 = vpop.f32.mrf.mxu0 }
 0x17d   : > { %620 = vst [vmem:[%s4115_s26 + $0x8] sm:$0xff] %v616_v19 }
 0x17e   : > { %v727_v20 = vpop.f32.mrf.mxu1  ;;  %v841_v52 = vpop.f32.mrf.mxu0 }
 0x17f   : > { %3581 = vst [vmem:[%s4115_s26 + $0x10] sm:$0xff] %v727_v20  ;;  %3587 = vst [vmem:[%s4115_s26 + $0x20] sm:$0xff] %v841_v52 }
 0x180   : > { %v729_v21 = vpop.f32.mrf.mxu1  ;;  %v843_v22 = vpop.f32.mrf.mxu0 }
 0x181   : > { %3582 = vst [vmem:[%s4115_s26 + $0x18] sm:$0xff] %v729_v21  ;;  %3588 = vst [vmem:[%s4115_s26 + $0x28] sm:$0xff] %v843_v22 }
 0x182   : > { %v955_v23 = vpop.f32.mrf.mxu1  ;;  %v1069_v24 = vpop.f32.mrf.mxu0  ;;  %v3267_v2 = vld [vmem:[%s4115_s26] sm:$0xff] (%p3852_p5) }
 0x183   : > { %3593 = vst [vmem:[%s4115_s26 + $0x30] sm:$0xff] %v955_v23  ;;  %3599 = vst [vmem:[%s4115_s26 + $0x40] sm:$0xff] %v1069_v24 }
 0x184   : > { %v957_v25 = vpop.f32.mrf.mxu1  ;;  %v1071_v26 = vpop.f32.mrf.mxu0  ;;  %v3269_v3 = vld [vmem:[%s4115_s26 + $0x8] sm:$0xff] (%p3852_p5)  ;;  %3268 = vst [vmem:[%s3254_s16] sm:$0xff] (%p3852_p5), %v3267_v2 }
 0x185   : > { %3594 = vst [vmem:[%s4115_s26 + $0x38] sm:$0xff] %v957_v25  ;;  %3600 = vst [vmem:[%s4115_s26 + $0x48] sm:$0xff] %v1071_v26 }
 0x186   : > { %v1183_v27 = vpop.f32.mrf.mxu1  ;;  %v1297_v28 = vpop.f32.mrf.mxu0  ;;  %v3271_v4 = vld [vmem:[%s4115_s26 + $0x10] sm:$0xff] (%p3852_p5)  ;;  %v3275_v6 = vld [vmem:[%s4115_s26 + $0x20] sm:$0xff] (%p3852_p5)  ;;  %3270 = vst [vmem:[%s3254_s16 + $0x8] sm:$0xff] (%p3852_p5), %v3269_v3 }
 0x187   : > { %3605 = vst [vmem:[%s4115_s26 + $0x50] sm:$0xff] %v1183_v27  ;;  %3611 = vst [vmem:[%s4115_s26 + $0x60] sm:$0xff] %v1297_v28 }
 0x188   : > { %v1185_v29 = vpop.f32.mrf.mxu1  ;;  %v1299_v30 = vpop.f32.mrf.mxu0  ;;  %v3273_v5 = vld [vmem:[%s4115_s26 + $0x18] sm:$0xff] (%p3852_p5)  ;;  %v3277_v7 = vld [vmem:[%s4115_s26 + $0x28] sm:$0xff] (%p3852_p5)  ;;  %3272 = vst [vmem:[%s3254_s16 + $0x20] sm:$0xff] (%p3852_p5), %v3271_v4  ;;  %3276 = vst [vmem:[%s3254_s16 + $0x40] sm:$0xff] (%p3852_p5), %v3275_v6 }
 0x189   : > { %3606 = vst [vmem:[%s4115_s26 + $0x58] sm:$0xff] %v1185_v29  ;;  %3612 = vst [vmem:[%s4115_s26 + $0x68] sm:$0xff] %v1299_v30 }
 0x18a   : > { %v1411_v31 = vpop.f32.mrf.mxu1  ;;  %v1523_v32 = vpop.f32.mrf.mxu0  ;;  %3274 = vst [vmem:[%s3254_s16 + $0x28] sm:$0xff] (%p3852_p5), %v3273_v5  ;;  %3278 = vst [vmem:[%s3254_s16 + $0x48] sm:$0xff] (%p3852_p5), %v3277_v7  ;;  %v3279_v8 = vld [vmem:[%s4115_s26 + $0x30] sm:$0xff] (%p3852_p5)  ;;  %v3283_v10 = vld [vmem:[%s4115_s26 + $0x40] sm:$0xff] (%p3852_p5) }
 0x18b   : > { %3617 = vst [vmem:[%s4115_s26 + $0x70] sm:$0xff] %v1411_v31  ;;  %1528 = vst [vmem:[%s4133_s10] sm:$0xff] %v1523_v32 }
 0x18c   : > { %v1413_v33 = vpop.f32.mrf.mxu1  ;;  %v1525_v34 = vpop.f32.mrf.mxu0  ;;  %v3281_v9 = vld [vmem:[%s4115_s26 + $0x38] sm:$0xff] (%p3852_p5)  ;;  %3280 = vst [vmem:[%s3254_s16 + $0x60] sm:$0xff] (%p3852_p5), %v3279_v8  ;;  %3284 = vst [vmem:[%s3254_s16 + $0x80] sm:$0xff] (%p3852_p5), %v3283_v10  ;;  %v3285_v11 = vld [vmem:[%s4115_s26 + $0x48] sm:$0xff] (%p3852_p5) }
 0x18d   : > { %3618 = vst [vmem:[%s4115_s26 + $0x78] sm:$0xff] %v1413_v33  ;;  %1529 = vst [vmem:[%s4133_s10 + $0x8] sm:$0xff] %v1525_v34 }
 0x18e   : > { %v1636_v35 = vpop.f32.mrf.mxu1  ;;  %v1750_v36 = vpop.f32.mrf.mxu0  ;;  %3282 = vst [vmem:[%s3254_s16 + $0x68] sm:$0xff] (%p3852_p5), %v3281_v9  ;;  %v3287_v12 = vld [vmem:[%s4115_s26 + $0x50] sm:$0xff] (%p3852_p5)  ;;  %3286 = vst [vmem:[%s3254_s16 + $0x88] sm:$0xff] (%p3852_p5), %v3285_v11  ;;  %v3291_v14 = vld [vmem:[%s4115_s26 + $0x60] sm:$0xff] (%p3852_p5) }
 0x18f   : > { %3624 = vst [vmem:[%s4133_s10 + $0x10] sm:$0xff] %v1636_v35  ;;  %3630 = vst [vmem:[%s4133_s10 + $0x20] sm:$0xff] %v1750_v36 }
 0x190   : > { %v1638_v37 = vpop.f32.mrf.mxu1  ;;  %v1752_v38 = vpop.f32.mrf.mxu0  ;;  %v3289_v13 = vld [vmem:[%s4115_s26 + $0x58] sm:$0xff] (%p3852_p5)  ;;  %3288 = vst [vmem:[%s3254_s16 + $0xa0] sm:$0xff] (%p3852_p5), %v3287_v12  ;;  %v3293_v15 = vld [vmem:[%s4115_s26 + $0x68] sm:$0xff] (%p3852_p5)  ;;  %3292 = vst [vmem:[%s3254_s16 + $0xc0] sm:$0xff] (%p3852_p5), %v3291_v14 }
 0x191   : > { %3625 = vst [vmem:[%s4133_s10 + $0x18] sm:$0xff] %v1638_v37  ;;  %3631 = vst [vmem:[%s4133_s10 + $0x28] sm:$0xff] %v1752_v38 }
 0x192   : > { %v1864_v39 = vpop.f32.mrf.mxu1  ;;  %v1978_v40 = vpop.f32.mrf.mxu0  ;;  %3290 = vst [vmem:[%s3254_s16 + $0xa8] sm:$0xff] (%p3852_p5), %v3289_v13  ;;  %v3295_v16 = vld [vmem:[%s4115_s26 + $0x70] sm:$0xff] (%p3852_p5)  ;;  %3294 = vst [vmem:[%s3254_s16 + $0xc8] sm:$0xff] (%p3852_p5), %v3293_v15 }
 0x193   : > { %3636 = vst [vmem:[%s4133_s10 + $0x30] sm:$0xff] %v1864_v39  ;;  %3642 = vst [vmem:[%s4133_s10 + $0x40] sm:$0xff] %v1978_v40 }
 0x194   : > { %v1866_v41 = vpop.f32.mrf.mxu1  ;;  %v1980_v42 = vpop.f32.mrf.mxu0  ;;  %3296 = vst [vmem:[%s3254_s16 + $0xe0] sm:$0xff] (%p3852_p5), %v3295_v16  ;;  %v3297_v17 = vld [vmem:[%s4115_s26 + $0x78] sm:$0xff] (%p3852_p5) }
 0x195   : > { %3637 = vst [vmem:[%s4133_s10 + $0x38] sm:$0xff] %v1866_v41  ;;  %3643 = vst [vmem:[%s4133_s10 + $0x48] sm:$0xff] %v1980_v42 }
 0x196   : > { %v2092_v43 = vpop.f32.mrf.mxu1  ;;  %v2206_v44 = vpop.f32.mrf.mxu0  ;;  %3298 = vst [vmem:[%s3254_s16 + $0xe8] sm:$0xff] (%p3852_p5), %v3297_v17 }
 0x197   : > { %3648 = vst [vmem:[%s4133_s10 + $0x50] sm:$0xff] %v2092_v43  ;;  %3654 = vst [vmem:[%s4133_s10 + $0x60] sm:$0xff] %v2206_v44 }
 0x198   : > { %v2094_v45 = vpop.f32.mrf.mxu1  ;;  %v2208_v46 = vpop.f32.mrf.mxu0 }
 0x199   : > { %3649 = vst [vmem:[%s4133_s10 + $0x58] sm:$0xff] %v2094_v45  ;;  %3655 = vst [vmem:[%s4133_s10 + $0x68] sm:$0xff] %v2208_v46 }
 0x19a   : > { %v2320_v47 = vpop.f32.mrf.mxu1  ;;  %v2432_v48 = vpop.f32.mrf.mxu0 }
 0x19b   : > { %3660 = vst [vmem:[%s4133_s10 + $0x70] sm:$0xff] %v2320_v47  ;;  %2437 = vst [vmem:[%s4152_s11] sm:$0xff] %v2432_v48 }
 0x19c   : > { %v2322_v49 = vpop.f32.mrf.mxu1  ;;  %v2434_v50 = vpop.f32.mrf.mxu0 }
 0x19d   : > { %3661 = vst [vmem:[%s4133_s10 + $0x78] sm:$0xff] %v2322_v49  ;;  %2438 = vst [vmem:[%s4152_s11 + $0x8] sm:$0xff] %v2434_v50 }
 0x19e   : > { %v2545_v51 = vpop.f32.mrf.mxu1  ;;  %v2659_v53 = vpop.f32.mrf.mxu0 }
 0x19f   : > { %3667 = vst [vmem:[%s4152_s11 + $0x10] sm:$0xff] %v2545_v51  ;;  %3673 = vst [vmem:[%s4152_s11 + $0x20] sm:$0xff] %v2659_v53 }
 0x1a0   : > { %v2547_v54 = vpop.f32.mrf.mxu1  ;;  %v2661_v55 = vpop.f32.mrf.mxu0 }
 0x1a1   : > { %3668 = vst [vmem:[%s4152_s11 + $0x18] sm:$0xff] %v2547_v54  ;;  %3674 = vst [vmem:[%s4152_s11 + $0x28] sm:$0xff] %v2661_v55 }
 0x1a2   : > { %v2773_v56 = vpop.f32.mrf.mxu1  ;;  %v2887_v57 = vpop.f32.mrf.mxu0 }
 0x1a3   : > { %3679 = vst [vmem:[%s4152_s11 + $0x30] sm:$0xff] %v2773_v56  ;;  %3685 = vst [vmem:[%s4152_s11 + $0x40] sm:$0xff] %v2887_v57 }
 0x1a4   : > { %v2775_v58 = vpop.f32.mrf.mxu1  ;;  %v2889_v59 = vpop.f32.mrf.mxu0 }
 0x1a5   : > { %3680 = vst [vmem:[%s4152_s11 + $0x38] sm:$0xff] %v2775_v58  ;;  %3686 = vst [vmem:[%s4152_s11 + $0x48] sm:$0xff] %v2889_v59 }
 0x1a6   : > { %v3001_v60 = vpop.f32.mrf.mxu1  ;;  %v3115_v61 = vpop.f32.mrf.mxu0 }
 0x1a7   : > { %3691 = vst [vmem:[%s4152_s11 + $0x50] sm:$0xff] %v3001_v60  ;;  %3697 = vst [vmem:[%s4152_s11 + $0x60] sm:$0xff] %v3115_v61 }
 0x1a8   : > { %v3003_v62 = vpop.f32.mrf.mxu1  ;;  %v3117_v63 = vpop.f32.mrf.mxu0 }
 0x1a9   : > { %3692 = vst [vmem:[%s4152_s11 + $0x58] sm:$0xff] %v3003_v62  ;;  %3698 = vst [vmem:[%s4152_s11 + $0x68] sm:$0xff] %v3117_v63  ;;  %3251 = sbr.rel (!%p3852_p5) target bundleno = 430 (0x1ae), region = 117 }
 0x1aa   : > { %v3229_v0 = vpop.f32.mrf.mxu1 }
 0x1ab   : > { %3703 = vst [vmem:[%s4152_s11 + $0x70] sm:$0xff] %v3229_v0 }
 0x1ac   : > { %v3231_v1 = vpop.f32.mrf.mxu1 }
 0x1ad   : > { %3704 = vst [vmem:[%s4152_s11 + $0x78] sm:$0xff] %v3231_v1 }
 0x1ae PF: > { %3304 = sbr.rel (!%p3852_p5) target bundleno = 440 (0x1b8), region = 140  ;;  %s3720_s17 = sshll.u32 (%p3852_p5), %s3833_s30, 4  ;;  %v3320_v18 = vld [vmem:[%s4133_s10] sm:$0xff] (%p3852_p5)  ;;  %v3322_v19 = vld [vmem:[%s4133_s10 + $0x8] sm:$0xff] (%p3852_p5)  ;;  %v3324_v20 = vld [vmem:[%s4133_s10 + $0x10] sm:$0xff] (%p3852_p5) }
 0x1af   : > { %s3307_s13 = scalar_lea.vmem (%p3852_p5), %s4254_s7, %s3720_s17  ;;  %v3326_v52 = vld [vmem:[%s4133_s10 + $0x18] sm:$0xff] (%p3852_p5)  ;;  %v3328_v21 = vld [vmem:[%s4133_s10 + $0x20] sm:$0xff] (%p3852_p5)  ;;  %v3330_v22 = vld [vmem:[%s4133_s10 + $0x28] sm:$0xff] (%p3852_p5) }
 0x1b0   : > { %3321 = vst [vmem:[%s3307_s13] sm:$0xff] (%p3852_p5), %v3320_v18  ;;  %3323 = vst [vmem:[%s3307_s13 + $0x8] sm:$0xff] (%p3852_p5), %v3322_v19  ;;  %v3332_v23 = vld [vmem:[%s4133_s10 + $0x30] sm:$0xff] (%p3852_p5)  ;;  %v3334_v24 = vld [vmem:[%s4133_s10 + $0x38] sm:$0xff] (%p3852_p5) }
 0x1b1   : > { %3325 = vst [vmem:[%s3307_s13 + $0x20] sm:$0xff] (%p3852_p5), %v3324_v20  ;;  %3327 = vst [vmem:[%s3307_s13 + $0x28] sm:$0xff] (%p3852_p5), %v3326_v52  ;;  %v3336_v25 = vld [vmem:[%s4133_s10 + $0x40] sm:$0xff] (%p3852_p5)  ;;  %v3338_v26 = vld [vmem:[%s4133_s10 + $0x48] sm:$0xff] (%p3852_p5) }
 0x1b2   : > { %3329 = vst [vmem:[%s3307_s13 + $0x40] sm:$0xff] (%p3852_p5), %v3328_v21  ;;  %3331 = vst [vmem:[%s3307_s13 + $0x48] sm:$0xff] (%p3852_p5), %v3330_v22  ;;  %v3340_v27 = vld [vmem:[%s4133_s10 + $0x50] sm:$0xff] (%p3852_p5)  ;;  %v3342_v28 = vld [vmem:[%s4133_s10 + $0x58] sm:$0xff] (%p3852_p5) }
 0x1b3   : > { %3333 = vst [vmem:[%s3307_s13 + $0x60] sm:$0xff] %v3332_v23  ;;  %3335 = vst [vmem:[%s3307_s13 + $0x68] sm:$0xff] %v3334_v24  ;;  %v3344_v29 = vld [vmem:[%s4133_s10 + $0x60] sm:$0xff]  ;;  %v3346_v30 = vld [vmem:[%s4133_s10 + $0x68] sm:$0xff] }
 0x1b4   : > { %3337 = vst [vmem:[%s3307_s13 + $0x80] sm:$0xff] %v3336_v25  ;;  %3339 = vst [vmem:[%s3307_s13 + $0x88] sm:$0xff] %v3338_v26  ;;  %v3348_v31 = vld [vmem:[%s4133_s10 + $0x70] sm:$0xff]  ;;  %v3350_v32 = vld [vmem:[%s4133_s10 + $0x78] sm:$0xff] }
 0x1b5   : > { %3341 = vst [vmem:[%s3307_s13 + $0xa0] sm:$0xff] %v3340_v27  ;;  %3343 = vst [vmem:[%s3307_s13 + $0xa8] sm:$0xff] %v3342_v28 }
 0x1b6   : > { %3345 = vst [vmem:[%s3307_s13 + $0xc0] sm:$0xff] %v3344_v29  ;;  %3347 = vst [vmem:[%s3307_s13 + $0xc8] sm:$0xff] %v3346_v30 }
 0x1b7   : > { %3349 = vst [vmem:[%s3307_s13 + $0xe0] sm:$0xff] %v3348_v31  ;;  %3351 = vst [vmem:[%s3307_s13 + $0xe8] sm:$0xff] %v3350_v32 }
 0x1b8 PF: > { %3357 = sbr.rel (!%p3852_p5) target bundleno = 450 (0x1c2), region = 163  ;;  %s3721_s21 = sshll.u32 (%p3852_p5), %s3833_s30, 4  ;;  %v3373_v33 = vld [vmem:[%s4152_s11] sm:$0xff] (%p3852_p5)  ;;  %v3375_v34 = vld [vmem:[%s4152_s11 + $0x8] sm:$0xff] (%p3852_p5)  ;;  %v3377_v35 = vld [vmem:[%s4152_s11 + $0x10] sm:$0xff] (%p3852_p5) }
 0x1b9   : > { %s3360_s24 = scalar_lea.vmem (%p3852_p5), %s4255_s8, %s3721_s21  ;;  %v3379_v36 = vld [vmem:[%s4152_s11 + $0x18] sm:$0xff] (%p3852_p5)  ;;  %v3381_v37 = vld [vmem:[%s4152_s11 + $0x20] sm:$0xff] (%p3852_p5)  ;;  %v3383_v38 = vld [vmem:[%s4152_s11 + $0x28] sm:$0xff] (%p3852_p5) }
 0x1ba   : > { %3374 = vst [vmem:[%s3360_s24] sm:$0xff] (%p3852_p5), %v3373_v33  ;;  %3376 = vst [vmem:[%s3360_s24 + $0x8] sm:$0xff] (%p3852_p5), %v3375_v34  ;;  %v3385_v39 = vld [vmem:[%s4152_s11 + $0x30] sm:$0xff] (%p3852_p5)  ;;  %v3387_v40 = vld [vmem:[%s4152_s11 + $0x38] sm:$0xff] (%p3852_p5) }
 0x1bb   : > { %3378 = vst [vmem:[%s3360_s24 + $0x20] sm:$0xff] (%p3852_p5), %v3377_v35  ;;  %3380 = vst [vmem:[%s3360_s24 + $0x28] sm:$0xff] (%p3852_p5), %v3379_v36  ;;  %v3389_v41 = vld [vmem:[%s4152_s11 + $0x40] sm:$0xff] (%p3852_p5)  ;;  %v3391_v42 = vld [vmem:[%s4152_s11 + $0x48] sm:$0xff] (%p3852_p5) }
 0x1bc   : > { %3382 = vst [vmem:[%s3360_s24 + $0x40] sm:$0xff] (%p3852_p5), %v3381_v37  ;;  %3384 = vst [vmem:[%s3360_s24 + $0x48] sm:$0xff] (%p3852_p5), %v3383_v38  ;;  %v3393_v43 = vld [vmem:[%s4152_s11 + $0x50] sm:$0xff] (%p3852_p5)  ;;  %v3395_v44 = vld [vmem:[%s4152_s11 + $0x58] sm:$0xff] (%p3852_p5) }
 0x1bd   : > { %3386 = vst [vmem:[%s3360_s24 + $0x60] sm:$0xff] %v3385_v39  ;;  %3388 = vst [vmem:[%s3360_s24 + $0x68] sm:$0xff] %v3387_v40  ;;  %v3397_v45 = vld [vmem:[%s4152_s11 + $0x60] sm:$0xff]  ;;  %v3399_v46 = vld [vmem:[%s4152_s11 + $0x68] sm:$0xff] }
 0x1be   : > { %3390 = vst [vmem:[%s3360_s24 + $0x80] sm:$0xff] %v3389_v41  ;;  %3392 = vst [vmem:[%s3360_s24 + $0x88] sm:$0xff] %v3391_v42  ;;  %v3401_v47 = vld [vmem:[%s4152_s11 + $0x70] sm:$0xff]  ;;  %v3403_v48 = vld [vmem:[%s4152_s11 + $0x78] sm:$0xff] }
 0x1bf   : > { %3394 = vst [vmem:[%s3360_s24 + $0xa0] sm:$0xff] %v3393_v43  ;;  %3396 = vst [vmem:[%s3360_s24 + $0xa8] sm:$0xff] %v3395_v44 }
 0x1c0   : > { %3398 = vst [vmem:[%s3360_s24 + $0xc0] sm:$0xff] %v3397_v45  ;;  %3400 = vst [vmem:[%s3360_s24 + $0xc8] sm:$0xff] %v3399_v46 }
 0x1c1   : > { %3402 = vst [vmem:[%s3360_s24 + $0xe0] sm:$0xff] %v3401_v47  ;;  %3404 = vst [vmem:[%s3360_s24 + $0xe8] sm:$0xff] %v3403_v48 }
 0x1c2 PF: > { %p16_p10 = scmp.ge.s32.totalorder %s3836_s9, 4   ;;  %s4258_s27 = smov %s3765_s28 }
 0x1c3   : > { %s4259_s28 = smov %s3846_s12  ;;  %s4260_s29 = smov %s3836_s9 }
 0x1c4   :  { %18 = sbr.rel (!%p16_p10) target bundleno = 2 (0x2), region = 320 }

// kernel: reverse.11
= control target key start
LH: loop header
LB: loop body
LE: loop exit
PB: predicated region body
PF: predicated region fallthrough
CT: control target
= control target key end

     0   :  { %v2_v0 = vlaneseq  ;;  %s3066_s0 = inlined_call_operand.vmem [shape: f32[2,4,16,16,7], index: 0, kind: input, shape index: {}]   ;;  %s3067_s1 = inlined_call_operand.vmem [shape: f32[2,4,16,16,7], index: 1, kind: output, shape index: {}]  }
   0x2   :  { %v2500_v1 = vsub.s32 6, %v2_v0 }
   0x4   :  { %4 = vset.pattern.permute.xlu0 %v2500_v1 }
   0x5   :  { %s2503_s6 = smov 0   ;;  %s2505_s7 = smov 0  }
   0x6   :  { %s2507_s8 = smov 0  }
   0x7 LB: > { %s2167_s9 = sadd.s32 4294967295, %s2488_s8   ;;  %s35_s10 = sadd.s32 1, %s2484_s7  ;;  %s2488_s8 = sphi %s2507_s8, %s10_s8   ;;  %s2484_s7 = sphi %s2505_s7, %s3069_s7   ;;  %s2480_s6 = sphi %s2503_s6, %s3068_s6  }
   0x8   : > { %p37_p0 = scmp.ge.s32.totalorder %s35_s10, 2  ;;  %p2169_p1 = scmp.ge.s32.totalorder %s2488_s8, 2 }
   0x9   : > { %s59_s11 = sand.u32 (!%p2169_p1), 1, %s2488_s8   ;;  %s2438_s12 = sshll.u32 (!%p2169_p1), %s2484_s7, 7 }
   0xa   : > { %s3071_s10 = smov (%p37_p0, %s35_s10), 0  ;;  %57 = sbr.rel (%p2169_p1) target bundleno = 80 (0x50), region = 16 }
   0xb   : > { %s2170_s13 = sshll.u32 (!%p2169_p1), %s59_s11, 10  ;;  %s2528_s16 = scalar_lea.vmem (!%p2169_p1), %s3066_s0, %s2438_s12 }
   0xc   : > { %s2533_s17 = scalar_lea.vmem (!%p2169_p1), [#allocation0], %s2170_s13 }
   0xf   : > { %v358_v2 = vld [vmem:[%s2528_s16] sm:$0xff]  ;;  %v360_v3 = vld [vmem:[%s2528_s16 + $0x8] sm:$0xff]  ;;  %v362_v4 = vld [vmem:[%s2528_s16 + $0x10] sm:$0xff] }
  0x10   : > { %359 = vst [vmem:[%s2533_s17] sm:$0xff] %v358_v2  ;;  %361 = vst [vmem:[%s2533_s17 + $0x8] sm:$0xff] %v360_v3  ;;  %v364_v5 = vld [vmem:[%s2528_s16 + $0x18] sm:$0xff]  ;;  %v366_v6 = vld [vmem:[%s2528_s16 + $0x20] sm:$0xff] }
  0x11   : > { %363 = vst [vmem:[%s2533_s17 + $0x10] sm:$0xff] %v362_v4  ;;  %v368_v7 = vld [vmem:[%s2528_s16 + $0x28] sm:$0xff]  ;;  %365 = vst [vmem:[%s2533_s17 + $0x18] sm:$0xff] %v364_v5  ;;  %v370_v8 = vld [vmem:[%s2528_s16 + $0x30] sm:$0xff] }
  0x12   : > { %367 = vst [vmem:[%s2533_s17 + $0x20] sm:$0xff] %v366_v6  ;;  %369 = vst [vmem:[%s2533_s17 + $0x28] sm:$0xff] %v368_v7  ;;  %v372_v9 = vld [vmem:[%s2528_s16 + $0x38] sm:$0xff]  ;;  %v374_v10 = vld [vmem:[%s2528_s16 + $0x40] sm:$0xff] }
  0x13   : > { %371 = vst [vmem:[%s2533_s17 + $0x30] sm:$0xff] %v370_v8  ;;  %373 = vst [vmem:[%s2533_s17 + $0x38] sm:$0xff] %v372_v9  ;;  %v376_v11 = vld [vmem:[%s2528_s16 + $0x48] sm:$0xff]  ;;  %v378_v12 = vld [vmem:[%s2528_s16 + $0x50] sm:$0xff] }
  0x14   : > { %375 = vst [vmem:[%s2533_s17 + $0x40] sm:$0xff] %v374_v10  ;;  %v380_v13 = vld [vmem:[%s2528_s16 + $0x58] sm:$0xff]  ;;  %377 = vst [vmem:[%s2533_s17 + $0x48] sm:$0xff] %v376_v11  ;;  %v382_v14 = vld [vmem:[%s2528_s16 + $0x60] sm:$0xff] }
  0x15   : > { %379 = vst [vmem:[%s2533_s17 + $0x50] sm:$0xff] %v378_v12  ;;  %381 = vst [vmem:[%s2533_s17 + $0x58] sm:$0xff] %v380_v13  ;;  %v384_v15 = vld [vmem:[%s2528_s16 + $0x68] sm:$0xff]  ;;  %v386_v16 = vld [vmem:[%s2528_s16 + $0x70] sm:$0xff] }
  0x16   : > { %383 = vst [vmem:[%s2533_s17 + $0x60] sm:$0xff] %v382_v14  ;;  %385 = vst [vmem:[%s2533_s17 + $0x68] sm:$0xff] %v384_v15  ;;  %v388_v17 = vld [vmem:[%s2528_s16 + $0x78] sm:$0xff]  ;;  %v390_v18 = vld [vmem:[%s2528_s16 + $0x100] sm:$0xff] }
  0x17   : > { %387 = vst [vmem:[%s2533_s17 + $0x70] sm:$0xff] %v386_v16  ;;  %v392_v19 = vld [vmem:[%s2528_s16 + $0x108] sm:$0xff]  ;;  %389 = vst [vmem:[%s2533_s17 + $0x78] sm:$0xff] %v388_v17  ;;  %v394_v20 = vld [vmem:[%s2528_s16 + $0x110] sm:$0xff] }
  0x18   : > { %391 = vst [vmem:[%s2533_s17 + $0x80] sm:$0xff] %v390_v18  ;;  %393 = vst [vmem:[%s2533_s17 + $0x88] sm:$0xff] %v392_v19  ;;  %v396_v21 = vld [vmem:[%s2528_s16 + $0x118] sm:$0xff]  ;;  %v398_v22 = vld [vmem:[%s2528_s16 + $0x120] sm:$0xff] }
  0x19   : > { %395 = vst [vmem:[%s2533_s17 + $0x90] sm:$0xff] %v394_v20  ;;  %397 = vst [vmem:[%s2533_s17 + $0x98] sm:$0xff] %v396_v21  ;;  %v400_v23 = vld [vmem:[%s2528_s16 + $0x128] sm:$0xff]  ;;  %v402_v24 = vld [vmem:[%s2528_s16 + $0x130] sm:$0xff] }
  0x1a   : > { %399 = vst [vmem:[%s2533_s17 + $0xa0] sm:$0xff] %v398_v22  ;;  %v404_v25 = vld [vmem:[%s2528_s16 + $0x138] sm:$0xff]  ;;  %401 = vst [vmem:[%s2533_s17 + $0xa8] sm:$0xff] %v400_v23  ;;  %v406_v26 = vld [vmem:[%s2528_s16 + $0x140] sm:$0xff] }
  0x1b   : > { %403 = vst [vmem:[%s2533_s17 + $0xb0] sm:$0xff] %v402_v24  ;;  %405 = vst [vmem:[%s2533_s17 + $0xb8] sm:$0xff] %v404_v25  ;;  %v408_v27 = vld [vmem:[%s2528_s16 + $0x148] sm:$0xff]  ;;  %v410_v28 = vld [vmem:[%s2528_s16 + $0x150] sm:$0xff] }
  0x1c   : > { %407 = vst [vmem:[%s2533_s17 + $0xc0] sm:$0xff] %v406_v26  ;;  %409 = vst [vmem:[%s2533_s17 + $0xc8] sm:$0xff] %v408_v27  ;;  %v412_v29 = vld [vmem:[%s2528_s16 + $0x158] sm:$0xff]  ;;  %v414_v30 = vld [vmem:[%s2528_s16 + $0x160] sm:$0xff] }
  0x1d   : > { %411 = vst [vmem:[%s2533_s17 + $0xd0] sm:$0xff] %v410_v28  ;;  %v416_v31 = vld [vmem:[%s2528_s16 + $0x168] sm:$0xff]  ;;  %413 = vst [vmem:[%s2533_s17 + $0xd8] sm:$0xff] %v412_v29  ;;  %v418_v32 = vld [vmem:[%s2528_s16 + $0x170] sm:$0xff] }
  0x1e   : > { %415 = vst [vmem:[%s2533_s17 + $0xe0] sm:$0xff] %v414_v30  ;;  %417 = vst [vmem:[%s2533_s17 + $0xe8] sm:$0xff] %v416_v31  ;;  %v420_v33 = vld [vmem:[%s2528_s16 + $0x178] sm:$0xff]  ;;  %v422_v34 = vld [vmem:[%s2528_s16 + $0x200] sm:$0xff] }
  0x1f   : > { %419 = vst [vmem:[%s2533_s17 + $0xf0] sm:$0xff] %v418_v32  ;;  %421 = vst [vmem:[%s2533_s17 + $0xf8] sm:$0xff] %v420_v33  ;;  %v424_v35 = vld [vmem:[%s2528_s16 + $0x208] sm:$0xff]  ;;  %v426_v36 = vld [vmem:[%s2528_s16 + $0x210] sm:$0xff] }
  0x20   : > { %423 = vst [vmem:[%s2533_s17 + $0x100] sm:$0xff] %v422_v34  ;;  %v428_v37 = vld [vmem:[%s2528_s16 + $0x218] sm:$0xff]  ;;  %425 = vst [vmem:[%s2533_s17 + $0x108] sm:$0xff] %v424_v35  ;;  %v430_v38 = vld [vmem:[%s2528_s16 + $0x220] sm:$0xff] }
  0x21   : > { %427 = vst [vmem:[%s2533_s17 + $0x110] sm:$0xff] %v426_v36  ;;  %429 = vst [vmem:[%s2533_s17 + $0x118] sm:$0xff] %v428_v37  ;;  %v432_v39 = vld [vmem:[%s2528_s16 + $0x228] sm:$0xff]  ;;  %v434_v40 = vld [vmem:[%s2528_s16 + $0x230] sm:$0xff] }
  0x22   : > { %431 = vst [vmem:[%s2533_s17 + $0x120] sm:$0xff] %v430_v38  ;;  %433 = vst [vmem:[%s2533_s17 + $0x128] sm:$0xff] %v432_v39  ;;  %v436_v41 = vld [vmem:[%s2528_s16 + $0x238] sm:$0xff]  ;;  %v438_v42 = vld [vmem:[%s2528_s16 + $0x240] sm:$0xff] }
  0x23   : > { %435 = vst [vmem:[%s2533_s17 + $0x130] sm:$0xff] %v434_v40  ;;  %v440_v43 = vld [vmem:[%s2528_s16 + $0x248] sm:$0xff]  ;;  %437 = vst [vmem:[%s2533_s17 + $0x138] sm:$0xff] %v436_v41  ;;  %v442_v44 = vld [vmem:[%s2528_s16 + $0x250] sm:$0xff] }
  0x24   : > { %439 = vst [vmem:[%s2533_s17 + $0x140] sm:$0xff] %v438_v42  ;;  %441 = vst [vmem:[%s2533_s17 + $0x148] sm:$0xff] %v440_v43  ;;  %v444_v45 = vld [vmem:[%s2528_s16 + $0x258] sm:$0xff]  ;;  %v446_v46 = vld [vmem:[%s2528_s16 + $0x260] sm:$0xff] }
  0x25   : > { %443 = vst [vmem:[%s2533_s17 + $0x150] sm:$0xff] %v442_v44  ;;  %445 = vst [vmem:[%s2533_s17 + $0x158] sm:$0xff] %v444_v45  ;;  %v448_v47 = vld [vmem:[%s2528_s16 + $0x268] sm:$0xff]  ;;  %v450_v48 = vld [vmem:[%s2528_s16 + $0x270] sm:$0xff] }
  0x26   : > { %447 = vst [vmem:[%s2533_s17 + $0x160] sm:$0xff] %v446_v46  ;;  %v452_v49 = vld [vmem:[%s2528_s16 + $0x278] sm:$0xff]  ;;  %449 = vst [vmem:[%s2533_s17 + $0x168] sm:$0xff] %v448_v47  ;;  %v454_v50 = vld [vmem:[%s2528_s16 + $0x300] sm:$0xff] }
  0x27   : > { %451 = vst [vmem:[%s2533_s17 + $0x170] sm:$0xff] %v450_v48  ;;  %453 = vst [vmem:[%s2533_s17 + $0x178] sm:$0xff] %v452_v49  ;;  %v456_v51 = vld [vmem:[%s2528_s16 + $0x308] sm:$0xff]  ;;  %v458_v52 = vld [vmem:[%s2528_s16 + $0x310] sm:$0xff] }
  0x28   : > { %455 = vst [vmem:[%s2533_s17 + $0x180] sm:$0xff] %v454_v50  ;;  %457 = vst [vmem:[%s2533_s17 + $0x188] sm:$0xff] %v456_v51  ;;  %v460_v53 = vld [vmem:[%s2528_s16 + $0x318] sm:$0xff]  ;;  %v462_v54 = vld [vmem:[%s2528_s16 + $0x320] sm:$0xff] }
  0x29   : > { %459 = vst [vmem:[%s2533_s17 + $0x190] sm:$0xff] %v458_v52  ;;  %v464_v55 = vld [vmem:[%s2528_s16 + $0x328] sm:$0xff]  ;;  %461 = vst [vmem:[%s2533_s17 + $0x198] sm:$0xff] %v460_v53  ;;  %v466_v56 = vld [vmem:[%s2528_s16 + $0x330] sm:$0xff] }
  0x2a   : > { %463 = vst [vmem:[%s2533_s17 + $0x1a0] sm:$0xff] %v462_v54  ;;  %465 = vst [vmem:[%s2533_s17 + $0x1a8] sm:$0xff] %v464_v55  ;;  %v468_v57 = vld [vmem:[%s2528_s16 + $0x338] sm:$0xff]  ;;  %v470_v58 = vld [vmem:[%s2528_s16 + $0x340] sm:$0xff] }
  0x2b   : > { %467 = vst [vmem:[%s2533_s17 + $0x1b0] sm:$0xff] %v466_v56  ;;  %469 = vst [vmem:[%s2533_s17 + $0x1b8] sm:$0xff] %v468_v57  ;;  %v472_v59 = vld [vmem:[%s2528_s16 + $0x348] sm:$0xff]  ;;  %v474_v60 = vld [vmem:[%s2528_s16 + $0x350] sm:$0xff] }
  0x2c   : > { %471 = vst [vmem:[%s2533_s17 + $0x1c0] sm:$0xff] %v470_v58  ;;  %v476_v61 = vld [vmem:[%s2528_s16 + $0x358] sm:$0xff]  ;;  %473 = vst [vmem:[%s2533_s17 + $0x1c8] sm:$0xff] %v472_v59  ;;  %v478_v62 = vld [vmem:[%s2528_s16 + $0x360] sm:$0xff] }
  0x2d   : > { %475 = vst [vmem:[%s2533_s17 + $0x1d0] sm:$0xff] %v474_v60  ;;  %477 = vst [vmem:[%s2533_s17 + $0x1d8] sm:$0xff] %v476_v61  ;;  %v480_v63 = vld [vmem:[%s2528_s16 + $0x368] sm:$0xff]  ;;  %v482_v0 = vld [vmem:[%s2528_s16 + $0x370] sm:$0xff] }
  0x2e   : > { %479 = vst [vmem:[%s2533_s17 + $0x1e0] sm:$0xff] %v478_v62  ;;  %481 = vst [vmem:[%s2533_s17 + $0x1e8] sm:$0xff] %v480_v63  ;;  %v484_v2 = vld [vmem:[%s2528_s16 + $0x378] sm:$0xff]  ;;  %v486_v3 = vld [vmem:[%s2528_s16 + $0x400] sm:$0xff] }
  0x2f   : > { %483 = vst [vmem:[%s2533_s17 + $0x1f0] sm:$0xff] %v482_v0  ;;  %v488_v4 = vld [vmem:[%s2528_s16 + $0x408] sm:$0xff]  ;;  %485 = vst [vmem:[%s2533_s17 + $0x1f8] sm:$0xff] %v484_v2  ;;  %v490_v5 = vld [vmem:[%s2528_s16 + $0x410] sm:$0xff] }
  0x30   : > { %487 = vst [vmem:[%s2533_s17 + $0x200] sm:$0xff] %v486_v3  ;;  %489 = vst [vmem:[%s2533_s17 + $0x208] sm:$0xff] %v488_v4  ;;  %v492_v6 = vld [vmem:[%s2528_s16 + $0x418] sm:$0xff]  ;;  %v494_v7 = vld [vmem:[%s2528_s16 + $0x420] sm:$0xff] }
  0x31   : > { %491 = vst [vmem:[%s2533_s17 + $0x210] sm:$0xff] %v490_v5  ;;  %493 = vst [vmem:[%s2533_s17 + $0x218] sm:$0xff] %v492_v6  ;;  %v496_v8 = vld [vmem:[%s2528_s16 + $0x428] sm:$0xff]  ;;  %v498_v9 = vld [vmem:[%s2528_s16 + $0x430] sm:$0xff] }
  0x32   : > { %495 = vst [vmem:[%s2533_s17 + $0x220] sm:$0xff] %v494_v7  ;;  %v500_v10 = vld [vmem:[%s2528_s16 + $0x438] sm:$0xff]  ;;  %497 = vst [vmem:[%s2533_s17 + $0x228] sm:$0xff] %v496_v8  ;;  %v502_v11 = vld [vmem:[%s2528_s16 + $0x440] sm:$0xff] }
  0x33   : > { %499 = vst [vmem:[%s2533_s17 + $0x230] sm:$0xff] %v498_v9  ;;  %501 = vst [vmem:[%s2533_s17 + $0x238] sm:$0xff] %v500_v10  ;;  %v504_v12 = vld [vmem:[%s2528_s16 + $0x448] sm:$0xff]  ;;  %v506_v13 = vld [vmem:[%s2528_s16 + $0x450] sm:$0xff] }
  0x34   : > { %503 = vst [vmem:[%s2533_s17 + $0x240] sm:$0xff] %v502_v11  ;;  %505 = vst [vmem:[%s2533_s17 + $0x248] sm:$0xff] %v504_v12  ;;  %v508_v14 = vld [vmem:[%s2528_s16 + $0x458] sm:$0xff]  ;;  %v510_v15 = vld [vmem:[%s2528_s16 + $0x460] sm:$0xff] }
  0x35   : > { %507 = vst [vmem:[%s2533_s17 + $0x250] sm:$0xff] %v506_v13  ;;  %v512_v16 = vld [vmem:[%s2528_s16 + $0x468] sm:$0xff]  ;;  %509 = vst [vmem:[%s2533_s17 + $0x258] sm:$0xff] %v508_v14  ;;  %v514_v17 = vld [vmem:[%s2528_s16 + $0x470] sm:$0xff] }
  0x36   : > { %511 = vst [vmem:[%s2533_s17 + $0x260] sm:$0xff] %v510_v15  ;;  %513 = vst [vmem:[%s2533_s17 + $0x268] sm:$0xff] %v512_v16  ;;  %v516_v18 = vld [vmem:[%s2528_s16 + $0x478] sm:$0xff]  ;;  %v518_v19 = vld [vmem:[%s2528_s16 + $0x500] sm:$0xff] }
  0x37   : > { %515 = vst [vmem:[%s2533_s17 + $0x270] sm:$0xff] %v514_v17  ;;  %517 = vst [vmem:[%s2533_s17 + $0x278] sm:$0xff] %v516_v18  ;;  %v520_v20 = vld [vmem:[%s2528_s16 + $0x508] sm:$0xff]  ;;  %v522_v21 = vld [vmem:[%s2528_s16 + $0x510] sm:$0xff] }
  0x38   : > { %519 = vst [vmem:[%s2533_s17 + $0x280] sm:$0xff] %v518_v19  ;;  %v524_v22 = vld [vmem:[%s2528_s16 + $0x518] sm:$0xff]  ;;  %521 = vst [vmem:[%s2533_s17 + $0x288] sm:$0xff] %v520_v20  ;;  %v526_v23 = vld [vmem:[%s2528_s16 + $0x520] sm:$0xff] }
  0x39   : > { %523 = vst [vmem:[%s2533_s17 + $0x290] sm:$0xff] %v522_v21  ;;  %525 = vst [vmem:[%s2533_s17 + $0x298] sm:$0xff] %v524_v22  ;;  %v528_v24 = vld [vmem:[%s2528_s16 + $0x528] sm:$0xff]  ;;  %v530_v25 = vld [vmem:[%s2528_s16 + $0x530] sm:$0xff] }
  0x3a   : > { %527 = vst [vmem:[%s2533_s17 + $0x2a0] sm:$0xff] %v526_v23  ;;  %529 = vst [vmem:[%s2533_s17 + $0x2a8] sm:$0xff] %v528_v24  ;;  %v532_v26 = vld [vmem:[%s2528_s16 + $0x538] sm:$0xff]  ;;  %v534_v27 = vld [vmem:[%s2528_s16 + $0x540] sm:$0xff] }
  0x3b   : > { %531 = vst [vmem:[%s2533_s17 + $0x2b0] sm:$0xff] %v530_v25  ;;  %v536_v28 = vld [vmem:[%s2528_s16 + $0x548] sm:$0xff]  ;;  %533 = vst [vmem:[%s2533_s17 + $0x2b8] sm:$0xff] %v532_v26  ;;  %v538_v29 = vld [vmem:[%s2528_s16 + $0x550] sm:$0xff] }
  0x3c   : > { %535 = vst [vmem:[%s2533_s17 + $0x2c0] sm:$0xff] %v534_v27  ;;  %537 = vst [vmem:[%s2533_s17 + $0x2c8] sm:$0xff] %v536_v28  ;;  %v540_v30 = vld [vmem:[%s2528_s16 + $0x558] sm:$0xff]  ;;  %v542_v31 = vld [vmem:[%s2528_s16 + $0x560] sm:$0xff] }
  0x3d   : > { %539 = vst [vmem:[%s2533_s17 + $0x2d0] sm:$0xff] %v538_v29  ;;  %541 = vst [vmem:[%s2533_s17 + $0x2d8] sm:$0xff] %v540_v30  ;;  %v544_v32 = vld [vmem:[%s2528_s16 + $0x568] sm:$0xff]  ;;  %v546_v33 = vld [vmem:[%s2528_s16 + $0x570] sm:$0xff] }
  0x3e   : > { %543 = vst [vmem:[%s2533_s17 + $0x2e0] sm:$0xff] %v542_v31  ;;  %v548_v34 = vld [vmem:[%s2528_s16 + $0x578] sm:$0xff]  ;;  %545 = vst [vmem:[%s2533_s17 + $0x2e8] sm:$0xff] %v544_v32  ;;  %v550_v35 = vld [vmem:[%s2528_s16 + $0x600] sm:$0xff] }
  0x3f   : > { %547 = vst [vmem:[%s2533_s17 + $0x2f0] sm:$0xff] %v546_v33  ;;  %549 = vst [vmem:[%s2533_s17 + $0x2f8] sm:$0xff] %v548_v34  ;;  %v552_v36 = vld [vmem:[%s2528_s16 + $0x608] sm:$0xff]  ;;  %v554_v37 = vld [vmem:[%s2528_s16 + $0x610] sm:$0xff] }
  0x40   : > { %551 = vst [vmem:[%s2533_s17 + $0x300] sm:$0xff] %v550_v35  ;;  %553 = vst [vmem:[%s2533_s17 + $0x308] sm:$0xff] %v552_v36  ;;  %v556_v38 = vld [vmem:[%s2528_s16 + $0x618] sm:$0xff]  ;;  %v558_v39 = vld [vmem:[%s2528_s16 + $0x620] sm:$0xff] }
  0x41   : > { %555 = vst [vmem:[%s2533_s17 + $0x310] sm:$0xff] %v554_v37  ;;  %v560_v40 = vld [vmem:[%s2528_s16 + $0x628] sm:$0xff]  ;;  %557 = vst [vmem:[%s2533_s17 + $0x318] sm:$0xff] %v556_v38  ;;  %v562_v41 = vld [vmem:[%s2528_s16 + $0x630] sm:$0xff] }
  0x42   : > { %559 = vst [vmem:[%s2533_s17 + $0x320] sm:$0xff] %v558_v39  ;;  %561 = vst [vmem:[%s2533_s17 + $0x328] sm:$0xff] %v560_v40  ;;  %v564_v42 = vld [vmem:[%s2528_s16 + $0x638] sm:$0xff]  ;;  %v566_v43 = vld [vmem:[%s2528_s16 + $0x640] sm:$0xff] }
  0x43   : > { %563 = vst [vmem:[%s2533_s17 + $0x330] sm:$0xff] %v562_v41  ;;  %565 = vst [vmem:[%s2533_s17 + $0x338] sm:$0xff] %v564_v42  ;;  %v568_v44 = vld [vmem:[%s2528_s16 + $0x648] sm:$0xff]  ;;  %v570_v45 = vld [vmem:[%s2528_s16 + $0x650] sm:$0xff] }
  0x44   : > { %567 = vst [vmem:[%s2533_s17 + $0x340] sm:$0xff] %v566_v43  ;;  %v572_v46 = vld [vmem:[%s2528_s16 + $0x658] sm:$0xff]  ;;  %569 = vst [vmem:[%s2533_s17 + $0x348] sm:$0xff] %v568_v44  ;;  %v574_v47 = vld [vmem:[%s2528_s16 + $0x660] sm:$0xff] }
  0x45   : > { %571 = vst [vmem:[%s2533_s17 + $0x350] sm:$0xff] %v570_v45  ;;  %573 = vst [vmem:[%s2533_s17 + $0x358] sm:$0xff] %v572_v46  ;;  %v576_v48 = vld [vmem:[%s2528_s16 + $0x668] sm:$0xff]  ;;  %v578_v49 = vld [vmem:[%s2528_s16 + $0x670] sm:$0xff] }
  0x46   : > { %575 = vst [vmem:[%s2533_s17 + $0x360] sm:$0xff] %v574_v47  ;;  %577 = vst [vmem:[%s2533_s17 + $0x368] sm:$0xff] %v576_v48  ;;  %v580_v50 = vld [vmem:[%s2528_s16 + $0x678] sm:$0xff]  ;;  %v582_v51 = vld [vmem:[%s2528_s16 + $0x700] sm:$0xff] }
  0x47   : > { %579 = vst [vmem:[%s2533_s17 + $0x370] sm:$0xff] %v578_v49  ;;  %v584_v52 = vld [vmem:[%s2528_s16 + $0x708] sm:$0xff]  ;;  %581 = vst [vmem:[%s2533_s17 + $0x378] sm:$0xff] %v580_v50  ;;  %v586_v53 = vld [vmem:[%s2528_s16 + $0x710] sm:$0xff] }
  0x48   : > { %583 = vst [vmem:[%s2533_s17 + $0x380] sm:$0xff] %v582_v51  ;;  %585 = vst [vmem:[%s2533_s17 + $0x388] sm:$0xff] %v584_v52  ;;  %v588_v54 = vld [vmem:[%s2528_s16 + $0x718] sm:$0xff]  ;;  %v590_v55 = vld [vmem:[%s2528_s16 + $0x720] sm:$0xff] }
  0x49   : > { %587 = vst [vmem:[%s2533_s17 + $0x390] sm:$0xff] %v586_v53  ;;  %589 = vst [vmem:[%s2533_s17 + $0x398] sm:$0xff] %v588_v54  ;;  %v592_v56 = vld [vmem:[%s2528_s16 + $0x728] sm:$0xff]  ;;  %v594_v57 = vld [vmem:[%s2528_s16 + $0x730] sm:$0xff] }
  0x4a   : > { %591 = vst [vmem:[%s2533_s17 + $0x3a0] sm:$0xff] %v590_v55  ;;  %v596_v58 = vld [vmem:[%s2528_s16 + $0x738] sm:$0xff]  ;;  %593 = vst [vmem:[%s2533_s17 + $0x3a8] sm:$0xff] %v592_v56  ;;  %v598_v59 = vld [vmem:[%s2528_s16 + $0x740] sm:$0xff] }
  0x4b   : > { %595 = vst [vmem:[%s2533_s17 + $0x3b0] sm:$0xff] %v594_v57  ;;  %597 = vst [vmem:[%s2533_s17 + $0x3b8] sm:$0xff] %v596_v58  ;;  %v600_v60 = vld [vmem:[%s2528_s16 + $0x748] sm:$0xff]  ;;  %v602_v61 = vld [vmem:[%s2528_s16 + $0x750] sm:$0xff] }
  0x4c   : > { %599 = vst [vmem:[%s2533_s17 + $0x3c0] sm:$0xff] %v598_v59  ;;  %601 = vst [vmem:[%s2533_s17 + $0x3c8] sm:$0xff] %v600_v60  ;;  %v604_v62 = vld [vmem:[%s2528_s16 + $0x758] sm:$0xff]  ;;  %v606_v63 = vld [vmem:[%s2528_s16 + $0x760] sm:$0xff] }
  0x4d   : > { %603 = vst [vmem:[%s2533_s17 + $0x3d0] sm:$0xff] %v602_v61  ;;  %v608_v0 = vld [vmem:[%s2528_s16 + $0x768] sm:$0xff]  ;;  %605 = vst [vmem:[%s2533_s17 + $0x3d8] sm:$0xff] %v604_v62  ;;  %v610_v2 = vld [vmem:[%s2528_s16 + $0x770] sm:$0xff] }
  0x4e   : > { %607 = vst [vmem:[%s2533_s17 + $0x3e0] sm:$0xff] %v606_v63  ;;  %609 = vst [vmem:[%s2533_s17 + $0x3e8] sm:$0xff] %v608_v0  ;;  %v612_v3 = vld [vmem:[%s2528_s16 + $0x778] sm:$0xff] }
  0x4f   : > { %611 = vst [vmem:[%s2533_s17 + $0x3f0] sm:$0xff] %v610_v2  ;;  %613 = vst [vmem:[%s2533_s17 + $0x3f8] sm:$0xff] %v612_v3 }
  0x50 PF: > { %p2174_p2 = scmp.ge.s32.totalorder %s2488_s8, 1  ;;  %p618_p3 = scmp.lt.s32.totalorder %s2488_s8, 3 }
  0x52   : > { %p619_p4 = pnand %p2174_p2, %p618_p3 }
  0x53   : > { %s625_s18 = sand.u32 (!%p619_p4), 1, %s2167_s9   ;;  %s2440_s21 = sshll.u32 (!%p619_p4), %s2480_s6, 7 }
  0x54   : > { %622 = sbr.rel (%p619_p4) target bundleno = 467 (0x1d3), region = 54  ;;  %s2175_s19 = sshll.u32 (!%p619_p4), %s625_s18, 10 }
  0x55   : > { %s2793_s20 = scalar_lea.vmem (!%p619_p4), [#allocation0], %s2175_s19  ;;  %s2861_s24 = scalar_lea.vmem (!%p619_p4), %s3067_s1, %s2440_s21 }
  0x59   : > { %2465 = vset.pattern.permute.xlu1 %v2500_v1  ;;  %v2179_v4 = vld [vmem:[%s2793_s20 + $0x10] sm:$0xff]  ;;  %v645_v5 = vld [vmem:[%s2793_s20] sm:$0xff]  ;;  %v2181_v6 = vld [vmem:[%s2793_s20 + $0x18] sm:$0xff] }
  0x5a   : > { %658 = vperm.xlu1 %2465, %v2179_v4   ;;  %646 = vperm.xlu0 %4, %v645_v5   ;;  %v2177_v7 = vld [vmem:[%s2793_s20 + $0x8] sm:$0xff]  ;;  %v2183_v9 = vld [vmem:[%s2793_s20 + $0x20] sm:$0xff]  ;;  %v2189_v10 = vld [vmem:[%s2793_s20 + $0x38] sm:$0xff] }
  0x5b   : > { %v2185_v8 = vld [vmem:[%s2793_s20 + $0x28] sm:$0xff]  ;;  %v2187_v11 = vld [vmem:[%s2793_s20 + $0x30] sm:$0xff]  ;;  %v2191_v13 = vld [vmem:[%s2793_s20 + $0x40] sm:$0xff] }
  0x5c   : > { %v2193_v12 = vld [vmem:[%s2793_s20 + $0x48] sm:$0xff]  ;;  %v2197_v14 = vld [vmem:[%s2793_s20 + $0x58] sm:$0xff]  ;;  %v2195_v15 = vld [vmem:[%s2793_s20 + $0x50] sm:$0xff] }
  0x5d   : > { %v2201_v16 = vld [vmem:[%s2793_s20 + $0x68] sm:$0xff]  ;;  %v2199_v17 = vld [vmem:[%s2793_s20 + $0x60] sm:$0xff]  ;;  %v2205_v18 = vld [vmem:[%s2793_s20 + $0x78] sm:$0xff] }
  0x5e   : > { %664 = vperm.xlu1 %2465, %v2181_v6   ;;  %652 = vperm.xlu0 %4, %v2177_v7   ;;  %v2203_v19 = vld [vmem:[%s2793_s20 + $0x70] sm:$0xff]  ;;  %v2209_v20 = vld [vmem:[%s2793_s20 + $0x88] sm:$0xff]  ;;  %v2207_v21 = vld [vmem:[%s2793_s20 + $0x80] sm:$0xff] }
  0x5f   : > { %v2213_v22 = vld [vmem:[%s2793_s20 + $0x98] sm:$0xff]  ;;  %v2211_v23 = vld [vmem:[%s2793_s20 + $0x90] sm:$0xff]  ;;  %v2217_v24 = vld [vmem:[%s2793_s20 + $0xa8] sm:$0xff] }
  0x60   : > { %v2215_v25 = vld [vmem:[%s2793_s20 + $0xa0] sm:$0xff]  ;;  %v2221_v26 = vld [vmem:[%s2793_s20 + $0xb8] sm:$0xff]  ;;  %v2219_v27 = vld [vmem:[%s2793_s20 + $0xb0] sm:$0xff] }
  0x61   : > { %v2225_v28 = vld [vmem:[%s2793_s20 + $0xc8] sm:$0xff]  ;;  %v2223_v29 = vld [vmem:[%s2793_s20 + $0xc0] sm:$0xff]  ;;  %v2229_v30 = vld [vmem:[%s2793_s20 + $0xd8] sm:$0xff] }
  0x62   : > { %676 = vperm.xlu1 %2465, %v2185_v8   ;;  %670 = vperm.xlu0 %4, %v2183_v9   ;;  %v2227_v31 = vld [vmem:[%s2793_s20 + $0xd0] sm:$0xff]  ;;  %v2233_v32 = vld [vmem:[%s2793_s20 + $0xe8] sm:$0xff]  ;;  %v2231_v33 = vld [vmem:[%s2793_s20 + $0xe0] sm:$0xff] }
  0x63   : > { %v2237_v34 = vld [vmem:[%s2793_s20 + $0xf8] sm:$0xff]  ;;  %v2235_v35 = vld [vmem:[%s2793_s20 + $0xf0] sm:$0xff]  ;;  %v2241_v36 = vld [vmem:[%s2793_s20 + $0x108] sm:$0xff] }
  0x64   : > { %v2239_v37 = vld [vmem:[%s2793_s20 + $0x100] sm:$0xff]  ;;  %v2245_v38 = vld [vmem:[%s2793_s20 + $0x118] sm:$0xff]  ;;  %v2243_v39 = vld [vmem:[%s2793_s20 + $0x110] sm:$0xff] }
  0x65   : > { %v2249_v40 = vld [vmem:[%s2793_s20 + $0x128] sm:$0xff]  ;;  %v2247_v41 = vld [vmem:[%s2793_s20 + $0x120] sm:$0xff]  ;;  %v2253_v42 = vld [vmem:[%s2793_s20 + $0x138] sm:$0xff] }
  0x66   : > { %688 = vperm.xlu1 %2465, %v2189_v10   ;;  %682 = vperm.xlu0 %4, %v2187_v11   ;;  %v2251_v43 = vld [vmem:[%s2793_s20 + $0x130] sm:$0xff]  ;;  %v2257_v44 = vld [vmem:[%s2793_s20 + $0x148] sm:$0xff]  ;;  %v2255_v45 = vld [vmem:[%s2793_s20 + $0x140] sm:$0xff] }
  0x67   : > { %v2261_v46 = vld [vmem:[%s2793_s20 + $0x158] sm:$0xff]  ;;  %v2259_v47 = vld [vmem:[%s2793_s20 + $0x150] sm:$0xff]  ;;  %v2265_v48 = vld [vmem:[%s2793_s20 + $0x168] sm:$0xff] }
  0x68   : > { %v2263_v49 = vld [vmem:[%s2793_s20 + $0x160] sm:$0xff]  ;;  %v2269_v50 = vld [vmem:[%s2793_s20 + $0x178] sm:$0xff]  ;;  %v2267_v51 = vld [vmem:[%s2793_s20 + $0x170] sm:$0xff] }
  0x69   : > { %v2273_v52 = vld [vmem:[%s2793_s20 + $0x188] sm:$0xff]  ;;  %v2271_v53 = vld [vmem:[%s2793_s20 + $0x180] sm:$0xff]  ;;  %v2277_v54 = vld [vmem:[%s2793_s20 + $0x198] sm:$0xff] }
  0x6a   : > { %700 = vperm.xlu1 %2465, %v2193_v12   ;;  %694 = vperm.xlu0 %4, %v2191_v13   ;;  %v2275_v55 = vld [vmem:[%s2793_s20 + $0x190] sm:$0xff]  ;;  %v2281_v56 = vld [vmem:[%s2793_s20 + $0x1a8] sm:$0xff]  ;;  %v2279_v57 = vld [vmem:[%s2793_s20 + $0x1a0] sm:$0xff] }
  0x6b   : > { %v2285_v58 = vld [vmem:[%s2793_s20 + $0x1b8] sm:$0xff]  ;;  %v2283_v59 = vld [vmem:[%s2793_s20 + $0x1b0] sm:$0xff]  ;;  %v2289_v60 = vld [vmem:[%s2793_s20 + $0x1c8] sm:$0xff] }
  0x6c   : > { %v2287_v61 = vld [vmem:[%s2793_s20 + $0x1c0] sm:$0xff]  ;;  %v2293_v62 = vld [vmem:[%s2793_s20 + $0x1d8] sm:$0xff]  ;;  %v2291_v63 = vld [vmem:[%s2793_s20 + $0x1d0] sm:$0xff] }
  0x6d   : > { %v2297_v0 = vld [vmem:[%s2793_s20 + $0x1e8] sm:$0xff]  ;;  %v2295_v2 = vld [vmem:[%s2793_s20 + $0x1e0] sm:$0xff]  ;;  %v2301_v3 = vld [vmem:[%s2793_s20 + $0x1f8] sm:$0xff] }
  0x6e   : > { %712 = vperm.xlu1 %2465, %v2197_v14   ;;  %706 = vperm.xlu0 %4, %v2195_v15   ;;  %v2299_v4 = vld [vmem:[%s2793_s20 + $0x1f0] sm:$0xff]  ;;  %v2305_v7 = vld [vmem:[%s2793_s20 + $0x208] sm:$0xff]  ;;  %v2303_v8 = vld [vmem:[%s2793_s20 + $0x200] sm:$0xff] }
  0x6f   : > { %v2309_v11 = vld [vmem:[%s2793_s20 + $0x218] sm:$0xff]  ;;  %v2307_v12 = vld [vmem:[%s2793_s20 + $0x210] sm:$0xff]  ;;  %v2313_v15 = vld [vmem:[%s2793_s20 + $0x228] sm:$0xff] }
  0x72   : > { %724 = vperm.xlu1 %2465, %v2201_v16   ;;  %718 = vperm.xlu0 %4, %v2199_v17   ;;  %v2311_v16 = vld [vmem:[%s2793_s20 + $0x220] sm:$0xff] }
  0x76   : > { %736 = vperm.xlu1 %2465, %v2205_v18   ;;  %730 = vperm.xlu0 %4, %v2203_v19   ;;  %v2317_v19 = vld [vmem:[%s2793_s20 + $0x238] sm:$0xff] }
  0x7a   : > { %748 = vperm.xlu1 %2465, %v2209_v20   ;;  %742 = vperm.xlu0 %4, %v2207_v21   ;;  %v2315_v20 = vld [vmem:[%s2793_s20 + $0x230] sm:$0xff] }
  0x7e   : > { %760 = vperm.xlu1 %2465, %v2213_v22   ;;  %754 = vperm.xlu0 %4, %v2211_v23   ;;  %v2321_v23 = vld [vmem:[%s2793_s20 + $0x248] sm:$0xff] }
  0x82   : > { %772 = vperm.xlu1 %2465, %v2217_v24   ;;  %766 = vperm.xlu0 %4, %v2215_v25   ;;  %v2319_v24 = vld [vmem:[%s2793_s20 + $0x240] sm:$0xff] }
  0x86   : > { %784 = vperm.xlu1 %2465, %v2221_v26   ;;  %778 = vperm.xlu0 %4, %v2219_v27   ;;  %v2325_v27 = vld [vmem:[%s2793_s20 + $0x258] sm:$0xff] }
  0x8a   : > { %796 = vperm.xlu1 %2465, %v2225_v28   ;;  %790 = vperm.xlu0 %4, %v2223_v29   ;;  %v2323_v28 = vld [vmem:[%s2793_s20 + $0x250] sm:$0xff] }
  0x8e   : > { %808 = vperm.xlu1 %2465, %v2229_v30   ;;  %802 = vperm.xlu0 %4, %v2227_v31   ;;  %v2329_v31 = vld [vmem:[%s2793_s20 + $0x268] sm:$0xff] }
  0x92   : > { %820 = vperm.xlu1 %2465, %v2233_v32   ;;  %814 = vperm.xlu0 %4, %v2231_v33   ;;  %v2327_v32 = vld [vmem:[%s2793_s20 + $0x260] sm:$0xff] }
  0x96   : > { %832 = vperm.xlu1 %2465, %v2237_v34   ;;  %826 = vperm.xlu0 %4, %v2235_v35   ;;  %v2333_v35 = vld [vmem:[%s2793_s20 + $0x278] sm:$0xff] }
  0x9a   : > { %844 = vperm.xlu1 %2465, %v2241_v36   ;;  %838 = vperm.xlu0 %4, %v2239_v37   ;;  %v2331_v36 = vld [vmem:[%s2793_s20 + $0x270] sm:$0xff] }
  0x9e   : > { %856 = vperm.xlu1 %2465, %v2245_v38   ;;  %850 = vperm.xlu0 %4, %v2243_v39   ;;  %v2337_v39 = vld [vmem:[%s2793_s20 + $0x288] sm:$0xff] }
  0xa2   : > { %868 = vperm.xlu1 %2465, %v2249_v40   ;;  %862 = vperm.xlu0 %4, %v2247_v41   ;;  %v2335_v40 = vld [vmem:[%s2793_s20 + $0x280] sm:$0xff] }
  0xa6   : > { %880 = vperm.xlu1 %2465, %v2253_v42   ;;  %874 = vperm.xlu0 %4, %v2251_v43   ;;  %v2341_v43 = vld [vmem:[%s2793_s20 + $0x298] sm:$0xff] }
  0xaa   : > { %892 = vperm.xlu1 %2465, %v2257_v44   ;;  %886 = vperm.xlu0 %4, %v2255_v45   ;;  %v2339_v44 = vld [vmem:[%s2793_s20 + $0x290] sm:$0xff] }
  0xae   : > { %904 = vperm.xlu1 %2465, %v2261_v46   ;;  %898 = vperm.xlu0 %4, %v2259_v47   ;;  %v2345_v47 = vld [vmem:[%s2793_s20 + $0x2a8] sm:$0xff] }
  0xb2   : > { %916 = vperm.xlu1 %2465, %v2265_v48   ;;  %910 = vperm.xlu0 %4, %v2263_v49   ;;  %v2343_v48 = vld [vmem:[%s2793_s20 + $0x2a0] sm:$0xff] }
  0xb6   : > { %928 = vperm.xlu1 %2465, %v2269_v50   ;;  %922 = vperm.xlu0 %4, %v2267_v51   ;;  %v2349_v51 = vld [vmem:[%s2793_s20 + $0x2b8] sm:$0xff] }
  0xba   : > { %940 = vperm.xlu1 %2465, %v2273_v52   ;;  %934 = vperm.xlu0 %4, %v2271_v53   ;;  %v2347_v52 = vld [vmem:[%s2793_s20 + $0x2b0] sm:$0xff] }
  0xbe   : > { %952 = vperm.xlu1 %2465, %v2277_v54   ;;  %946 = vperm.xlu0 %4, %v2275_v55   ;;  %v2353_v55 = vld [vmem:[%s2793_s20 + $0x2c8] sm:$0xff] }
  0xc2   : > { %964 = vperm.xlu1 %2465, %v2281_v56   ;;  %958 = vperm.xlu0 %4, %v2279_v57   ;;  %v2351_v56 = vld [vmem:[%s2793_s20 + $0x2c0] sm:$0xff] }
  0xc6   : > { %976 = vperm.xlu1 %2465, %v2285_v58   ;;  %970 = vperm.xlu0 %4, %v2283_v59   ;;  %v2357_v59 = vld [vmem:[%s2793_s20 + $0x2d8] sm:$0xff] }
  0xca   : > { %988 = vperm.xlu1 %2465, %v2289_v60   ;;  %982 = vperm.xlu0 %4, %v2287_v61   ;;  %v2355_v60 = vld [vmem:[%s2793_s20 + $0x2d0] sm:$0xff] }
  0xce   : > { %1000 = vperm.xlu1 %2465, %v2293_v62   ;;  %994 = vperm.xlu0 %4, %v2291_v63   ;;  %v2361_v63 = vld [vmem:[%s2793_s20 + $0x2e8] sm:$0xff] }
  0xd2   : > { %1012 = vperm.xlu1 %2465, %v2297_v0   ;;  %1006 = vperm.xlu0 %4, %v2295_v2   ;;  %v2359_v0 = vld [vmem:[%s2793_s20 + $0x2e0] sm:$0xff] }
  0xd5   : > { %v659_v5 = vpop.permute.xlu1 %658  ;;  %v647_v6 = vpop.permute.xlu0 %646 }
  0xd6   : > { %1715 = vst [vmem:[%s2861_s24 + $0x10] sm:$0xff] %v659_v5  ;;  %1711 = vst [vmem:[%s2861_s24] sm:$0xff] %v647_v6  ;;  %1024 = vperm.xlu1 %2465, %v2301_v3   ;;  %1018 = vperm.xlu0 %4, %v2299_v4   ;;  %v2365_v4 = vld [vmem:[%s2793_s20 + $0x2f8] sm:$0xff]  ;;  %v2363_v5 = vld [vmem:[%s2793_s20 + $0x2f0] sm:$0xff] }
  0xd9   : > { %v665_v9 = vpop.permute.xlu1 %664  ;;  %v653_v10 = vpop.permute.xlu0 %652 }
  0xda   : > { %1717 = vst [vmem:[%s2861_s24 + $0x18] sm:$0xff] %v665_v9  ;;  %1713 = vst [vmem:[%s2861_s24 + $0x8] sm:$0xff] %v653_v10  ;;  %1036 = vperm.xlu1 %2465, %v2305_v7   ;;  %1030 = vperm.xlu0 %4, %v2303_v8   ;;  %v2369_v8 = vld [vmem:[%s2793_s20 + $0x308] sm:$0xff]  ;;  %v2367_v9 = vld [vmem:[%s2793_s20 + $0x300] sm:$0xff] }
  0xdd   : > { %v677_v13 = vpop.permute.xlu1 %676  ;;  %v671_v14 = vpop.permute.xlu0 %670 }
  0xde   : > { %1721 = vst [vmem:[%s2861_s24 + $0x28] sm:$0xff] %v677_v13  ;;  %1719 = vst [vmem:[%s2861_s24 + $0x20] sm:$0xff] %v671_v14  ;;  %1048 = vperm.xlu1 %2465, %v2309_v11   ;;  %1042 = vperm.xlu0 %4, %v2307_v12   ;;  %v2373_v12 = vld [vmem:[%s2793_s20 + $0x318] sm:$0xff]  ;;  %v2371_v13 = vld [vmem:[%s2793_s20 + $0x310] sm:$0xff] }
  0xe1   : > { %v689_v17 = vpop.permute.xlu1 %688  ;;  %v683_v18 = vpop.permute.xlu0 %682 }
  0xe2   : > { %1725 = vst [vmem:[%s2861_s24 + $0x38] sm:$0xff] %v689_v17  ;;  %1723 = vst [vmem:[%s2861_s24 + $0x30] sm:$0xff] %v683_v18  ;;  %1060 = vperm.xlu1 %2465, %v2313_v15   ;;  %1054 = vperm.xlu0 %4, %v2311_v16   ;;  %v2377_v16 = vld [vmem:[%s2793_s20 + $0x328] sm:$0xff]  ;;  %v2375_v17 = vld [vmem:[%s2793_s20 + $0x320] sm:$0xff] }
  0xe5   : > { %v701_v21 = vpop.permute.xlu1 %700  ;;  %v695_v22 = vpop.permute.xlu0 %694 }
  0xe6   : > { %1729 = vst [vmem:[%s2861_s24 + $0x48] sm:$0xff] %v701_v21  ;;  %1727 = vst [vmem:[%s2861_s24 + $0x40] sm:$0xff] %v695_v22  ;;  %1072 = vperm.xlu1 %2465, %v2317_v19   ;;  %1066 = vperm.xlu0 %4, %v2315_v20   ;;  %v2381_v20 = vld [vmem:[%s2793_s20 + $0x338] sm:$0xff]  ;;  %v2379_v21 = vld [vmem:[%s2793_s20 + $0x330] sm:$0xff] }
  0xe9   : > { %v713_v25 = vpop.permute.xlu1 %712  ;;  %v707_v26 = vpop.permute.xlu0 %706 }
  0xea   : > { %1733 = vst [vmem:[%s2861_s24 + $0x58] sm:$0xff] %v713_v25  ;;  %1731 = vst [vmem:[%s2861_s24 + $0x50] sm:$0xff] %v707_v26  ;;  %1084 = vperm.xlu1 %2465, %v2321_v23   ;;  %1078 = vperm.xlu0 %4, %v2319_v24   ;;  %v2385_v24 = vld [vmem:[%s2793_s20 + $0x348] sm:$0xff]  ;;  %v2383_v25 = vld [vmem:[%s2793_s20 + $0x340] sm:$0xff] }
  0xed   : > { %v725_v29 = vpop.permute.xlu1 %724  ;;  %v719_v30 = vpop.permute.xlu0 %718 }
  0xee   : > { %1737 = vst [vmem:[%s2861_s24 + $0x68] sm:$0xff] %v725_v29  ;;  %1735 = vst [vmem:[%s2861_s24 + $0x60] sm:$0xff] %v719_v30  ;;  %1096 = vperm.xlu1 %2465, %v2325_v27   ;;  %1090 = vperm.xlu0 %4, %v2323_v28   ;;  %v2389_v28 = vld [vmem:[%s2793_s20 + $0x358] sm:$0xff]  ;;  %v2387_v29 = vld [vmem:[%s2793_s20 + $0x350] sm:$0xff] }
  0xf1   : > { %v737_v33 = vpop.permute.xlu1 %736  ;;  %v731_v34 = vpop.permute.xlu0 %730 }
  0xf2   : > { %1741 = vst [vmem:[%s2861_s24 + $0x78] sm:$0xff] %v737_v33  ;;  %1739 = vst [vmem:[%s2861_s24 + $0x70] sm:$0xff] %v731_v34  ;;  %1108 = vperm.xlu1 %2465, %v2329_v31   ;;  %1102 = vperm.xlu0 %4, %v2327_v32   ;;  %v2393_v32 = vld [vmem:[%s2793_s20 + $0x368] sm:$0xff]  ;;  %v2391_v33 = vld [vmem:[%s2793_s20 + $0x360] sm:$0xff] }
  0xf5   : > { %v749_v37 = vpop.permute.xlu1 %748  ;;  %v743_v38 = vpop.permute.xlu0 %742 }
  0xf6   : > { %1745 = vst [vmem:[%s2861_s24 + $0x108] sm:$0xff] %v749_v37  ;;  %1743 = vst [vmem:[%s2861_s24 + $0x100] sm:$0xff] %v743_v38  ;;  %1120 = vperm.xlu1 %2465, %v2333_v35   ;;  %1114 = vperm.xlu0 %4, %v2331_v36   ;;  %v2397_v36 = vld [vmem:[%s2793_s20 + $0x378] sm:$0xff]  ;;  %v2395_v37 = vld [vmem:[%s2793_s20 + $0x370] sm:$0xff] }
  0xf9   : > { %v761_v41 = vpop.permute.xlu1 %760  ;;  %v755_v42 = vpop.permute.xlu0 %754 }
  0xfa   : > { %1749 = vst [vmem:[%s2861_s24 + $0x118] sm:$0xff] %v761_v41  ;;  %1747 = vst [vmem:[%s2861_s24 + $0x110] sm:$0xff] %v755_v42  ;;  %1132 = vperm.xlu1 %2465, %v2337_v39   ;;  %1126 = vperm.xlu0 %4, %v2335_v40   ;;  %v2401_v40 = vld [vmem:[%s2793_s20 + $0x388] sm:$0xff]  ;;  %v2399_v41 = vld [vmem:[%s2793_s20 + $0x380] sm:$0xff] }
  0xfd   : > { %v773_v45 = vpop.permute.xlu1 %772  ;;  %v767_v46 = vpop.permute.xlu0 %766 }
  0xfe   : > { %1753 = vst [vmem:[%s2861_s24 + $0x128] sm:$0xff] %v773_v45  ;;  %1751 = vst [vmem:[%s2861_s24 + $0x120] sm:$0xff] %v767_v46  ;;  %1144 = vperm.xlu1 %2465, %v2341_v43   ;;  %1138 = vperm.xlu0 %4, %v2339_v44   ;;  %v2405_v44 = vld [vmem:[%s2793_s20 + $0x398] sm:$0xff]  ;;  %v2403_v45 = vld [vmem:[%s2793_s20 + $0x390] sm:$0xff] }
 0x101   : > { %v785_v49 = vpop.permute.xlu1 %784  ;;  %v779_v50 = vpop.permute.xlu0 %778 }
 0x102   : > { %1757 = vst [vmem:[%s2861_s24 + $0x138] sm:$0xff] %v785_v49  ;;  %1755 = vst [vmem:[%s2861_s24 + $0x130] sm:$0xff] %v779_v50  ;;  %1156 = vperm.xlu1 %2465, %v2345_v47   ;;  %1150 = vperm.xlu0 %4, %v2343_v48   ;;  %v2409_v48 = vld [vmem:[%s2793_s20 + $0x3a8] sm:$0xff]  ;;  %v2407_v49 = vld [vmem:[%s2793_s20 + $0x3a0] sm:$0xff] }
 0x105   : > { %v797_v53 = vpop.permute.xlu1 %796  ;;  %v791_v54 = vpop.permute.xlu0 %790 }
 0x106   : > { %1761 = vst [vmem:[%s2861_s24 + $0x148] sm:$0xff] %v797_v53  ;;  %1759 = vst [vmem:[%s2861_s24 + $0x140] sm:$0xff] %v791_v54  ;;  %1168 = vperm.xlu1 %2465, %v2349_v51   ;;  %1162 = vperm.xlu0 %4, %v2347_v52   ;;  %v2413_v52 = vld [vmem:[%s2793_s20 + $0x3b8] sm:$0xff]  ;;  %v2411_v53 = vld [vmem:[%s2793_s20 + $0x3b0] sm:$0xff] }
 0x109   : > { %v809_v57 = vpop.permute.xlu1 %808  ;;  %v803_v58 = vpop.permute.xlu0 %802 }
 0x10a   : > { %1765 = vst [vmem:[%s2861_s24 + $0x158] sm:$0xff] %v809_v57  ;;  %1763 = vst [vmem:[%s2861_s24 + $0x150] sm:$0xff] %v803_v58  ;;  %1180 = vperm.xlu1 %2465, %v2353_v55   ;;  %1174 = vperm.xlu0 %4, %v2351_v56   ;;  %v2417_v56 = vld [vmem:[%s2793_s20 + $0x3c8] sm:$0xff]  ;;  %v2415_v57 = vld [vmem:[%s2793_s20 + $0x3c0] sm:$0xff] }
 0x10d   : > { %v821_v61 = vpop.permute.xlu1 %820  ;;  %v815_v62 = vpop.permute.xlu0 %814 }
 0x10e   : > { %1769 = vst [vmem:[%s2861_s24 + $0x168] sm:$0xff] %v821_v61  ;;  %1767 = vst [vmem:[%s2861_s24 + $0x160] sm:$0xff] %v815_v62  ;;  %1192 = vperm.xlu1 %2465, %v2357_v59   ;;  %1186 = vperm.xlu0 %4, %v2355_v60   ;;  %v2421_v60 = vld [vmem:[%s2793_s20 + $0x3d8] sm:$0xff]  ;;  %v2419_v61 = vld [vmem:[%s2793_s20 + $0x3d0] sm:$0xff] }
 0x111   : > { %v833_v2 = vpop.permute.xlu1 %832  ;;  %v827_v3 = vpop.permute.xlu0 %826 }
 0x112   : > { %1773 = vst [vmem:[%s2861_s24 + $0x178] sm:$0xff] %v833_v2  ;;  %1771 = vst [vmem:[%s2861_s24 + $0x170] sm:$0xff] %v827_v3  ;;  %1204 = vperm.xlu1 %2465, %v2361_v63   ;;  %1198 = vperm.xlu0 %4, %v2359_v0   ;;  %v2425_v0 = vld [vmem:[%s2793_s20 + $0x3e8] sm:$0xff]  ;;  %v2423_v2 = vld [vmem:[%s2793_s20 + $0x3e0] sm:$0xff] }
 0x115   : > { %v845_v6 = vpop.permute.xlu1 %844  ;;  %v839_v7 = vpop.permute.xlu0 %838 }
 0x116   : > { %1777 = vst [vmem:[%s2861_s24 + $0x208] sm:$0xff] %v845_v6  ;;  %1775 = vst [vmem:[%s2861_s24 + $0x200] sm:$0xff] %v839_v7  ;;  %1216 = vperm.xlu1 %2465, %v2365_v4   ;;  %1210 = vperm.xlu0 %4, %v2363_v5   ;;  %v2429_v5 = vld [vmem:[%s2793_s20 + $0x3f8] sm:$0xff]  ;;  %v2427_v6 = vld [vmem:[%s2793_s20 + $0x3f0] sm:$0xff] }
 0x119   : > { %v857_v10 = vpop.permute.xlu1 %856  ;;  %v851_v11 = vpop.permute.xlu0 %850 }
 0x11a   : > { %1781 = vst [vmem:[%s2861_s24 + $0x218] sm:$0xff] %v857_v10  ;;  %1779 = vst [vmem:[%s2861_s24 + $0x210] sm:$0xff] %v851_v11  ;;  %1228 = vperm.xlu1 %2465, %v2369_v8   ;;  %1222 = vperm.xlu0 %4, %v2367_v9  }
 0x11d   : > { %v869_v14 = vpop.permute.xlu1 %868  ;;  %v863_v15 = vpop.permute.xlu0 %862 }
 0x11e   : > { %1785 = vst [vmem:[%s2861_s24 + $0x228] sm:$0xff] %v869_v14  ;;  %1783 = vst [vmem:[%s2861_s24 + $0x220] sm:$0xff] %v863_v15  ;;  %1240 = vperm.xlu1 %2465, %v2373_v12   ;;  %1234 = vperm.xlu0 %4, %v2371_v13  }
 0x121   : > { %v881_v18 = vpop.permute.xlu1 %880  ;;  %v875_v19 = vpop.permute.xlu0 %874 }
 0x122   : > { %1789 = vst [vmem:[%s2861_s24 + $0x238] sm:$0xff] %v881_v18  ;;  %1787 = vst [vmem:[%s2861_s24 + $0x230] sm:$0xff] %v875_v19  ;;  %1252 = vperm.xlu1 %2465, %v2377_v16   ;;  %1246 = vperm.xlu0 %4, %v2375_v17  }
 0x125   : > { %v893_v22 = vpop.permute.xlu1 %892  ;;  %v887_v23 = vpop.permute.xlu0 %886 }
 0x126   : > { %1793 = vst [vmem:[%s2861_s24 + $0x248] sm:$0xff] %v893_v22  ;;  %1791 = vst [vmem:[%s2861_s24 + $0x240] sm:$0xff] %v887_v23  ;;  %1264 = vperm.xlu1 %2465, %v2381_v20   ;;  %1258 = vperm.xlu0 %4, %v2379_v21  }
 0x129   : > { %v905_v26 = vpop.permute.xlu1 %904  ;;  %v899_v27 = vpop.permute.xlu0 %898 }
 0x12a   : > { %1797 = vst [vmem:[%s2861_s24 + $0x258] sm:$0xff] %v905_v26  ;;  %1795 = vst [vmem:[%s2861_s24 + $0x250] sm:$0xff] %v899_v27  ;;  %1276 = vperm.xlu1 %2465, %v2385_v24   ;;  %1270 = vperm.xlu0 %4, %v2383_v25  }
 0x12d   : > { %v917_v30 = vpop.permute.xlu1 %916  ;;  %v911_v31 = vpop.permute.xlu0 %910 }
 0x12e   : > { %1801 = vst [vmem:[%s2861_s24 + $0x268] sm:$0xff] %v917_v30  ;;  %1799 = vst [vmem:[%s2861_s24 + $0x260] sm:$0xff] %v911_v31  ;;  %1288 = vperm.xlu1 %2465, %v2389_v28   ;;  %1282 = vperm.xlu0 %4, %v2387_v29  }
 0x131   : > { %v929_v34 = vpop.permute.xlu1 %928  ;;  %v923_v35 = vpop.permute.xlu0 %922 }
 0x132   : > { %1805 = vst [vmem:[%s2861_s24 + $0x278] sm:$0xff] %v929_v34  ;;  %1803 = vst [vmem:[%s2861_s24 + $0x270] sm:$0xff] %v923_v35  ;;  %1300 = vperm.xlu1 %2465, %v2393_v32   ;;  %1294 = vperm.xlu0 %4, %v2391_v33  }
 0x135   : > { %v941_v38 = vpop.permute.xlu1 %940  ;;  %v935_v39 = vpop.permute.xlu0 %934 }
 0x136   : > { %1809 = vst [vmem:[%s2861_s24 + $0x308] sm:$0xff] %v941_v38  ;;  %1807 = vst [vmem:[%s2861_s24 + $0x300] sm:$0xff] %v935_v39  ;;  %1312 = vperm.xlu1 %2465, %v2397_v36   ;;  %1306 = vperm.xlu0 %4, %v2395_v37  }
 0x139   : > { %v953_v42 = vpop.permute.xlu1 %952  ;;  %v947_v43 = vpop.permute.xlu0 %946 }
 0x13a   : > { %1813 = vst [vmem:[%s2861_s24 + $0x318] sm:$0xff] %v953_v42  ;;  %1811 = vst [vmem:[%s2861_s24 + $0x310] sm:$0xff] %v947_v43  ;;  %1324 = vperm.xlu1 %2465, %v2401_v40   ;;  %1318 = vperm.xlu0 %4, %v2399_v41  }
 0x13d   : > { %v965_v46 = vpop.permute.xlu1 %964  ;;  %v959_v47 = vpop.permute.xlu0 %958 }
 0x13e   : > { %1817 = vst [vmem:[%s2861_s24 + $0x328] sm:$0xff] %v965_v46  ;;  %1815 = vst [vmem:[%s2861_s24 + $0x320] sm:$0xff] %v959_v47  ;;  %1336 = vperm.xlu1 %2465, %v2405_v44   ;;  %1330 = vperm.xlu0 %4, %v2403_v45  }
 0x141   : > { %v977_v50 = vpop.permute.xlu1 %976  ;;  %v971_v51 = vpop.permute.xlu0 %970 }
 0x142   : > { %1821 = vst [vmem:[%s2861_s24 + $0x338] sm:$0xff] %v977_v50  ;;  %1819 = vst [vmem:[%s2861_s24 + $0x330] sm:$0xff] %v971_v51  ;;  %1348 = vperm.xlu1 %2465, %v2409_v48   ;;  %1342 = vperm.xlu0 %4, %v2407_v49  }
 0x145   : > { %v989_v54 = vpop.permute.xlu1 %988  ;;  %v983_v55 = vpop.permute.xlu0 %982 }
 0x146   : > { %1825 = vst [vmem:[%s2861_s24 + $0x348] sm:$0xff] %v989_v54  ;;  %1823 = vst [vmem:[%s2861_s24 + $0x340] sm:$0xff] %v983_v55  ;;  %1360 = vperm.xlu1 %2465, %v2413_v52   ;;  %1354 = vperm.xlu0 %4, %v2411_v53  }
 0x149   : > { %v1001_v58 = vpop.permute.xlu1 %1000  ;;  %v995_v59 = vpop.permute.xlu0 %994 }
 0x14a   : > { %1829 = vst [vmem:[%s2861_s24 + $0x358] sm:$0xff] %v1001_v58  ;;  %1827 = vst [vmem:[%s2861_s24 + $0x350] sm:$0xff] %v995_v59  ;;  %1372 = vperm.xlu1 %2465, %v2417_v56   ;;  %1366 = vperm.xlu0 %4, %v2415_v57  }
 0x14d   : > { %v1013_v62 = vpop.permute.xlu1 %1012  ;;  %v1007_v63 = vpop.permute.xlu0 %1006 }
 0x14e   : > { %1833 = vst [vmem:[%s2861_s24 + $0x368] sm:$0xff] %v1013_v62  ;;  %1831 = vst [vmem:[%s2861_s24 + $0x360] sm:$0xff] %v1007_v63  ;;  %1384 = vperm.xlu1 %2465, %v2421_v60   ;;  %1378 = vperm.xlu0 %4, %v2419_v61  }
 0x151   : > { %v1025_v3 = vpop.permute.xlu1 %1024  ;;  %v1019_v4 = vpop.permute.xlu0 %1018 }
 0x152   : > { %1837 = vst [vmem:[%s2861_s24 + $0x378] sm:$0xff] %v1025_v3  ;;  %1835 = vst [vmem:[%s2861_s24 + $0x370] sm:$0xff] %v1019_v4  ;;  %1396 = vperm.xlu1 %2465, %v2425_v0   ;;  %1390 = vperm.xlu0 %4, %v2423_v2  }
 0x155   : > { %v1037_v7 = vpop.permute.xlu1 %1036  ;;  %v1031_v8 = vpop.permute.xlu0 %1030 }
 0x156   : > { %1841 = vst [vmem:[%s2861_s24 + $0x408] sm:$0xff] %v1037_v7  ;;  %1839 = vst [vmem:[%s2861_s24 + $0x400] sm:$0xff] %v1031_v8  ;;  %1408 = vperm.xlu1 %2465, %v2429_v5   ;;  %1402 = vperm.xlu0 %4, %v2427_v6  }
 0x159   : > { %v1049_v9 = vpop.permute.xlu1 %1048  ;;  %v1043_v10 = vpop.permute.xlu0 %1042 }
 0x15a   : > { %1845 = vst [vmem:[%s2861_s24 + $0x418] sm:$0xff] %v1049_v9  ;;  %1843 = vst [vmem:[%s2861_s24 + $0x410] sm:$0xff] %v1043_v10 }
 0x15d   : > { %v1061_v11 = vpop.permute.xlu1 %1060  ;;  %v1055_v12 = vpop.permute.xlu0 %1054 }
 0x15e   : > { %1849 = vst [vmem:[%s2861_s24 + $0x428] sm:$0xff] %v1061_v11  ;;  %1847 = vst [vmem:[%s2861_s24 + $0x420] sm:$0xff] %v1055_v12 }
 0x161   : > { %v1073_v13 = vpop.permute.xlu1 %1072  ;;  %v1067_v14 = vpop.permute.xlu0 %1066 }
 0x162   : > { %1853 = vst [vmem:[%s2861_s24 + $0x438] sm:$0xff] %v1073_v13  ;;  %1851 = vst [vmem:[%s2861_s24 + $0x430] sm:$0xff] %v1067_v14 }
 0x165   : > { %v1085_v15 = vpop.permute.xlu1 %1084  ;;  %v1079_v16 = vpop.permute.xlu0 %1078 }
 0x166   : > { %1857 = vst [vmem:[%s2861_s24 + $0x448] sm:$0xff] %v1085_v15  ;;  %1855 = vst [vmem:[%s2861_s24 + $0x440] sm:$0xff] %v1079_v16 }
 0x169   : > { %v1097_v17 = vpop.permute.xlu1 %1096  ;;  %v1091_v18 = vpop.permute.xlu0 %1090 }
 0x16a   : > { %1861 = vst [vmem:[%s2861_s24 + $0x458] sm:$0xff] %v1097_v17  ;;  %1859 = vst [vmem:[%s2861_s24 + $0x450] sm:$0xff] %v1091_v18 }
 0x16d   : > { %v1109_v19 = vpop.permute.xlu1 %1108  ;;  %v1103_v20 = vpop.permute.xlu0 %1102 }
 0x16e   : > { %1865 = vst [vmem:[%s2861_s24 + $0x468] sm:$0xff] %v1109_v19  ;;  %1863 = vst [vmem:[%s2861_s24 + $0x460] sm:$0xff] %v1103_v20 }
 0x171   : > { %v1121_v21 = vpop.permute.xlu1 %1120  ;;  %v1115_v22 = vpop.permute.xlu0 %1114 }
 0x172   : > { %1869 = vst [vmem:[%s2861_s24 + $0x478] sm:$0xff] %v1121_v21  ;;  %1867 = vst [vmem:[%s2861_s24 + $0x470] sm:$0xff] %v1115_v22 }
 0x175   : > { %v1133_v23 = vpop.permute.xlu1 %1132  ;;  %v1127_v24 = vpop.permute.xlu0 %1126 }
 0x176   : > { %1873 = vst [vmem:[%s2861_s24 + $0x508] sm:$0xff] %v1133_v23  ;;  %1871 = vst [vmem:[%s2861_s24 + $0x500] sm:$0xff] %v1127_v24 }
 0x179   : > { %v1145_v25 = vpop.permute.xlu1 %1144  ;;  %v1139_v26 = vpop.permute.xlu0 %1138 }
 0x17a   : > { %1877 = vst [vmem:[%s2861_s24 + $0x518] sm:$0xff] %v1145_v25  ;;  %1875 = vst [vmem:[%s2861_s24 + $0x510] sm:$0xff] %v1139_v26 }
 0x17d   : > { %v1157_v27 = vpop.permute.xlu1 %1156  ;;  %v1151_v28 = vpop.permute.xlu0 %1150 }
 0x17e   : > { %1881 = vst [vmem:[%s2861_s24 + $0x528] sm:$0xff] %v1157_v27  ;;  %1879 = vst [vmem:[%s2861_s24 + $0x520] sm:$0xff] %v1151_v28 }
 0x181   : > { %v1169_v29 = vpop.permute.xlu1 %1168  ;;  %v1163_v30 = vpop.permute.xlu0 %1162 }
 0x182   : > { %1885 = vst [vmem:[%s2861_s24 + $0x538] sm:$0xff] %v1169_v29  ;;  %1883 = vst [vmem:[%s2861_s24 + $0x530] sm:$0xff] %v1163_v30 }
 0x185   : > { %v1181_v31 = vpop.permute.xlu1 %1180  ;;  %v1175_v32 = vpop.permute.xlu0 %1174 }
 0x186   : > { %1889 = vst [vmem:[%s2861_s24 + $0x548] sm:$0xff] %v1181_v31  ;;  %1887 = vst [vmem:[%s2861_s24 + $0x540] sm:$0xff] %v1175_v32 }
 0x189   : > { %v1193_v33 = vpop.permute.xlu1 %1192  ;;  %v1187_v34 = vpop.permute.xlu0 %1186 }
 0x18a   : > { %1893 = vst [vmem:[%s2861_s24 + $0x558] sm:$0xff] %v1193_v33  ;;  %1891 = vst [vmem:[%s2861_s24 + $0x550] sm:$0xff] %v1187_v34 }
 0x18d   : > { %v1205_v35 = vpop.permute.xlu1 %1204  ;;  %v1199_v36 = vpop.permute.xlu0 %1198 }
 0x18e   : > { %1897 = vst [vmem:[%s2861_s24 + $0x568] sm:$0xff] %v1205_v35  ;;  %1895 = vst [vmem:[%s2861_s24 + $0x560] sm:$0xff] %v1199_v36 }
 0x191   : > { %v1217_v37 = vpop.permute.xlu1 %1216  ;;  %v1211_v38 = vpop.permute.xlu0 %1210 }
 0x192   : > { %1901 = vst [vmem:[%s2861_s24 + $0x578] sm:$0xff] %v1217_v37  ;;  %1899 = vst [vmem:[%s2861_s24 + $0x570] sm:$0xff] %v1211_v38 }
 0x195   : > { %v1229_v39 = vpop.permute.xlu1 %1228  ;;  %v1223_v40 = vpop.permute.xlu0 %1222 }
 0x196   : > { %1905 = vst [vmem:[%s2861_s24 + $0x608] sm:$0xff] %v1229_v39  ;;  %1903 = vst [vmem:[%s2861_s24 + $0x600] sm:$0xff] %v1223_v40 }
 0x199   : > { %v1241_v41 = vpop.permute.xlu1 %1240  ;;  %v1235_v42 = vpop.permute.xlu0 %1234 }
 0x19a   : > { %1909 = vst [vmem:[%s2861_s24 + $0x618] sm:$0xff] %v1241_v41  ;;  %1907 = vst [vmem:[%s2861_s24 + $0x610] sm:$0xff] %v1235_v42 }
 0x19d   : > { %v1253_v43 = vpop.permute.xlu1 %1252  ;;  %v1247_v44 = vpop.permute.xlu0 %1246 }
 0x19e   : > { %1913 = vst [vmem:[%s2861_s24 + $0x628] sm:$0xff] %v1253_v43  ;;  %1911 = vst [vmem:[%s2861_s24 + $0x620] sm:$0xff] %v1247_v44 }
 0x1a1   : > { %v1265_v45 = vpop.permute.xlu1 %1264  ;;  %v1259_v46 = vpop.permute.xlu0 %1258 }
 0x1a2   : > { %1917 = vst [vmem:[%s2861_s24 + $0x638] sm:$0xff] %v1265_v45  ;;  %1915 = vst [vmem:[%s2861_s24 + $0x630] sm:$0xff] %v1259_v46 }
 0x1a5   : > { %v1277_v47 = vpop.permute.xlu1 %1276  ;;  %v1271_v48 = vpop.permute.xlu0 %1270 }
 0x1a6   : > { %1921 = vst [vmem:[%s2861_s24 + $0x648] sm:$0xff] %v1277_v47  ;;  %1919 = vst [vmem:[%s2861_s24 + $0x640] sm:$0xff] %v1271_v48 }
 0x1a9   : > { %v1289_v49 = vpop.permute.xlu1 %1288  ;;  %v1283_v50 = vpop.permute.xlu0 %1282 }
 0x1aa   : > { %1925 = vst [vmem:[%s2861_s24 + $0x658] sm:$0xff] %v1289_v49  ;;  %1923 = vst [vmem:[%s2861_s24 + $0x650] sm:$0xff] %v1283_v50 }
 0x1ad   : > { %v1301_v51 = vpop.permute.xlu1 %1300  ;;  %v1295_v52 = vpop.permute.xlu0 %1294 }
 0x1ae   : > { %1929 = vst [vmem:[%s2861_s24 + $0x668] sm:$0xff] %v1301_v51  ;;  %1927 = vst [vmem:[%s2861_s24 + $0x660] sm:$0xff] %v1295_v52 }
 0x1b1   : > { %v1313_v53 = vpop.permute.xlu1 %1312  ;;  %v1307_v54 = vpop.permute.xlu0 %1306 }
 0x1b2   : > { %1933 = vst [vmem:[%s2861_s24 + $0x678] sm:$0xff] %v1313_v53  ;;  %1931 = vst [vmem:[%s2861_s24 + $0x670] sm:$0xff] %v1307_v54 }
 0x1b5   : > { %v1325_v55 = vpop.permute.xlu1 %1324  ;;  %v1319_v56 = vpop.permute.xlu0 %1318 }
 0x1b6   : > { %1937 = vst [vmem:[%s2861_s24 + $0x708] sm:$0xff] %v1325_v55  ;;  %1935 = vst [vmem:[%s2861_s24 + $0x700] sm:$0xff] %v1319_v56 }
 0x1b9   : > { %v1337_v57 = vpop.permute.xlu1 %1336  ;;  %v1331_v58 = vpop.permute.xlu0 %1330 }
 0x1ba   : > { %1941 = vst [vmem:[%s2861_s24 + $0x718] sm:$0xff] %v1337_v57  ;;  %1939 = vst [vmem:[%s2861_s24 + $0x710] sm:$0xff] %v1331_v58 }
 0x1bd   : > { %v1349_v59 = vpop.permute.xlu1 %1348  ;;  %v1343_v60 = vpop.permute.xlu0 %1342 }
 0x1be   : > { %1945 = vst [vmem:[%s2861_s24 + $0x728] sm:$0xff] %v1349_v59  ;;  %1943 = vst [vmem:[%s2861_s24 + $0x720] sm:$0xff] %v1343_v60 }
 0x1c1   : > { %v1361_v61 = vpop.permute.xlu1 %1360  ;;  %v1355_v62 = vpop.permute.xlu0 %1354 }
 0x1c2   : > { %1949 = vst [vmem:[%s2861_s24 + $0x738] sm:$0xff] %v1361_v61  ;;  %1947 = vst [vmem:[%s2861_s24 + $0x730] sm:$0xff] %v1355_v62 }
 0x1c5   : > { %v1373_v63 = vpop.permute.xlu1 %1372  ;;  %v1367_v0 = vpop.permute.xlu0 %1366 }
 0x1c6   : > { %1953 = vst [vmem:[%s2861_s24 + $0x748] sm:$0xff] %v1373_v63  ;;  %1951 = vst [vmem:[%s2861_s24 + $0x740] sm:$0xff] %v1367_v0 }
 0x1c9   : > { %v1385_v2 = vpop.permute.xlu1 %1384  ;;  %v1379_v3 = vpop.permute.xlu0 %1378 }
 0x1ca   : > { %1957 = vst [vmem:[%s2861_s24 + $0x758] sm:$0xff] %v1385_v2  ;;  %1955 = vst [vmem:[%s2861_s24 + $0x750] sm:$0xff] %v1379_v3 }
 0x1cd   : > { %v1397_v4 = vpop.permute.xlu1 %1396  ;;  %v1391_v5 = vpop.permute.xlu0 %1390 }
 0x1ce   : > { %1961 = vst [vmem:[%s2861_s24 + $0x768] sm:$0xff] %v1397_v4  ;;  %1959 = vst [vmem:[%s2861_s24 + $0x760] sm:$0xff] %v1391_v5 }
 0x1d1   : > { %v1409_v6 = vpop.permute.xlu1 %1408  ;;  %v1403_v7 = vpop.permute.xlu0 %1402 }
 0x1d2   : > { %1965 = vst [vmem:[%s2861_s24 + $0x778] sm:$0xff] %v1409_v6  ;;  %1963 = vst [vmem:[%s2861_s24 + $0x770] sm:$0xff] %v1403_v7 }
 0x1d3 PF: > { %s10_s8 = sadd.s32 1, %s2488_s8   ;;  %s3068_s6 = smov %s2484_s7 }
 0x1d4   : > { %p7_p5 = scmp.ge.s32.totalorder %s10_s8, 4   ;;  %s3069_s7 = smov %s3071_s10 }
 0x1d6   :  { %9 = sbr.rel (!%p7_p5) target bundleno = 7 (0x7), region = 372 }

// kernel: spectral_conv_forward.3
= control target key start
LH: loop header
LB: loop body
LE: loop exit
PB: predicated region body
PF: predicated region fallthrough
CT: control target
= control target key end

     0   :  { %s3605_s21 = smov 0   ;;  %s3607_s22 = smov 0   ;;  %s3960_s0 = inlined_call_operand.vmem [shape: f32[2,4,4096], index: 0, kind: input, shape index: {}]   ;;  %s3961_s1 = inlined_call_operand.vmem [shape: f32[2,4,4096], index: 1, kind: input, shape index: {}]   ;;  %s3962_s2 = inlined_call_operand.vmem [shape: f32[2,4,4096], index: 2, kind: input, shape index: {}]   ;;  %s3963_s3 = inlined_call_operand.vmem [shape: f32[4,8], index: 3, kind: input, shape index: {}]   ;;  %s3964_s4 = inlined_call_operand.vmem [shape: f32[8,1], index: 4, kind: input, shape index: {}]   ;;  %s3965_s5 = inlined_call_operand.vmem [shape: f32[8,4], index: 5, kind: input, shape index: {}]   ;;  %s3966_s6 = inlined_call_operand.vmem [shape: f32[4,1], index: 6, kind: input, shape index: {}]   ;;  %s3967_s7 = inlined_call_operand.vmem [shape: f32[4,8], index: 7, kind: input, shape index: {}]   ;;  %s3968_s8 = inlined_call_operand.vmem [shape: f32[8,1], index: 8, kind: input, shape index: {}]   ;;  %s3969_s9 = inlined_call_operand.vmem [shape: f32[8,4], index: 9, kind: input, shape index: {}]   ;;  %s3970_s10 = inlined_call_operand.vmem [shape: f32[4,1], index: 10, kind: input, shape index: {}]   ;;  %s3971_s11 = inlined_call_operand.vmem [shape: f32[2,4,4096], index: 11, kind: output, shape index: {0}]   ;;  %s3972_s12 = inlined_call_operand.vmem [shape: f32[2,4,4096], index: 12, kind: output, shape index: {1}]  }
   0x1   :  { %s3609_s23 = smov 0   ;;  %s3611_s24 = smov 0  }
   0x2   :  { %s3613_s25 = smov 0  }
   0x3 LB: > { %s32_s26 = sadd.s32 1, %s3528_s23  ;;  %s35_s27 = sadd.s32 1, %s3532_s24  ;;  %s3536_s25 = sphi %s3613_s25, %s23_s25   ;;  %s3532_s24 = sphi %s3611_s24, %s3976_s24   ;;  %s3528_s23 = sphi %s3609_s23, %s3975_s23   ;;  %s3524_s22 = sphi %s3607_s22, %s3974_s22   ;;  %s3520_s21 = sphi %s3605_s21, %s3973_s21  }
   0x4   : > { %p33_p0 = scmp.ge.s32.totalorder %s32_s26, 2  ;;  %p3372_p1 = scmp.ge.s32.totalorder %s3536_s25, 1 }
   0x5   : > { %p422_p2 = scmp.lt.s32.totalorder %s3536_s25, 5 }
   0x6   : > { %s3978_s26 = smov (%p33_p0, %s32_s26), 0  ;;  %s3980_s27 = smov (!%p33_p0, %s35_s27), %s3532_s24 }
   0x7   : > { %p423_p3 = pnand %p3372_p1, %p422_p2  ;;  %p37_p4 = scmp.ge.s32.totalorder %s3980_s27, 2 }
   0x8   : > { %s3373_s30 = sshll.u32 (!%p423_p3), %s3520_s21, 4  ;;  %p500_p5 = scmp.lt.s32.totalorder (!%p423_p3), %s3524_s22, 1 }
   0x9   : > { %s3982_s27 = smov (%p37_p4, %s3980_s27), 0  ;;  %426 = sbr.rel (%p423_p3) target bundleno = 770 (0x302), region = 64 }
   0xa   : > { %p502_p6 = scmp.lt.s32.totalorder (!%p423_p3), %s3373_s30, 31 }
   0xe   : > { %v589_v0 = vld [vmem:[%s3963_s3] sm:$0xf]  ;;  %v3538_v1 = vmov 0.0   ;;  %s3984_s22 = smov (!%p500_p5, %s3524_s22), 1  ;;  %s3986_s30 = smov (!%p502_p6, %s3373_s30), 31  ;;  %vm648_vm0 = vcmask 1043456  }
   0xf   : > { %596 = vxpose.xlu0.b32.start.end [1/1] (short) (narrow) %v589_v0, 8  ;;  %745 = vmatprep.mubr.f32.mxu0 %v3538_v1  ;;  %s3374_s13 = sshll.u32 %s3984_s22, 5  ;;  %v1265_v45 = vld [vmem:[%s3965_s5] sm:$0xff]  ;;  %v3539_v49 = vmov 0   ;;  %vm644_vm1 = vcmask 31744   ;;  %vm1304_vm2 = vcmask 64512  }
  0x10   : > { %816 = vmatprep.mubr.f32.mxu1 %v3538_v1  ;;  %s505_s14 = sadd.s32 %s3374_s13, %s3986_s30  ;;  %1272 = vxpose.xlu1.b32.start.end [1/1] (short) (narrow) %v1265_v45, 8  ;;  %v1916_v47 = vld [vmem:[%s3967_s7] sm:$0xf] }
  0x11   : > { %s3640_s15 = sshll.u32 %s505_s14, 2  ;;  %v590_v48 = vld [vmem:[%s3964_s4] sm:$0xff] }
  0x12   : > { %s3646_s18 = scalar_lea.vmem %s3960_s0, %s3640_s15  ;;  %s3652_s21 = scalar_lea.vmem %s3961_s1, %s3640_s15  ;;  %v1266_v50 = vld [vmem:[%s3966_s6] sm:$0xf] }
  0x13   : > { %s3658_s29 = scalar_lea.vmem %s3962_s2, %s3640_s15  ;;  %v549_v2 = vld [vmem:[%s3646_s18] sm:$0xff]  ;;  %v550_v4 = vld [vmem:[%s3646_s18 + $0x8] sm:$0xff]  ;;  %v551_v10 = vld [vmem:[%s3646_s18 + $0x10] sm:$0xff]  ;;  %s3879_s17 = scalar_lea.vmem %s3971_s11, %s3640_s15 }
  0x14   : > { %v557_v3 = vld [vmem:[%s3652_s21] sm:$0xff]  ;;  %v558_v7 = vld [vmem:[%s3652_s21 + $0x8] sm:$0xff]  ;;  %v559_v11 = vld [vmem:[%s3652_s21 + $0x10] sm:$0xff]  ;;  %1923 = vxpose.xlu1.b32.start.end [1/1] (short) (narrow) %v1916_v47, 8  ;;  %s3935_s20 = scalar_lea.vmem %s3972_s12, %s3640_s15 }
  0x15   : > { %v565_v5 = vadd.f32 %v557_v3, %v549_v2  ;;  %v573_v6 = vld [vmem:[%s3658_s29] sm:$0xff]  ;;  %v574_v8 = vld [vmem:[%s3658_s29 + $0x8] sm:$0xff]  ;;  %v566_v9 = vadd.f32 %v558_v7, %v550_v4  ;;  %v575_v12 = vld [vmem:[%s3658_s29 + $0x10] sm:$0xff]  ;;  %v567_v14 = vadd.f32 %v559_v11, %v551_v10 }
  0x16   : > { %v552_v15 = vld [vmem:[%s3646_s18 + $0x18] sm:$0xff]  ;;  %v553_v20 = vld [vmem:[%s3646_s18 + $0x20] sm:$0xff]  ;;  %v554_v26 = vld [vmem:[%s3646_s18 + $0x28] sm:$0xff] }
  0x17   : > { %v3669_v13 = vadd.f32 %v573_v6, %v565_v5  ;;  %v560_v16 = vld [vmem:[%s3652_s21 + $0x18] sm:$0xff]  ;;  %v3674_v18 = vadd.f32 %v574_v8, %v566_v9  ;;  %v561_v21 = vld [vmem:[%s3652_s21 + $0x20] sm:$0xff]  ;;  %v3683_v24 = vadd.f32 %v575_v12, %v567_v14  ;;  %v562_v27 = vld [vmem:[%s3652_s21 + $0x28] sm:$0xff] }
  0x18   : > { %v576_v17 = vld [vmem:[%s3658_s29 + $0x18] sm:$0xff]  ;;  %v568_v19 = vadd.f32 %v560_v16, %v552_v15  ;;  %v577_v22 = vld [vmem:[%s3658_s29 + $0x20] sm:$0xff]  ;;  %v569_v25 = vadd.f32 %v561_v21, %v553_v20  ;;  %v578_v28 = vld [vmem:[%s3658_s29 + $0x28] sm:$0xff]  ;;  %v570_v31 = vadd.f32 %v562_v27, %v554_v26 }
  0x19   : > { %v3681_v23 = vcombine.high %v3669_v13, %v3669_v13  ;;  %v3690_v29 = vcombine.high %v3674_v18, %v3674_v18  ;;  %v555_v32 = vld [vmem:[%s3646_s18 + $0x30] sm:$0xff]  ;;  %v3701_v35 = vcombine.high %v3683_v24, %v3683_v24  ;;  %v556_v38 = vld [vmem:[%s3646_s18 + $0x38] sm:$0xff]  ;;  %v2543_v51 = vld [vmem:[%s3970_s10] sm:$0xf] }
  0x1a   : > { %v3692_v30 = vadd.f32 %v576_v17, %v568_v19  ;;  %v563_v33 = vld [vmem:[%s3652_s21 + $0x30] sm:$0xff]  ;;  %v3703_v36 = vadd.f32 %v577_v22, %v569_v25  ;;  %v564_v39 = vld [vmem:[%s3652_s21 + $0x38] sm:$0xff]  ;;  %v3716_v42 = vadd.f32 %v578_v28, %v570_v31  ;;  %v1917_v57 = vld [vmem:[%s3968_s8] sm:$0xff] }
  0x1b   : > { %v579_v34 = vld [vmem:[%s3658_s29 + $0x30] sm:$0xff]  ;;  %3388 = vmatprep.subr.msk.mxu0 %vm648_vm0, %v3681_v23  ;;  %v571_v37 = vadd.f32 %v563_v33, %v555_v32  ;;  %v580_v40 = vld [vmem:[%s3658_s29 + $0x38] sm:$0xff]  ;;  %3391 = vmatprep.subr.msk.mxu1 %vm648_vm0, %v3690_v29  ;;  %v572_v43 = vadd.f32 %v564_v39, %v556_v38  ;;  %v2542_v58 = vld [vmem:[%s3969_s9] sm:$0xff] }
  0x1c   : > { %3389 = vmatpush1.msk.msra.mxu0 %vm648_vm0, %v3669_v13  ;;  %v3714_v41 = vcombine.high %v3692_v30, %v3692_v30  ;;  %3392 = vmatpush1.msk.msra.mxu1 %vm648_vm0, %v3674_v18  ;;  %v3745_v53 = vcombine.high %v3703_v36, %v3703_v36  ;;  %v3749_v54 = vcombine.high %v3716_v42, %v3716_v42 }
  0x1d   : > { %3394 = vmatprep.subr.msk.mxu0 %vm648_vm0, %v3701_v35  ;;  %v3722_v44 = vadd.f32 %v579_v34, %v571_v37  ;;  %v3729_v46 = vadd.f32 %v580_v40, %v572_v43 }
  0x1e   : > { %3397 = vmatprep.subr.msk.mxu1 %vm648_vm0, %v3714_v41 }
  0x1f   : > { %v3765_v55 = vcombine.high %v3722_v44, %v3722_v44  ;;  %v3769_v56 = vcombine.high %v3729_v46, %v3729_v46 }
  0x32   : > { %3497 = vset.pattern.permute.xlu1 %v3539_v49 }
  0x33   : > { %1920 = vperm.xlu1 %3497, %v1917_v57  }
  0x38   : > { %3496 = vset.pattern.permute.xlu0 %v3539_v49 }
  0x39   : > { %593 = vperm.xlu0 %3496, %v590_v48  }
  0x3d   : > { %1269 = vperm.xlu0 %3496, %v1266_v50  }
  0x41   : > { %2546 = vperm.xlu0 %3496, %v2543_v51  }
  0x5c   : > { %2549 = vxpose.xlu1.b32.start.end [1/1] (short) (narrow) %v2542_v58, 8 }
  0x8b   : > { %v612_v52 = vpop.trf.xlu0 }
  0x8c   : > { %3390 = vmatmul.mubr.msk.f32.vlgmr.msra.gmra.mxu0 %vm644_vm1, %v612_v52  ;;  %3393 = vmatmul.mubr.msk.f32.vlgmr.msra.gmra.mxu1 %vm644_vm1, %v612_v52  ;;  %v3801_v9 = vpop.trf.xlu1 }
  0x8d   : > { %3395 = vmatpush1.msk.msra.mxu0 %vm648_vm0, %v3683_v24  ;;  %887 = vmatprep.mubr.f32.mxu0 %v3538_v1 }
  0x8e   : > { %3398 = vmatpush1.msk.msra.mxu1 %vm648_vm0, %v3692_v30  ;;  %958 = vmatprep.mubr.f32.mxu1 %v3538_v1 }
  0x8f   : > { %3400 = vmatprep.subr.msk.mxu0 %vm648_vm0, %v3745_v53  ;;  %3403 = vmatprep.subr.msk.mxu1 %vm648_vm0, %v3749_v54 }
  0x90   : > { %3396 = vmatmul.mubr.msk.f32.vlgmr.msra.gmra.mxu0 %vm644_vm1, %v612_v52  ;;  %3399 = vmatmul.mubr.msk.f32.vlgmr.msra.gmra.mxu1 %vm644_vm1, %v612_v52 }
  0x91   : > { %3401 = vmatpush1.msk.msra.mxu0 %vm648_vm0, %v3703_v36  ;;  %1029 = vmatprep.mubr.f32.mxu0 %v3538_v1 }
  0x92   : > { %3404 = vmatpush1.msk.msra.mxu1 %vm648_vm0, %v3716_v42  ;;  %1100 = vmatprep.mubr.f32.mxu1 %v3538_v1 }
  0x93   : > { %3406 = vmatprep.subr.msk.mxu0 %vm648_vm0, %v3765_v55  ;;  %3409 = vmatprep.subr.msk.mxu1 %vm648_vm0, %v3769_v56 }
  0x94   : > { %3402 = vmatmul.mubr.msk.f32.vlgmr.msra.gmra.mxu0 %vm644_vm1, %v612_v52  ;;  %3405 = vmatmul.mubr.msk.f32.vlgmr.msra.gmra.mxu1 %vm644_vm1, %v612_v52 }
  0x95   : > { %3407 = vmatpush1.msk.msra.mxu0 %vm648_vm0, %v3722_v44  ;;  %1171 = vmatprep.mubr.f32.mxu0 %v3538_v1 }
  0x96   : > { %3410 = vmatpush1.msk.msra.mxu1 %vm648_vm0, %v3729_v46  ;;  %1242 = vmatprep.mubr.f32.mxu1 %v3538_v1 }
  0x98   : > { %3408 = vmatmul.mubr.msk.f32.vlgmr.msra.gmra.mxu0 %vm644_vm1, %v612_v52  ;;  %3411 = vmatmul.mubr.msk.f32.vlgmr.msra.gmra.mxu1 %vm644_vm1, %v612_v52 }
  0x99   : > { %1372 = vmatprep.mubr.f32.mxu0 %v3538_v1  ;;  %1443 = vmatprep.mubr.f32.mxu1 %v3538_v1 }
  0xb4   : > { %v594_v61 = vpop.permute.xlu0 %593 }
 0x14c   : > { %v747_v59 = vpop.f32.mrf.mxu0  ;;  %v818_v60 = vpop.f32.mrf.mxu1 }
 0x14d   : > { %v748_v62 = vadd.f32 %v747_v59, %v594_v61  ;;  %v819_v63 = vadd.f32 %v818_v60, %v594_v61 }
 0x14e   : > { %v749_v0 = vpop.f32.mrf.mxu0  ;;  %v820_v2 = vpop.f32.mrf.mxu1 }
 0x14f   : > { %v750_v3 = vadd.f32 %v749_v0, %v594_v61  ;;  %v821_v4 = vadd.f32 %v820_v2, %v594_v61  ;;  %v1249_v10 = vmax.f32 %v748_v62, 0.0  ;;  %v1251_v11 = vmax.f32 %v819_v63, 0.0 }
 0x150   : > { %v889_v5 = vpop.f32.mrf.mxu0  ;;  %v960_v6 = vpop.f32.mrf.mxu1 }
 0x151   : > { %v1250_v7 = vmax.f32 %v750_v3, 0.0  ;;  %v1252_v8 = vmax.f32 %v821_v4, 0.0  ;;  %v890_v12 = vadd.f32 %v889_v5, %v594_v61  ;;  %v961_v14 = vadd.f32 %v960_v6, %v594_v61 }
 0x152   : > { %v891_v15 = vpop.f32.mrf.mxu0  ;;  %v962_v16 = vpop.f32.mrf.mxu1 }
 0x153   : > { %v892_v17 = vadd.f32 %v891_v15, %v594_v61  ;;  %v963_v19 = vadd.f32 %v962_v16, %v594_v61  ;;  %1338 = vmatprep.subr.mxu0 %v1250_v7  ;;  %1409 = vmatprep.subr.mxu1 %v1252_v8  ;;  %v1253_v26 = vmax.f32 %v890_v12, 0.0  ;;  %v1255_v27 = vmax.f32 %v961_v14, 0.0 }
 0x154   : > { %v1031_v20 = vpop.f32.mrf.mxu0  ;;  %v1102_v21 = vpop.f32.mrf.mxu1  ;;  %1339 = vmatpush1.msra.mxu0 %v1249_v10  ;;  %1410 = vmatpush1.msra.mxu1 %v1251_v11 }
 0x155   : > { %v1254_v22 = vmax.f32 %v892_v17, 0.0  ;;  %v1256_v25 = vmax.f32 %v963_v19, 0.0  ;;  %3412 = vmatmul.mubr.msk.f32.vlgmr.msra.gmra.mxu0 %vm1304_vm2, %v3801_v9  ;;  %3413 = vmatmul.mubr.msk.f32.vlgmr.msra.gmra.mxu1 %vm1304_vm2, %v3801_v9  ;;  %v1032_v28 = vadd.f32 %v1031_v20, %v594_v61  ;;  %v1103_v31 = vadd.f32 %v1102_v21, %v594_v61 }
 0x156   : > { %v1033_v32 = vpop.f32.mrf.mxu0  ;;  %v1104_v33 = vpop.f32.mrf.mxu1  ;;  %1514 = vmatprep.mubr.f32.mxu0 %v3538_v1  ;;  %1585 = vmatprep.mubr.f32.mxu1 %v3538_v1 }
 0x157   : > { %v1034_v34 = vadd.f32 %v1033_v32, %v594_v61  ;;  %v1105_v37 = vadd.f32 %v1104_v33, %v594_v61  ;;  %1480 = vmatprep.subr.mxu0 %v1254_v22  ;;  %1551 = vmatprep.subr.mxu1 %v1256_v25  ;;  %v1257_v45 = vmax.f32 %v1032_v28, 0.0  ;;  %v1259_v47 = vmax.f32 %v1103_v31, 0.0 }
 0x158   : > { %v1173_v38 = vpop.f32.mrf.mxu0  ;;  %v1244_v39 = vpop.f32.mrf.mxu1  ;;  %1481 = vmatpush1.msra.mxu0 %v1253_v26  ;;  %1552 = vmatpush1.msra.mxu1 %v1255_v27 }
 0x159   : > { %v1258_v40 = vmax.f32 %v1034_v34, 0.0  ;;  %v1260_v43 = vmax.f32 %v1105_v37, 0.0  ;;  %3414 = vmatmul.mubr.msk.f32.vlgmr.msra.gmra.mxu0 %vm1304_vm2, %v3801_v9  ;;  %3415 = vmatmul.mubr.msk.f32.vlgmr.msra.gmra.mxu1 %vm1304_vm2, %v3801_v9  ;;  %v1174_v48 = vadd.f32 %v1173_v38, %v594_v61  ;;  %v1245_v49 = vadd.f32 %v1244_v39, %v594_v61 }
 0x15a   : > { %v1175_v50 = vpop.f32.mrf.mxu0  ;;  %v1246_v51 = vpop.f32.mrf.mxu1  ;;  %1656 = vmatprep.mubr.f32.mxu0 %v3538_v1  ;;  %1727 = vmatprep.mubr.f32.mxu1 %v3538_v1 }
 0x15b   : > { %v1176_v52 = vadd.f32 %v1175_v50, %v594_v61  ;;  %v1247_v57 = vadd.f32 %v1246_v51, %v594_v61  ;;  %1622 = vmatprep.subr.mxu0 %v1258_v40  ;;  %1693 = vmatprep.subr.mxu1 %v1260_v43  ;;  %v1261_v60 = vmax.f32 %v1174_v48, 0.0  ;;  %v1263_v62 = vmax.f32 %v1245_v49, 0.0  ;;  %v1939_v61 = vpop.trf.xlu1 }
 0x15c   : > { %1623 = vmatpush1.msra.mxu0 %v1257_v45  ;;  %1694 = vmatpush1.msra.mxu1 %v1259_v47 }
 0x15d   : > { %v1262_v58 = vmax.f32 %v1176_v52, 0.0  ;;  %v1264_v59 = vmax.f32 %v1247_v57, 0.0  ;;  %3416 = vmatmul.mubr.msk.f32.vlgmr.msra.gmra.mxu0 %vm1304_vm2, %v3801_v9  ;;  %3417 = vmatmul.mubr.msk.f32.vlgmr.msra.gmra.mxu1 %vm1304_vm2, %v3801_v9 }
 0x15e   : > { %1798 = vmatprep.mubr.f32.mxu0 %v3538_v1  ;;  %1869 = vmatprep.mubr.f32.mxu1 %v3538_v1 }
 0x15f   : > { %1764 = vmatprep.subr.mxu0 %v1262_v58  ;;  %1835 = vmatprep.subr.mxu1 %v1264_v59  ;;  %v3887_v31 = vpop.permute.xlu1 %1920 }
 0x160   : > { %1765 = vmatpush1.msra.mxu0 %v1261_v60  ;;  %1836 = vmatpush1.msra.mxu1 %v1263_v62 }
 0x161   : > { %3418 = vmatmul.mubr.msk.f32.vlgmr.msra.gmra.mxu0 %vm1304_vm2, %v3801_v9  ;;  %3419 = vmatmul.mubr.msk.f32.vlgmr.msra.gmra.mxu1 %vm1304_vm2, %v3801_v9 }
 0x162   : > { %3420 = vmatprep.subr.msk.mxu0 %vm648_vm0, %v3681_v23  ;;  %3423 = vmatprep.subr.msk.mxu1 %vm648_vm0, %v3690_v29  ;;  %v1270_v23 = vpop.permute.xlu0 %1269 }
 0x163   : > { %3421 = vmatpush1.msk.msra.mxu0 %vm648_vm0, %v3669_v13  ;;  %2022 = vmatprep.mubr.f32.mxu0 %v3538_v1  ;;  %v3895_v50 = vpop.trf.xlu1 }
 0x164   : > { %3424 = vmatpush1.msk.msra.mxu1 %vm648_vm0, %v3674_v18  ;;  %2093 = vmatprep.mubr.f32.mxu1 %v3538_v1 }
 0x165   : > { %3422 = vmatmul.mubr.msk.f32.vlgmr.msra.gmra.mxu0 %vm644_vm1, %v1939_v61  ;;  %3425 = vmatmul.mubr.msk.f32.vlgmr.msra.gmra.mxu1 %vm644_vm1, %v1939_v61 }
 0x166   : > { %3426 = vmatprep.subr.msk.mxu0 %vm648_vm0, %v3701_v35  ;;  %3429 = vmatprep.subr.msk.mxu1 %vm648_vm0, %v3714_v41 }
 0x167   : > { %3427 = vmatpush1.msk.msra.mxu0 %vm648_vm0, %v3683_v24  ;;  %2164 = vmatprep.mubr.f32.mxu0 %v3538_v1 }
 0x168   : > { %3430 = vmatpush1.msk.msra.mxu1 %vm648_vm0, %v3692_v30  ;;  %2235 = vmatprep.mubr.f32.mxu1 %v3538_v1 }
 0x169   : > { %3428 = vmatmul.mubr.msk.f32.vlgmr.msra.gmra.mxu0 %vm644_vm1, %v1939_v61  ;;  %3431 = vmatmul.mubr.msk.f32.vlgmr.msra.gmra.mxu1 %vm644_vm1, %v1939_v61 }
 0x16a   : > { %3432 = vmatprep.subr.msk.mxu0 %vm648_vm0, %v3745_v53  ;;  %3435 = vmatprep.subr.msk.mxu1 %vm648_vm0, %v3749_v54 }
 0x16b   : > { %3433 = vmatpush1.msk.msra.mxu0 %vm648_vm0, %v3703_v36  ;;  %2306 = vmatprep.mubr.f32.mxu0 %v3538_v1 }
 0x16c   : > { %3436 = vmatpush1.msk.msra.mxu1 %vm648_vm0, %v3716_v42  ;;  %2377 = vmatprep.mubr.f32.mxu1 %v3538_v1 }
 0x16d   : > { %3434 = vmatmul.mubr.msk.f32.vlgmr.msra.gmra.mxu0 %vm644_vm1, %v1939_v61  ;;  %3437 = vmatmul.mubr.msk.f32.vlgmr.msra.gmra.mxu1 %vm644_vm1, %v1939_v61 }
 0x16e   : > { %3438 = vmatprep.subr.msk.mxu0 %vm648_vm0, %v3765_v55  ;;  %3441 = vmatprep.subr.msk.mxu1 %vm648_vm0, %v3769_v56 }
 0x16f   : > { %3439 = vmatpush1.msk.msra.mxu0 %vm648_vm0, %v3722_v44  ;;  %2448 = vmatprep.mubr.f32.mxu0 %v3538_v1 }
 0x170   : > { %3442 = vmatpush1.msk.msra.mxu1 %vm648_vm0, %v3729_v46  ;;  %2519 = vmatprep.mubr.f32.mxu1 %v3538_v1 }
 0x171   : > { %3440 = vmatmul.mubr.msk.f32.vlgmr.msra.gmra.mxu0 %vm644_vm1, %v1939_v61  ;;  %3443 = vmatmul.mubr.msk.f32.vlgmr.msra.gmra.mxu1 %vm644_vm1, %v1939_v61 }
 0x172   : > { %2648 = vmatprep.mubr.f32.mxu0 %v3538_v1  ;;  %2719 = vmatprep.mubr.f32.mxu1 %v3538_v1 }
 0x215   : > { %v1374_v13 = vpop.f32.mrf.mxu0  ;;  %v1445_v18 = vpop.f32.mrf.mxu1 }
 0x216   : > { %v1375_v30 = vadd.f32 %v1374_v13, %v1270_v23  ;;  %v1446_v35 = vadd.f32 %v1445_v18, %v1270_v23 }
 0x217   : > { %v1376_v24 = vpop.f32.mrf.mxu0  ;;  %v1447_v29 = vpop.f32.mrf.mxu1 }
 0x218   : > { %v1377_v36 = vadd.f32 %v1376_v24, %v1270_v23  ;;  %v1448_v41 = vadd.f32 %v1447_v29, %v1270_v23 }
 0x219   : > { %v1516_v42 = vpop.f32.mrf.mxu0  ;;  %v1587_v44 = vpop.f32.mrf.mxu1 }
 0x21a   : > { %v1892_v46 = vcombine.low %v1375_v30, %v1377_v36  ;;  %v1893_v53 = vcombine.low %v1446_v35, %v1448_v41  ;;  %v1517_v56 = vadd.f32 %v1516_v42, %v1270_v23  ;;  %v1588_v63 = vadd.f32 %v1587_v44, %v1270_v23 }
 0x21b   : > { %v1518_v54 = vpop.f32.mrf.mxu0  ;;  %v1589_v55 = vpop.f32.mrf.mxu1 }
 0x21c   : > { %1908 = vst [vmem:[%s3879_s17] sm:$0xff] %v1892_v46  ;;  %1909 = vst [vmem:[%s3879_s17 + $0x8] sm:$0xff] %v1893_v53  ;;  %v1519_v0 = vadd.f32 %v1518_v54, %v1270_v23  ;;  %v1590_v2 = vadd.f32 %v1589_v55, %v1270_v23 }
 0x21d   : > { %v1658_v3 = vpop.f32.mrf.mxu0  ;;  %v1729_v4 = vpop.f32.mrf.mxu1 }
 0x21e   : > { %v1894_v5 = vcombine.low %v1517_v56, %v1519_v0  ;;  %v1895_v6 = vcombine.low %v1588_v63, %v1590_v2  ;;  %v1659_v9 = vadd.f32 %v1658_v3, %v1270_v23  ;;  %v1730_v10 = vadd.f32 %v1729_v4, %v1270_v23 }
 0x21f   : > { %v1660_v7 = vpop.f32.mrf.mxu0  ;;  %v1731_v8 = vpop.f32.mrf.mxu1 }
 0x220   : > { %1910 = vst [vmem:[%s3879_s17 + $0x10] sm:$0xff] %v1894_v5  ;;  %1911 = vst [vmem:[%s3879_s17 + $0x18] sm:$0xff] %v1895_v6  ;;  %v1661_v11 = vadd.f32 %v1660_v7, %v1270_v23  ;;  %v1732_v12 = vadd.f32 %v1731_v8, %v1270_v23 }
 0x221   : > { %v1800_v14 = vpop.f32.mrf.mxu0  ;;  %v1871_v15 = vpop.f32.mrf.mxu1 }
 0x222   : > { %v1896_v16 = vcombine.low %v1659_v9, %v1661_v11  ;;  %v1897_v17 = vcombine.low %v1730_v10, %v1732_v12  ;;  %v1801_v21 = vadd.f32 %v1800_v14, %v1270_v23  ;;  %v1872_v22 = vadd.f32 %v1871_v15, %v1270_v23  ;;  %v2547_v15 = vpop.permute.xlu0 %2546 }
 0x223   : > { %v1802_v19 = vpop.f32.mrf.mxu0  ;;  %v1873_v20 = vpop.f32.mrf.mxu1 }
 0x224   : > { %1912 = vst [vmem:[%s3879_s17 + $0x20] sm:$0xff] %v1896_v16  ;;  %1913 = vst [vmem:[%s3879_s17 + $0x28] sm:$0xff] %v1897_v17  ;;  %v1803_v25 = vadd.f32 %v1802_v19, %v1270_v23  ;;  %v1874_v26 = vadd.f32 %v1873_v20, %v1270_v23 }
 0x225   : > { %v2024_v27 = vpop.f32.mrf.mxu0  ;;  %v2095_v28 = vpop.f32.mrf.mxu1 }
 0x226   : > { %v1898_v32 = vcombine.low %v1801_v21, %v1803_v25  ;;  %v1899_v33 = vcombine.low %v1872_v22, %v1874_v26  ;;  %v2025_v34 = vadd.f32 %v2024_v27, %v3887_v31  ;;  %v2096_v37 = vadd.f32 %v2095_v28, %v3887_v31 }
 0x227   : > { %v2026_v38 = vpop.f32.mrf.mxu0  ;;  %v2097_v39 = vpop.f32.mrf.mxu1 }
 0x228   : > { %1914 = vst [vmem:[%s3879_s17 + $0x30] sm:$0xff] %v1898_v32  ;;  %1915 = vst [vmem:[%s3879_s17 + $0x38] sm:$0xff] %v1899_v33  ;;  %v2027_v40 = vadd.f32 %v2026_v38, %v3887_v31  ;;  %v2098_v43 = vadd.f32 %v2097_v39, %v3887_v31  ;;  %v2526_v51 = vmax.f32 %v2025_v34, 0.0  ;;  %v2528_v52 = vmax.f32 %v2096_v37, 0.0 }
 0x229   : > { %v2166_v45 = vpop.f32.mrf.mxu0  ;;  %v2237_v47 = vpop.f32.mrf.mxu1 }
 0x22a   : > { %v2527_v48 = vmax.f32 %v2027_v40, 0.0  ;;  %v2529_v49 = vmax.f32 %v2098_v43, 0.0  ;;  %v2167_v57 = vadd.f32 %v2166_v45, %v3887_v31  ;;  %v2238_v58 = vadd.f32 %v2237_v47, %v3887_v31 }
 0x22b   : > { %v2168_v59 = vpop.f32.mrf.mxu0  ;;  %v2239_v60 = vpop.f32.mrf.mxu1 }
 0x22c   : > { %v2169_v62 = vadd.f32 %v2168_v59, %v3887_v31  ;;  %v2240_v61 = vadd.f32 %v2239_v60, %v3887_v31  ;;  %2614 = vmatprep.subr.mxu0 %v2527_v48  ;;  %2685 = vmatprep.subr.mxu1 %v2529_v49  ;;  %v2530_v29 = vmax.f32 %v2167_v57, 0.0  ;;  %v2532_v30 = vmax.f32 %v2238_v58, 0.0 }
 0x22d   : > { %v2308_v13 = vpop.f32.mrf.mxu0  ;;  %v2379_v18 = vpop.f32.mrf.mxu1  ;;  %2615 = vmatpush1.msra.mxu0 %v2526_v51  ;;  %2686 = vmatpush1.msra.mxu1 %v2528_v52 }
 0x22e   : > { %v2531_v23 = vmax.f32 %v2169_v62, 0.0  ;;  %v2533_v24 = vmax.f32 %v2240_v61, 0.0  ;;  %3444 = vmatmul.mubr.msk.f32.vlgmr.msra.gmra.mxu0 %vm1304_vm2, %v3895_v50  ;;  %3445 = vmatmul.mubr.msk.f32.vlgmr.msra.gmra.mxu1 %vm1304_vm2, %v3895_v50  ;;  %v2309_v35 = vadd.f32 %v2308_v13, %v3887_v31  ;;  %v2380_v36 = vadd.f32 %v2379_v18, %v3887_v31 }
 0x22f   : > { %v2310_v41 = vpop.f32.mrf.mxu0  ;;  %v2381_v42 = vpop.f32.mrf.mxu1  ;;  %2790 = vmatprep.mubr.f32.mxu0 %v3538_v1  ;;  %2861 = vmatprep.mubr.f32.mxu1 %v3538_v1 }
 0x230   : > { %v2311_v44 = vadd.f32 %v2310_v41, %v3887_v31  ;;  %v2382_v46 = vadd.f32 %v2381_v42, %v3887_v31  ;;  %2756 = vmatprep.subr.mxu0 %v2531_v23  ;;  %2827 = vmatprep.subr.mxu1 %v2533_v24  ;;  %v2534_v63 = vmax.f32 %v2309_v35, 0.0  ;;  %v2536_v0 = vmax.f32 %v2380_v36, 0.0 }
 0x231   : > { %v2450_v53 = vpop.f32.mrf.mxu0  ;;  %v2521_v54 = vpop.f32.mrf.mxu1  ;;  %2757 = vmatpush1.msra.mxu0 %v2530_v29  ;;  %2828 = vmatpush1.msra.mxu1 %v2532_v30 }
 0x232   : > { %v2535_v55 = vmax.f32 %v2311_v44, 0.0  ;;  %v2537_v56 = vmax.f32 %v2382_v46, 0.0  ;;  %3446 = vmatmul.mubr.msk.f32.vlgmr.msra.gmra.mxu0 %vm1304_vm2, %v3895_v50  ;;  %3447 = vmatmul.mubr.msk.f32.vlgmr.msra.gmra.mxu1 %vm1304_vm2, %v3895_v50  ;;  %v2451_v2 = vadd.f32 %v2450_v53, %v3887_v31  ;;  %v2522_v3 = vadd.f32 %v2521_v54, %v3887_v31 }
 0x233   : > { %v2452_v4 = vpop.f32.mrf.mxu0  ;;  %v2523_v5 = vpop.f32.mrf.mxu1  ;;  %2932 = vmatprep.mubr.f32.mxu0 %v3538_v1  ;;  %3003 = vmatprep.mubr.f32.mxu1 %v3538_v1 }
 0x234   : > { %v2453_v6 = vadd.f32 %v2452_v4, %v3887_v31  ;;  %v2524_v7 = vadd.f32 %v2523_v5, %v3887_v31  ;;  %2898 = vmatprep.subr.mxu0 %v2535_v55  ;;  %2969 = vmatprep.subr.mxu1 %v2537_v56  ;;  %v2538_v10 = vmax.f32 %v2451_v2, 0.0  ;;  %v2540_v11 = vmax.f32 %v2522_v3, 0.0 }
 0x235   : > { %2899 = vmatpush1.msra.mxu0 %v2534_v63  ;;  %2970 = vmatpush1.msra.mxu1 %v2536_v0 }
 0x236   : > { %v2539_v8 = vmax.f32 %v2453_v6, 0.0  ;;  %v2541_v9 = vmax.f32 %v2524_v7, 0.0  ;;  %3448 = vmatmul.mubr.msk.f32.vlgmr.msra.gmra.mxu0 %vm1304_vm2, %v3895_v50  ;;  %3449 = vmatmul.mubr.msk.f32.vlgmr.msra.gmra.mxu1 %vm1304_vm2, %v3895_v50 }
 0x237   : > { %3074 = vmatprep.mubr.f32.mxu0 %v3538_v1  ;;  %3145 = vmatprep.mubr.f32.mxu1 %v3538_v1 }
 0x238   : > { %3040 = vmatprep.subr.mxu0 %v2539_v8  ;;  %3111 = vmatprep.subr.mxu1 %v2541_v9 }
 0x239   : > { %3041 = vmatpush1.msra.mxu0 %v2538_v10  ;;  %3112 = vmatpush1.msra.mxu1 %v2540_v11 }
 0x23a   : > { %3450 = vmatmul.mubr.msk.f32.vlgmr.msra.gmra.mxu0 %vm1304_vm2, %v3895_v50  ;;  %3451 = vmatmul.mubr.msk.f32.vlgmr.msra.gmra.mxu1 %vm1304_vm2, %v3895_v50 }
 0x2ee   : > { %v2650_v12 = vpop.f32.mrf.mxu0  ;;  %v2721_v14 = vpop.f32.mrf.mxu1 }
 0x2ef   : > { %v2651_v19 = vadd.f32 %v2650_v12, %v2547_v15  ;;  %v2722_v20 = vadd.f32 %v2721_v14, %v2547_v15 }
 0x2f0   : > { %v2652_v16 = vpop.f32.mrf.mxu0  ;;  %v2723_v17 = vpop.f32.mrf.mxu1 }
 0x2f1   : > { %v2653_v21 = vadd.f32 %v2652_v16, %v2547_v15  ;;  %v2724_v1 = vadd.f32 %v2723_v17, %v2547_v15 }
 0x2f2   : > { %v2792_v22 = vpop.f32.mrf.mxu0  ;;  %v2863_v25 = vpop.f32.mrf.mxu1 }
 0x2f3   : > { %v3168_v26 = vcombine.low %v2651_v19, %v2653_v21  ;;  %v3169_v27 = vcombine.low %v2722_v20, %v2724_v1  ;;  %v2793_v32 = vadd.f32 %v2792_v22, %v2547_v15  ;;  %v2864_v33 = vadd.f32 %v2863_v25, %v2547_v15 }
 0x2f4   : > { %v2794_v28 = vpop.f32.mrf.mxu0  ;;  %v2865_v31 = vpop.f32.mrf.mxu1 }
 0x2f5   : > { %3184 = vst [vmem:[%s3935_s20] sm:$0xff] %v3168_v26  ;;  %3185 = vst [vmem:[%s3935_s20 + $0x8] sm:$0xff] %v3169_v27  ;;  %v2795_v34 = vadd.f32 %v2794_v28, %v2547_v15  ;;  %v2866_v37 = vadd.f32 %v2865_v31, %v2547_v15 }
 0x2f6   : > { %v2934_v38 = vpop.f32.mrf.mxu0  ;;  %v3005_v39 = vpop.f32.mrf.mxu1 }
 0x2f7   : > { %v3170_v40 = vcombine.low %v2793_v32, %v2795_v34  ;;  %v3171_v43 = vcombine.low %v2864_v33, %v2866_v37  ;;  %v2935_v48 = vadd.f32 %v2934_v38, %v2547_v15  ;;  %v3006_v49 = vadd.f32 %v3005_v39, %v2547_v15 }
 0x2f8   : > { %v2936_v45 = vpop.f32.mrf.mxu0  ;;  %v3007_v47 = vpop.f32.mrf.mxu1 }
 0x2f9   : > { %3186 = vst [vmem:[%s3935_s20 + $0x10] sm:$0xff] %v3170_v40  ;;  %3187 = vst [vmem:[%s3935_s20 + $0x18] sm:$0xff] %v3171_v43  ;;  %v2937_v50 = vadd.f32 %v2936_v45, %v2547_v15  ;;  %v3008_v51 = vadd.f32 %v3007_v47, %v2547_v15 }
 0x2fa   : > { %v3076_v52 = vpop.f32.mrf.mxu0  ;;  %v3147_v57 = vpop.f32.mrf.mxu1 }
 0x2fb   : > { %v3172_v58 = vcombine.low %v2935_v48, %v2937_v50  ;;  %v3173_v59 = vcombine.low %v3006_v49, %v3008_v51  ;;  %v3077_v61 = vadd.f32 %v3076_v52, %v2547_v15  ;;  %v3148_v13 = vadd.f32 %v3147_v57, %v2547_v15 }
 0x2fc   : > { %v3078_v60 = vpop.f32.mrf.mxu0  ;;  %v3149_v62 = vpop.f32.mrf.mxu1 }
 0x2fd   : > { %3188 = vst [vmem:[%s3935_s20 + $0x20] sm:$0xff] %v3172_v58  ;;  %3189 = vst [vmem:[%s3935_s20 + $0x28] sm:$0xff] %v3173_v59  ;;  %v3079_v18 = vadd.f32 %v3078_v60, %v2547_v15  ;;  %v3150_v23 = vadd.f32 %v3149_v62, %v2547_v15 }
 0x2ff   : > { %v3174_v24 = vcombine.low %v3077_v61, %v3079_v18  ;;  %v3175_v29 = vcombine.low %v3148_v13, %v3150_v23 }
 0x301   : > { %3190 = vst [vmem:[%s3935_s20 + $0x30] sm:$0xff] %v3174_v24  ;;  %3191 = vst [vmem:[%s3935_s20 + $0x38] sm:$0xff] %v3175_v29 }
 0x302 PF: > { %s23_s25 = sadd.s32 1, %s3536_s25   ;;  %s3973_s21 = smov %s3528_s23 }
 0x303   : > { %p20_p7 = scmp.ge.s32.totalorder %s23_s25, 6   ;;  %s3974_s22 = smov %s3532_s24 }
 0x304   : > { %s3975_s23 = smov %s3978_s26  ;;  %s3976_s24 = smov %s3982_s27 }
 0x305   :  { %22 = sbr.rel (!%p20_p7) target bundleno = 3 (0x3), region = 112 }

</bundles_post_ra>
